<compile_context>
chip_gen: v7x
topology: tpu7x:2x2x1
jax: 0.10.0
libtpu: 0.0.40
codegen_flags: <defaults>
</compile_context>

<pallas_src>
import jax
import jax.numpy as jnp
from jax.experimental import pallas as pl
from jax.experimental.pallas import tpu as pltpu

HIDDEN = 500  # as in FullyConnectedModel([500, 500, 500, state_dim], ...)


def _round_up(x: int, m: int) -> int:
    return pl.cdiv(x, m) * m


def _env_model_kernel(x_ref,
                      w1_ref, b1_ref,
                      w2_ref, b2_ref,
                      w3_ref, b3_ref,
                      w4_ref, b4_ref,
                      out_ref):
    # layer 1: Linear(state_dim + num_actions, 512p) [+ folded BN] + ReLU
    # x_ref already holds [states || one_hot] padded to a lane-aligned K.
    h = jnp.dot(x_ref[...], w1_ref[...],
                preferred_element_type=jnp.float32) + b1_ref[...]
    h = jnp.maximum(h, 0.0)

    # layer 2: Linear(512p, 512p) [+ folded BN] + ReLU
    h = jnp.dot(h.astype(jnp.bfloat16), w2_ref[...],
                preferred_element_type=jnp.float32) + b2_ref[...]
    h = jnp.maximum(h, 0.0)

    # layer 3: Linear(512p, 512p) [+ folded BN] + ReLU
    h = jnp.dot(h.astype(jnp.bfloat16), w3_ref[...],
                preferred_element_type=jnp.float32) + b3_ref[...]
    h = jnp.maximum(h, 0.0)

    # layer 4: Linear(512p, out_pad) + Sigmoid.
    # Stable sigmoid on the EUP: sigmoid(x) = 0.5 * tanh(0.5*x) + 0.5
    # (no exp overflow, no approximate reciprocal).
    h = jnp.dot(h.astype(jnp.bfloat16), w4_ref[...],
                preferred_element_type=jnp.float32) + b4_ref[...]
    out_ref[...] = (0.5 * jnp.tanh(0.5 * h) + 0.5).astype(out_ref.dtype)


def env_model_forward(states, actions, params, *, num_actions,
                      batch_tile=512, vmem_limit_bytes=None,
                      core_parallel=False, single_buffer_weights=False):
    """EnvModel forward.

    states: (B, state_dim) f32, actions: (B,) int, params: folded-BN weights
    ("w1".."w4" as (in, out), "b1".."b4" as (1, out)).

    batch_tile: rows per grid step; multiple of 128 recommended (256 on
      v6e/v7x MXU height).  512-1024 is the sweet spot for production batches;
      values > 1024 require an explicit vmem_limit_bytes (v7x: 64 MiB VMEM).
    core_parallel: set True on v7x to shard the batch grid across its two
      TensorCores (pltpu.CORE_PARALLEL); leave False on single-TC parts.
    single_buffer_weights: set True (mainly v7x) to single-buffer the resident
      weight blocks via pl.Buffered(1) and reclaim ~2 MB of VMEM.
    """
    B, state_dim = states.shape
    assert batch_tile % 8 == 0, "batch_tile must be a multiple of 8 (sublane)"
    if vmem_limit_bytes is None:
        assert batch_tile <= 1024, (
            "batch_tile > 1024 needs an explicit vmem_limit_bytes "
            "(v7x has 64 MiB VMEM / 32 MiB scoped default)")

    hp = _round_up(HIDDEN, 128)                      # 500 -> 512 hidden width
    op = _round_up(state_dim, 128)                   # lane-dense output width
    kin = state_dim + num_actions
    kp = _round_up(kin, 128)                         # lane-aligned input width

    # Don't over-pad tiny batches: clamp the tile to the 128-rounded batch.
    batch_tile = min(batch_tile, max(_round_up(B, 128), 128))
    bp = _round_up(B, batch_tile)                    # padded batch

    # --- build the merged, padded input slab [states || one_hot] --------------
    # NOTE: like jax.nn.one_hot (and unlike torch F.one_hot), out-of-range
    # action ids produce an all-zero row instead of raising.
    oh = jax.nn.one_hot(actions, num_actions, dtype=jnp.float32)
    x = jnp.concatenate([states.astype(jnp.float32), oh], axis=1)   # (B, kin)
    x_p = jnp.pad(x, ((0, bp - B), (0, kp - kin))).astype(jnp.bfloat16)

    # --- pad + cast weights (zero padding is exact: padded hidden units are 0,
    #     padded output columns are sliced off) --------------------------------
    def pad2(a, rows, cols):
        return jnp.pad(a, ((0, rows - a.shape[0]), (0, cols - a.shape[1])))

    w1 = pad2(params["w1"], kp, hp).astype(jnp.bfloat16)   # (kp, 512)
    b1 = pad2(params["b1"], 1, hp).astype(jnp.float32)
    w2 = pad2(params["w2"], hp, hp).astype(jnp.bfloat16)
    b2 = pad2(params["b2"], 1, hp).astype(jnp.float32)
    w3 = pad2(params["w3"], hp, hp).astype(jnp.bfloat16)
    b3 = pad2(params["b3"], 1, hp).astype(jnp.float32)
    w4 = pad2(params["w4"], hp, op).astype(jnp.bfloat16)
    b4 = pad2(params["b4"], 1, op).astype(jnp.float32)

    # Resident (never re-DMA'd) weight/bias blocks: constant index_map.
    res_kwargs = {"pipeline_mode": pl.Buffered(1)} if single_buffer_weights else {}

    def resident(shape):
        return pl.BlockSpec(shape, lambda i: (0, 0), **res_kwargs)

    grid = (bp // batch_tile,)
    dim_sem = (pltpu.CORE_PARALLEL,) if core_parallel else ("parallel",)

    out = pl.pallas_call(
        _env_model_kernel,
        # bf16 output store: ~half the per-step HBM writeback (biggest win on
        # v6e) and half the output VMEM; cast back to f32 below.
        out_shape=jax.ShapeDtypeStruct((bp, op), jnp.bfloat16),
        grid_spec=pltpu.PrefetchScalarGridSpec(
            num_scalar_prefetch=0,
            grid=grid,
            in_specs=[
                pl.BlockSpec((batch_tile, kp), lambda i: (i, 0)),   # x slab
                resident(w1.shape), resident(b1.shape),
                resident(w2.shape), resident(b2.shape),
                resident(w3.shape), resident(b3.shape),
                resident(w4.shape), resident(b4.shape),
            ],
            out_specs=pl.BlockSpec((batch_tile, op), lambda i: (i, 0)),
        ),
        compiler_params=pltpu.CompilerParams(
            dimension_semantics=dim_sem,
            vmem_limit_bytes=vmem_limit_bytes,
        ),
    )(x_p, w1, b1, w2, b2, w3, b3, w4, b4)

    return out[:B, :state_dim].astype(jnp.float32)


def _fold_bn(w, b, gamma, beta, mean, var, eps=1e-5):
    """Fold eval-mode BatchNorm1d into the preceding Linear (w: (in, out))."""
    scale = gamma / jnp.sqrt(var + eps)            # (out,)
    w_f = w * scale[None, :]
    b_f = (b - mean) * scale + beta
    return w_f, b_f.reshape(1, -1)


def make_params(key, state_dim, num_actions):
    """Deterministic synthetic parameters (Linear + eval-mode BN folded)."""
    dims_in = [state_dim + num_actions, HIDDEN, HIDDEN, HIDDEN]
    dims_out = [HIDDEN, HIDDEN, HIDDEN, state_dim]
    has_bn = [True, True, True, False]
    params = {}
    keys = jax.random.split(key, 4 * 6)
    for li in range(4):
        k = keys[li * 6:(li + 1) * 6]
        fan_in, fan_out = dims_in[li], dims_out[li]
        w = jax.random.normal(k[0], (fan_in, fan_out), jnp.float32) * (1.0 / jnp.sqrt(fan_in))
        b = jax.random.normal(k[1], (fan_out,), jnp.float32) * 0.01
        if has_bn[li]:
            gamma = 1.0 + 0.1 * jax.random.normal(k[2], (fan_out,), jnp.float32)
            beta = 0.1 * jax.random.normal(k[3], (fan_out,), jnp.float32)
            mean = 0.05 * jax.random.normal(k[4], (fan_out,), jnp.float32)
            var = jnp.abs(1.0 + 0.1 * jax.random.normal(k[5], (fan_out,), jnp.float32))
            w, b2 = _fold_bn(w, b, gamma, beta, mean, var)
        else:
            b2 = b.reshape(1, -1)
        params[f"w{li + 1}"] = w
        params[f"b{li + 1}"] = b2
    return params


def reference_forward_f32(states, actions, params, *, num_actions):
    """Pure-JAX f32 reference of the same forward (BN already folded)."""
    oh = jax.nn.one_hot(actions, num_actions, dtype=jnp.float32)
    x = jnp.concatenate([states.astype(jnp.float32), oh], axis=1)
    h = jax.nn.relu(x @ params["w1"] + params["b1"])
    h = jax.nn.relu(h @ params["w2"] + params["b2"])
    h = jax.nn.relu(h @ params["w3"] + params["b3"])
    return jax.nn.sigmoid(h @ params["w4"] + params["b4"])


def reference_forward_matched(states, actions, params, *, num_actions):
    """Pure-JAX reference mirroring the kernel arithmetic:
    bf16-in / f32-accum matmuls, tanh-form sigmoid, bf16 output rounding."""
    oh = jax.nn.one_hot(actions, num_actions, dtype=jnp.float32)
    x = jnp.concatenate([states.astype(jnp.float32), oh], axis=1).astype(jnp.bfloat16)

    def dense(v, w, b):
        return jnp.dot(v.astype(jnp.bfloat16), w.astype(jnp.bfloat16),
                       preferred_element_type=jnp.float32) + b

    h = jax.nn.relu(dense(x, params["w1"], params["b1"]))
    h = jax.nn.relu(dense(h, params["w2"], params["b2"]))
    h = jax.nn.relu(dense(h, params["w3"], params["b3"]))
    y = 0.5 * jnp.tanh(0.5 * dense(h, params["w4"], params["b4"])) + 0.5
    return y.astype(jnp.bfloat16).astype(jnp.float32)


if __name__ == "__main__":
    # Small, module-consistent shapes (real Cube3 would be state_dim=324, 12
    # actions, batches of thousands).  B=300 with batch_tile=256 exercises the
    # pad-and-slice batch path AND a multi-step parallel grid (2 steps).
    B, STATE_DIM, NUM_ACTIONS = 300, 32, 12

    key = jax.random.PRNGKey(0)
    k_s, k_a, k_p = jax.random.split(key, 3)
    states = jax.random.uniform(k_s, (B, STATE_DIM), jnp.float32)
    actions = jax.random.randint(k_a, (B,), 0, NUM_ACTIONS, jnp.int32)
    params = make_params(k_p, STATE_DIM, NUM_ACTIONS)

    out = env_model_forward(states, actions, params,
                            num_actions=NUM_ACTIONS, batch_tile=256)
    out = jax.block_until_ready(out)
    assert out.shape == (B, STATE_DIM) and out.dtype == jnp.float32

    # Tight check vs. a reference that mirrors the kernel's arithmetic.
    ref_m = reference_forward_matched(states, actions, params, num_actions=NUM_ACTIONS)
    assert jnp.max(jnp.abs(out - ref_m)) < 5e-3, "mismatch vs matched reference"

    # Loose sanity check vs. the full-f32 reference (bf16 weight rounding).
    ref_f32 = reference_forward_f32(states, actions, params, num_actions=NUM_ACTIONS)
    assert jnp.max(jnp.abs(out - ref_f32)) < 1e-1, "mismatch vs f32 reference"

    print("KERNEL_OK")
</pallas_src>

<mosaic_0001>
module attributes {stable_mosaic.version = 11 : i64} {
  func.func @_env_model_kernel(%arg0: i32, %arg1: memref<256x128xbf16, #tpu.memory_space<vmem>>, %arg2: memref<128x512xbf16, #tpu.memory_space<vmem>>, %arg3: memref<1x512xf32, #tpu.memory_space<vmem>>, %arg4: memref<512x512xbf16, #tpu.memory_space<vmem>>, %arg5: memref<1x512xf32, #tpu.memory_space<vmem>>, %arg6: memref<512x512xbf16, #tpu.memory_space<vmem>>, %arg7: memref<1x512xf32, #tpu.memory_space<vmem>>, %arg8: memref<512x128xbf16, #tpu.memory_space<vmem>>, %arg9: memref<1x128xf32, #tpu.memory_space<vmem>>, %arg10: memref<256x128xbf16, #tpu.memory_space<vmem>>) attributes {dimension_semantics = [#tpu.dimension_semantics<parallel>], iteration_bounds = array<i64: 2>, scalar_prefetch = 0 : i64, scratch_operands = 0 : i64, tpu.core_type = #tpu.core_type<tc>, window_params = [{transform_indices = @transform_0, window_bounds = array<i64: 256, 128>}, {pipeline_mode = #tpu.pipeline_mode<synchronous>, transform_indices = @transform_1, window_bounds = array<i64: 128, 512>}, {pipeline_mode = #tpu.pipeline_mode<synchronous>, transform_indices = @transform_2, window_bounds = array<i64: 1, 512>}, {pipeline_mode = #tpu.pipeline_mode<synchronous>, transform_indices = @transform_3, window_bounds = array<i64: 512, 512>}, {pipeline_mode = #tpu.pipeline_mode<synchronous>, transform_indices = @transform_4, window_bounds = array<i64: 1, 512>}, {pipeline_mode = #tpu.pipeline_mode<synchronous>, transform_indices = @transform_5, window_bounds = array<i64: 512, 512>}, {pipeline_mode = #tpu.pipeline_mode<synchronous>, transform_indices = @transform_6, window_bounds = array<i64: 1, 512>}, {pipeline_mode = #tpu.pipeline_mode<synchronous>, transform_indices = @transform_7, window_bounds = array<i64: 512, 128>}, {pipeline_mode = #tpu.pipeline_mode<synchronous>, transform_indices = @transform_8, window_bounds = array<i64: 1, 128>}, {transform_indices = @transform_9, window_bounds = array<i64: 256, 128>}]} {
    %c0 = arith.constant 0 : index
    %c0_0 = arith.constant 0 : index
    %0 = vector.load %arg1[%c0, %c0_0] : memref<256x128xbf16, #tpu.memory_space<vmem>>, vector<256x128xbf16>
    %c0_1 = arith.constant 0 : index
    %c0_2 = arith.constant 0 : index
    %1 = vector.load %arg2[%c0_1, %c0_2] : memref<128x512xbf16, #tpu.memory_space<vmem>>, vector<128x512xbf16>
    %cst = arith.constant dense<0.000000e+00> : vector<256x512xf32>
    %2 = tpu.matmul %0, %1, %cst {dimension_numbers = #tpu.dot_dimension_numbers<[1], [0], [0], [1], [0, 0, 1, 1], [], []>} : vector<256x128xbf16>, vector<128x512xbf16>, vector<256x512xf32> -> vector<256x512xf32>
    %c0_3 = arith.constant 0 : index
    %c0_4 = arith.constant 0 : index
    %3 = vector.load %arg3[%c0_3, %c0_4] : memref<1x512xf32, #tpu.memory_space<vmem>>, vector<1x512xf32>
    %4 = vector.broadcast %3 : vector<1x512xf32> to vector<256x512xf32>
    %5 = arith.addf %2, %4 : vector<256x512xf32>
    %cst_5 = arith.constant 0.000000e+00 : f32
    %6 = vector.broadcast %cst_5 : f32 to vector<256x512xf32>
    %7 = arith.maximumf %5, %6 : vector<256x512xf32>
    %8 = arith.truncf %7 : vector<256x512xf32> to vector<256x512xbf16>
    %c0_6 = arith.constant 0 : index
    %c0_7 = arith.constant 0 : index
    %9 = vector.load %arg4[%c0_6, %c0_7] : memref<512x512xbf16, #tpu.memory_space<vmem>>, vector<512x512xbf16>
    %cst_8 = arith.constant dense<0.000000e+00> : vector<256x512xf32>
    %10 = tpu.matmul %8, %9, %cst_8 {dimension_numbers = #tpu.dot_dimension_numbers<[1], [0], [0], [1], [0, 0, 1, 1], [], []>} : vector<256x512xbf16>, vector<512x512xbf16>, vector<256x512xf32> -> vector<256x512xf32>
    %c0_9 = arith.constant 0 : index
    %c0_10 = arith.constant 0 : index
    %11 = vector.load %arg5[%c0_9, %c0_10] : memref<1x512xf32, #tpu.memory_space<vmem>>, vector<1x512xf32>
    %12 = vector.broadcast %11 : vector<1x512xf32> to vector<256x512xf32>
    %13 = arith.addf %10, %12 : vector<256x512xf32>
    %cst_11 = arith.constant 0.000000e+00 : f32
    %14 = vector.broadcast %cst_11 : f32 to vector<256x512xf32>
    %15 = arith.maximumf %13, %14 : vector<256x512xf32>
    %16 = arith.truncf %15 : vector<256x512xf32> to vector<256x512xbf16>
    %c0_12 = arith.constant 0 : index
    %c0_13 = arith.constant 0 : index
    %17 = vector.load %arg6[%c0_12, %c0_13] : memref<512x512xbf16, #tpu.memory_space<vmem>>, vector<512x512xbf16>
    %cst_14 = arith.constant dense<0.000000e+00> : vector<256x512xf32>
    %18 = tpu.matmul %16, %17, %cst_14 {dimension_numbers = #tpu.dot_dimension_numbers<[1], [0], [0], [1], [0, 0, 1, 1], [], []>} : vector<256x512xbf16>, vector<512x512xbf16>, vector<256x512xf32> -> vector<256x512xf32>
    %c0_15 = arith.constant 0 : index
    %c0_16 = arith.constant 0 : index
    %19 = vector.load %arg7[%c0_15, %c0_16] : memref<1x512xf32, #tpu.memory_space<vmem>>, vector<1x512xf32>
    %20 = vector.broadcast %19 : vector<1x512xf32> to vector<256x512xf32>
    %21 = arith.addf %18, %20 : vector<256x512xf32>
    %cst_17 = arith.constant 0.000000e+00 : f32
    %22 = vector.broadcast %cst_17 : f32 to vector<256x512xf32>
    %23 = arith.maximumf %21, %22 : vector<256x512xf32>
    %24 = arith.truncf %23 : vector<256x512xf32> to vector<256x512xbf16>
    %c0_18 = arith.constant 0 : index
    %c0_19 = arith.constant 0 : index
    %25 = vector.load %arg8[%c0_18, %c0_19] : memref<512x128xbf16, #tpu.memory_space<vmem>>, vector<512x128xbf16>
    %cst_20 = arith.constant dense<0.000000e+00> : vector<256x128xf32>
    %26 = tpu.matmul %24, %25, %cst_20 {dimension_numbers = #tpu.dot_dimension_numbers<[1], [0], [0], [1], [0, 0, 1, 1], [], []>} : vector<256x512xbf16>, vector<512x128xbf16>, vector<256x128xf32> -> vector<256x128xf32>
    %c0_21 = arith.constant 0 : index
    %c0_22 = arith.constant 0 : index
    %27 = vector.load %arg9[%c0_21, %c0_22] : memref<1x128xf32, #tpu.memory_space<vmem>>, vector<1x128xf32>
    %28 = vector.broadcast %27 : vector<1x128xf32> to vector<256x128xf32>
    %29 = arith.addf %26, %28 : vector<256x128xf32>
    %cst_23 = arith.constant 5.000000e-01 : f32
    %30 = vector.broadcast %cst_23 : f32 to vector<256x128xf32>
    %31 = arith.mulf %30, %29 : vector<256x128xf32>
    %32 = math.tanh %31 : vector<256x128xf32>
    %cst_24 = arith.constant 5.000000e-01 : f32
    %33 = vector.broadcast %cst_24 : f32 to vector<256x128xf32>
    %34 = arith.mulf %33, %32 : vector<256x128xf32>
    %cst_25 = arith.constant 5.000000e-01 : f32
    %35 = vector.broadcast %cst_25 : f32 to vector<256x128xf32>
    %36 = arith.addf %34, %35 : vector<256x128xf32>
    %37 = arith.truncf %36 : vector<256x128xf32> to vector<256x128xbf16>
    %c0_26 = arith.constant 0 : index
    %c0_27 = arith.constant 0 : index
    %38 = vector.load %arg10[%c0_26, %c0_27] : memref<256x128xbf16, #tpu.memory_space<vmem>>, vector<256x128xbf16>
    tpu.vector_store %arg10[%c0_26, %c0_27], %37 {strides = array<i32>} : memref<256x128xbf16, #tpu.memory_space<vmem>>, vector<256x128xbf16>,
    return
  }
  func.func @transform_0(%arg0: i32) -> (i32, i32) {
    %c0_i32 = arith.constant 0 : i32
    %c0_i32_0 = arith.constant 0 : i32
    return %arg0, %c0_i32 : i32, i32
  }
  func.func @transform_1(%arg0: i32) -> (i32, i32) {
    %c0_i32 = arith.constant 0 : i32
    %c0_i32_0 = arith.constant 0 : i32
    %c0_i32_1 = arith.constant 0 : i32
    return %c0_i32, %c0_i32_0 : i32, i32
  }
  func.func @transform_2(%arg0: i32) -> (i32, i32) {
    %c0_i32 = arith.constant 0 : i32
    %c0_i32_0 = arith.constant 0 : i32
    %c0_i32_1 = arith.constant 0 : i32
    return %c0_i32, %c0_i32_0 : i32, i32
  }
  func.func @transform_3(%arg0: i32) -> (i32, i32) {
    %c0_i32 = arith.constant 0 : i32
    %c0_i32_0 = arith.constant 0 : i32
    %c0_i32_1 = arith.constant 0 : i32
    return %c0_i32, %c0_i32_0 : i32, i32
  }
  func.func @transform_4(%arg0: i32) -> (i32, i32) {
    %c0_i32 = arith.constant 0 : i32
    %c0_i32_0 = arith.constant 0 : i32
    %c0_i32_1 = arith.constant 0 : i32
    return %c0_i32, %c0_i32_0 : i32, i32
  }
  func.func @transform_5(%arg0: i32) -> (i32, i32) {
    %c0_i32 = arith.constant 0 : i32
    %c0_i32_0 = arith.constant 0 : i32
    %c0_i32_1 = arith.constant 0 : i32
    return %c0_i32, %c0_i32_0 : i32, i32
  }
  func.func @transform_6(%arg0: i32) -> (i32, i32) {
    %c0_i32 = arith.constant 0 : i32
    %c0_i32_0 = arith.constant 0 : i32
    %c0_i32_1 = arith.constant 0 : i32
    return %c0_i32, %c0_i32_0 : i32, i32
  }
  func.func @transform_7(%arg0: i32) -> (i32, i32) {
    %c0_i32 = arith.constant 0 : i32
    %c0_i32_0 = arith.constant 0 : i32
    %c0_i32_1 = arith.constant 0 : i32
    return %c0_i32, %c0_i32_0 : i32, i32
  }
  func.func @transform_8(%arg0: i32) -> (i32, i32) {
    %c0_i32 = arith.constant 0 : i32
    %c0_i32_0 = arith.constant 0 : i32
    %c0_i32_1 = arith.constant 0 : i32
    return %c0_i32, %c0_i32_0 : i32, i32
  }
  func.func @transform_9(%arg0: i32) -> (i32, i32) {
    %c0_i32 = arith.constant 0 : i32
    %c0_i32_0 = arith.constant 0 : i32
    return %arg0, %c0_i32 : i32, i32
  }
}

</mosaic_0001>

<bundles_post_ra>
// kernel: tpu_custom_call.1
= control target key start
LH: loop header
LB: loop body
LE: loop exit
PB: predicated region body
PF: predicated region fallthrough
CT: control target
= control target key end

     0   :  { %s9108_s0 = inlined_call_operand.hbm [shape: bf16[512,128], index: 0, kind: input, shape index: {}]   ;;  %s9109_s1 = inlined_call_operand.hbm [shape: bf16[128,512], index: 1, kind: input, shape index: {}]   ;;  %s9110_s2 = inlined_call_operand.vmem [shape: f32[1,512], index: 2, kind: input, shape index: {}]   ;;  %s9111_s3 = inlined_call_operand.hbm [shape: bf16[512,512], index: 3, kind: input, shape index: {}]   ;;  %s9112_s4 = inlined_call_operand.vmem [shape: f32[1,512], index: 4, kind: input, shape index: {}]   ;;  %s9113_s5 = inlined_call_operand.hbm [shape: bf16[512,512], index: 5, kind: input, shape index: {}]   ;;  %s9114_s6 = inlined_call_operand.vmem [shape: f32[1,512], index: 6, kind: input, shape index: {}]   ;;  %s9115_s7 = inlined_call_operand.hbm [shape: bf16[512,128], index: 7, kind: input, shape index: {}]   ;;  %s9116_s8 = inlined_call_operand.vmem [shape: f32[1,128], index: 8, kind: input, shape index: {}]   ;;  %s9117_s9 = inlined_call_operand.hbm [shape: bf16[512,128], index: 9, kind: output, shape index: {}]  }
   0x1   :  { %9124 = sst [smem:[#allocation18_spill]] %s9117_s9 }
   0x2   :  { %14 = vsyncpa [#allocation3], 0 }
   0x3   :  { %16 = vsyncpa [#allocation3 + $0x1], 0 }
   0x4   :  { %17 = vsyncpa [#allocation6], 0 }
   0x5   :  { %18 = vsyncpa [#allocation9], 0 }
   0x6   :  { %19 = vsyncpa [#allocation4], 0 }
   0x7   :  { %21 = vsyncpa [#allocation4 + $0x1], 0  ;;  %s8013_s30 = smov 0   ;;  %s8015_s10 = smov 0  }
   0x8   :  { %s8017_s11 = smov 0   ;;  %s8019_s12 = smov 0  }
   0x9 LB: > { %9125 = sst [smem:[#allocation16_spill]] %s7936_s30  ;;  %s8034_s13 = sadd.s32 4294967295, %s7948_s12   ;;  %s7948_s12 = sphi %s8019_s12, %s9149_s12   ;;  %s7944_s11 = sphi %s8017_s11, %s9148_s11   ;;  %s7940_s10 = sphi %s8015_s10, %s9147_s10   ;;  %s7936_s30 = sphi %s8013_s30, %s9146_s30  }
   0xa   : > { %s5838_s14 = sadd.s32 4294967294, %s7948_s12   ;;  %p47_p0 = scmp.ne.s32.totalorder %s7940_s10, %s7936_s30 }
   0xb   : > { %p9118_p1 = scmp.eq.s32.totalorder %s8034_s13, 0  ;;  %p245_p3 = scmp.eq.s32.totalorder %s5838_s14, 1 }
   0xc   : > { %p5839_p5 = scmp.ge.s32.totalorder %s7948_s12, 1  ;;  %p252_p7 = scmp.lt.s32.totalorder %s7948_s12, 3 }
   0xd   : > { %p8043_p4 = por %p9118_p1, %p47_p0  ;;  %p8048_p6 = por %p245_p3, %p47_p0 }
   0xe   : > { %p8053_p8 = pnand %p5839_p5, %p252_p7  ;;  %s7950_s18 = smov [#allocation5]  }
   0xf   : > { %s9126_s15 = scalar_select %p8043_p4, 1, 0 }
  0x10   : > { %s9127_s16 = scalar_select %p8048_p6, 1, 0 }
  0x11   : > { %s9129_s17 = scalar_select %p8053_p8, 1, 0 }
  0x12   : > { %9128 = sst [smem:[#allocation17_spill]] %s9127_s16  ;;  %s264_s19 = sshll.u32 %s7950_s18, 4  ;;  %s8057_s19 = int_to_ptr.vmem [resolvable:$true] %s264_s19 }
  0x13   : > { %p7114_p9 = pneg %p8053_p8  ;;  %s7951_s21 = smov [#allocation8]  }
  0x14   : > { %s296_s22 = sshll.u32 %s7951_s21, 4  ;;  %s7952_s23 = smov [#allocation7]   ;;  %s8068_s22 = int_to_ptr.vmem [resolvable:$true] %s296_s22 }
  0x15   : > { %p8064_p11 = pnand %p7114_p9, %p9118_p1  ;;  %s8070_s24 = sshll.u32 %s7952_s23, 4  ;;  %s281_s24 = int_to_ptr.vmem [resolvable:$true] %s8070_s24 }
  0x16   : > { %s7732_s27 = scalar_lea.hbm %s9109_s1, 4096 }
  0x17   : > { %p7733_p12 = scmp.ne.s32.totalorder %s9109_s1, %s7732_s27  ;;  %p8080_p13 = pneg %p8064_p11 }
  0x18   : > { %p7739_p5 = scmp.lt.u32.totalorder %s7732_s27, %s9109_s1 }
  0x19   : > { %p7735_p0 = pnand %p8080_p13, %p7733_p12 }
  0x1b   : > { %p7736_p3 = pneg %p7735_p0 }
  0x1d   : > { %p7741_p7 = pnand %p7739_p5, %p7736_p3 }
  0x1f   : > { %7744 = shalt.err (!%p7741_p7)
}
  0x20   : > { %s7745_s23 = scalar_lea.vmem %s8057_s19, 4096  ;;  %p7753_p2 = scmp.lt.s32.totalorder %s8057_s19, %s8057_s19 }
  0x21   : > { %p7746_p9 = scmp.ne.s32.totalorder %s8057_s19, %s7745_s23  ;;  %p7754_p6 = scmp.lt.s32.totalorder %s7745_s23, %s7745_s23 }
  0x23   : > { %p7748_p10 = pnand %p7746_p9, %p8080_p13  ;;  %p7755_p12 = por %p7754_p6, %p7753_p2 }
  0x25   : > { %p7749_p1 = pneg %p7748_p10 }
  0x27   : > { %p7756_p0 = pnand %p7755_p12, %p7749_p1 }
  0x29   : > { %7759 = shalt.err (!%p7756_p0)
}
  0x2a   : > { %s7953_s25 = smov 256   ;;  %s7954_s26 = smov 16  }
  0x2b   : > { %7117 = dma.hbm_to_vmem [thread:$0]  (!%p8064_p11), %s9109_s1, 4096, %s8057_s19, [#allocation6], %s7953_s25, %s7953_s25, %s7954_s26  }
  0x2c   : > { %s7760_s21 = scalar_lea.hbm %s9113_s5, 16384 }
  0x2d   : > { %p7761_p1 = scmp.ne.s32.totalorder %s9113_s5, %s7760_s21  ;;  %p7767_p10 = scmp.lt.u32.totalorder %s7760_s21, %s9113_s5 }
  0x2f   : > { %p7763_p2 = pnand %p7761_p1, %p8080_p13 }
  0x31   : > { %p7764_p6 = pneg %p7763_p2 }
  0x33   : > { %p7769_p3 = pnand %p7767_p10, %p7764_p6 }
  0x35   : > { %7772 = shalt.err (!%p7769_p3)
}
  0x36   : > { %s7773_s19 = scalar_lea.vmem %s8068_s22, 16384  ;;  %p7781_p12 = scmp.lt.s32.totalorder %s8068_s22, %s8068_s22 }
  0x37   : > { %p7774_p5 = scmp.ne.s32.totalorder %s8068_s22, %s7773_s19  ;;  %p7782_p0 = scmp.lt.s32.totalorder %s7773_s19, %s7773_s19 }
  0x39   : > { %p7776_p7 = pnand %p7774_p5, %p8080_p13  ;;  %p7783_p1 = por %p7782_p0, %p7781_p12 }
  0x3b   : > { %p7777_p9 = pneg %p7776_p7 }
  0x3d   : > { %p7784_p2 = pnand %p7783_p1, %p7777_p9 }
  0x3f   : > { %7787 = shalt.err (!%p7784_p2)
}
  0x40   : > { %7123 = dma.hbm_to_vmem [thread:$0]  (!%p8064_p11), %s9113_s5, 16384, %s8068_s22, [#allocation9], %s7953_s25, %s7953_s25, %s7954_s26  }
  0x41   : > { %s7788_s28 = scalar_lea.hbm %s9111_s3, 16384 }
  0x42   : > { %p7789_p6 = scmp.ne.s32.totalorder %s9111_s3, %s7788_s28  ;;  %p7795_p5 = scmp.lt.u32.totalorder %s7788_s28, %s9111_s3 }
  0x44   : > { %p7791_p10 = pnand %p7789_p6, %p8080_p13 }
  0x46   : > { %p7792_p3 = pneg %p7791_p10 }
  0x48   : > { %p7797_p7 = pnand %p7795_p5, %p7792_p3 }
  0x4a   : > { %7800 = shalt.err (!%p7797_p7)
}
  0x4b   : > { %s7801_s19 = scalar_lea.vmem %s281_s24, 16384  ;;  %p7809_p1 = scmp.lt.s32.totalorder %s281_s24, %s281_s24 }
  0x4c   : > { %p7802_p9 = scmp.ne.s32.totalorder %s281_s24, %s7801_s19  ;;  %p7810_p2 = scmp.lt.s32.totalorder %s7801_s19, %s7801_s19 }
  0x4e   : > { %p7804_p12 = pnand %p7802_p9, %p8080_p13  ;;  %p7811_p4 = por %p7810_p2, %p7809_p1 }
  0x50   : > { %p7805_p0 = pneg %p7804_p12 }
  0x52   : > { %p7812_p8 = pnand %p7811_p4, %p7805_p0 }
  0x54   : > { %7815 = shalt.err (!%p7812_p8)
}
  0x55   : > { %7120 = dma.hbm_to_vmem [thread:$0]  (!%p8064_p11), %s9111_s3, 16384, %s281_s24, [#allocation6], %s7953_s25, %s7953_s25, %s7954_s26  }
  0x56   : > { %s7955_s30 = smov [#allocation10]   ;;  %s7816_s29 = scalar_lea.hbm %s9115_s7, 4096 }
  0x57   : > { %s312_s16 = sshll.u32 %s7955_s30, 4  ;;  %p7817_p4 = scmp.ne.s32.totalorder %s9115_s7, %s7816_s29  ;;  %s313_s16 = int_to_ptr.vmem [resolvable:$true] %s312_s16 }
  0x58   : > { %p7823_p10 = scmp.lt.u32.totalorder %s7816_s29, %s9115_s7 }
  0x59   : > { %p7819_p8 = pnand %p7817_p4, %p8080_p13 }
  0x5b   : > { %p7820_p6 = pneg %p7819_p8 }
  0x5d   : > { %p7825_p3 = pnand %p7823_p10, %p7820_p6 }
  0x5f   : > { %7828 = shalt.err (!%p7825_p3)
}
  0x60   : > { %s7829_s24 = scalar_lea.vmem %s313_s16, 4096  ;;  %p7837_p12 = scmp.lt.s32.totalorder %s313_s16, %s313_s16 }
  0x61   : > { %p7830_p5 = scmp.ne.s32.totalorder %s313_s16, %s7829_s24  ;;  %p7838_p0 = scmp.lt.s32.totalorder %s7829_s24, %s7829_s24 }
  0x63   : > { %p7832_p7 = pnand %p7830_p5, %p8080_p13  ;;  %p7839_p1 = por %p7838_p0, %p7837_p12 }
  0x65   : > { %p7833_p9 = pneg %p7832_p7 }
  0x67   : > { %p7840_p2 = pnand %p7839_p1, %p7833_p9 }
  0x69   : > { %7843 = shalt.err (!%p7840_p2)
}
  0x6a   : > { %s7956_s25 = smov 64   ;;  %s7957_s14 = smov 4  }
  0x6b   : > { %7126 = dma.hbm_to_vmem [thread:$0]  (!%p8064_p11), %s9115_s7, 4096, %s313_s16, [#allocation9], %s7956_s25, %s7956_s25, %s7957_s14  }
  0x6c   : > { %s8174_s9 = sadd.s32 1, %s7948_s12   ;;  %s34_s27 = sadd.s32 1, %s7944_s11 }
  0x6d   : > { %s31_s30 = ssub.s32 %s7948_s12, %s8174_s9  ;;  %p41_p4 = scmp.ne.s32.totalorder %s7944_s11, %s7940_s10 }
  0x6e   : > { %p32_p13 = scmp.eq.s32.totalorder %s31_s30, 0  ;;  %p42_p8 = scmp.eq.s32.totalorder %s7948_s12, 0 }
  0x6f   : > { %p9132_p10 = scmp.eq.s32.totalorder %s8034_s13, 1  ;;  %p7139_p5 = scmp.lt.s32.totalorder %s7948_s12, 2 }
  0x70   : > { %s8183_s28 = scalar_select %p32_p13, %s7944_s11, %s34_s27  }
  0x71   : > { %p43_p6 = por %p42_p8, %p41_p4  ;;  %p8187_p3 = por %p9132_p10, %p41_p4 }
  0x72   : > { %s329_s29 = sand.u32 1, %s7944_s11   ;;  %s6229_s16 = sshll.u32 %s7948_s12, 11 }
  0x73   : > { %s5845_s18 = sshll.u32 %s329_s29, 7  ;;  %s8197_s19 = scalar_lea.hbm %s9108_s0, %s6229_s16 }
  0x74   : > { %s333_s24 = scalar_lea.vmem [#allocation2], %s5845_s18  ;;  %p8201_p11 = pnand %p7139_p5, %p43_p6 }
  0x75   : > { %s340_s26 = sshll.u32 %s333_s24, 4  ;;  %s8205_s30 = scalar_lea.sflag [#allocation3], %s329_s29  ;;  %s8199_s26 = int_to_ptr.vmem [resolvable:$true] %s340_s26 }
  0x76   : > { %s7844_s27 = scalar_lea.hbm %s8197_s19, 2048  ;;  %p7846_p9 = pneg %p8201_p11 }
  0x77   : > { %p7845_p7 = scmp.ne.s32.totalorder %s8197_s19, %s7844_s27  ;;  %s7849_s21 = scalar_lea.hbm %s9108_s0, 4096 }
  0x78   : > { %p7850_p1 = scmp.lt.u32.totalorder %s8197_s19, %s9108_s0  ;;  %p7851_p2 = scmp.lt.u32.totalorder %s7849_s21, %s7844_s27 }
  0x79   : > { %p7847_p12 = pnand %p7846_p9, %p7845_p7  ;;  %p7853_p4 = scmp.lt.u32.totalorder %s7844_s27, %s8197_s19 }
  0x7a   : > { %p7852_p13 = por %p7851_p2, %p7850_p1 }
  0x7b   : > { %p7848_p0 = pneg %p7847_p12 }
  0x7c   : > { %p7854_p8 = por %p7853_p4, %p7852_p13 }
  0x7e   : > { %p7855_p6 = pnand %p7854_p8, %p7848_p0 }
  0x80   : > { %7858 = shalt.err (!%p7855_p6)
}
  0x81   : > { %s7859_s29 = scalar_lea.vmem %s8199_s26, 2048  ;;  %s7958_s18 = smov [#allocation2]  }
  0x82   : > { %p7860_p10 = scmp.ne.s32.totalorder %s8199_s26, %s7859_s29  ;;  %s7864_s16 = sshll.u32 %s7958_s18, 4  ;;  %s7865_s16 = int_to_ptr.vmem [resolvable:$false] %s7864_s16 }
  0x83   : > { %s7866_s23 = scalar_lea.vmem %s7865_s16, 4096  ;;  %p7867_p12 = scmp.lt.s32.totalorder %s8199_s26, %s7865_s16 }
  0x84   : > { %p7862_p5 = pnand %p7860_p10, %p7846_p9  ;;  %p7868_p1 = scmp.lt.s32.totalorder %s7866_s23, %s7859_s29 }
  0x86   : > { %p7863_p7 = pneg %p7862_p5  ;;  %p7869_p2 = por %p7868_p1, %p7867_p12 }
  0x88   : > { %p7870_p13 = pnand %p7869_p2, %p7863_p7 }
  0x8a   : > { %7873 = shalt.err (!%p7870_p13)
}
  0x8b   : > { %7130 = dma.hbm_to_vmem [thread:$0]  (!%p8201_p11), %s8197_s19, 2048, %s8199_s26, %s8205_s30, %s7956_s25, %s7956_s25, %s7957_s14  }
  0x8c   : > { %p9135_p9 = scmp.ne.s32.totalorder %s9129_s17, 0 }
  0x8d   : > { %s8239_s27 = sand.u32 (!%p9135_p9), 1, %s7940_s10   ;;  %p9136_p0 = scmp.ne.s32.totalorder (!%p9135_p9), %s9126_s15, 0 }
  0x8e   : > { %352 = sbr.rel (%p9135_p9) target bundleno = 1488 (0x5d0), region = 56  ;;  %s5849_s21 = sshll.u32 (!%p9135_p9), %s8239_s27, 7 }
  0x8f   : > { %s355_s24 = scalar_lea.sflag (!%p9135_p9), [#allocation3], %s8239_s27  ;;  %s8245_s22 = scalar_lea.vmem (!%p9135_p9), [#allocation2], %s5849_s21 }
  0x95   : > { %7919 = dma.done.wait (%p9136_p0), %s355_s24, 2048  }
  0x96   : > { %7921 = vsyncadd (%p9136_p0), %s355_s24, 4294965248  ;;  %p9137_p11 = scmp.eq.s32.totalorder %s8034_s13, 0 }
  0x98   : > { %7923 = dma.done.wait (%p9137_p11), [#allocation6], 20480   ;;  %p9138_p4 = pmov %p9137_p11 }
  0x9a   : > { %7925 = vsyncadd (%p9138_p4), [#allocation6], 4294946816  ;;  %p9139_p8 = pmov %p9138_p4 }
  0x9b   : > { %p9140_p6 = pmov %p9138_p4 }
  0x9c   : > { %7927 = dma.done.wait (%p9139_p8), [#allocation9], 20480  }
  0x9d   : > { %7929 = vsyncadd (%p9140_p6), [#allocation9], 4294946816  ;;  %v7959_v0 = vmov 0   ;;  %v7188_v1 = vld [vmem:[#allocation5 + $0x4] ss:$16 sps:$4 sm:$0xff]   ;;  %v7213_v31 = vld [vmem:[%s8245_s22 + $0x8] sm:$0xff]  }
  0x9e   : > { %786 = vmatprep.mubr.bf16.mxu0 %v7959_v0  ;;  %979 = vmatprep.mubr.bf16.mxu1 %v7959_v0  ;;  %v7190_v2 = vld [vmem:[#allocation5] ss:$16 sps:$4 sm:$0xff]   ;;  %v7191_v3 = vld [vmem:[#allocation5 + $0x24] ss:$16 sps:$4 sm:$0xff]   ;;  %v7220_v13 = vld [vmem:[#allocation5 + $0xc] ss:$16 sps:$4 sm:$0xff]  }
  0x9f   : > { %754 = vmatprep.subr.bf16.mxu0 %v7188_v1  ;;  %v7193_v4 = vld [vmem:[#allocation5 + $0x20] ss:$16 sps:$4 sm:$0xff]   ;;  %v7194_v5 = vld [vmem:[#allocation5 + $0x44] ss:$16 sps:$4 sm:$0xff]   ;;  %v7222_v14 = vld [vmem:[#allocation5 + $0x8] ss:$16 sps:$4 sm:$0xff]   ;;  %947 = vmatprep.subr.bf16.mxu1 %v7220_v13 }
  0xa0   : > { %755 = vmatpush1.bf16.msra.mxu0 %v7190_v2  ;;  %v7196_v6 = vld [vmem:[#allocation5 + $0x40] ss:$16 sps:$4 sm:$0xff]   ;;  %v7197_v7 = vld [vmem:[#allocation5 + $0x64] ss:$16 sps:$4 sm:$0xff]   ;;  %v7224_v16 = vld [vmem:[#allocation5 + $0x2c] ss:$16 sps:$4 sm:$0xff]   ;;  %948 = vmatpush1.bf16.msra.mxu1 %v7222_v14 }
  0xa1   : > { %756 = vmatprep.subr.bf16.mxu0 %v7191_v3  ;;  %v7199_v8 = vld [vmem:[#allocation5 + $0x60] ss:$16 sps:$4 sm:$0xff]   ;;  %v7200_v9 = vld [vmem:[#allocation5 + $0x84] ss:$16 sps:$4 sm:$0xff]   ;;  %v7226_v17 = vld [vmem:[#allocation5 + $0x28] ss:$16 sps:$4 sm:$0xff]   ;;  %949 = vmatprep.subr.bf16.mxu1 %v7224_v16 }
  0xa2   : > { %v7202_v10 = vld [vmem:[#allocation5 + $0x80] ss:$16 sps:$4 sm:$0xff]   ;;  %v7203_v11 = vld [vmem:[#allocation5 + $0xa4] ss:$16 sps:$4 sm:$0xff]   ;;  %v7227_v19 = vld [vmem:[#allocation5 + $0x4c] ss:$16 sps:$4 sm:$0xff]  }
  0xa3   : > { %v7205_v12 = vld [vmem:[#allocation5 + $0xa0] ss:$16 sps:$4 sm:$0xff]   ;;  %v7206_v15 = vld [vmem:[#allocation5 + $0xc4] ss:$16 sps:$4 sm:$0xff]   ;;  %v7229_v22 = vld [vmem:[#allocation5 + $0x48] ss:$16 sps:$4 sm:$0xff]  }
  0xa4   : > { %757 = vmatpush1.bf16.msra.mxu0 %v7193_v4  ;;  %v7208_v18 = vld [vmem:[#allocation5 + $0xc0] ss:$16 sps:$4 sm:$0xff]   ;;  %v7209_v20 = vld [vmem:[#allocation5 + $0xe4] ss:$16 sps:$4 sm:$0xff]   ;;  %950 = vmatpush1.bf16.msra.mxu1 %v7226_v17  ;;  %v7231_v23 = vld [vmem:[#allocation5 + $0x6c] ss:$16 sps:$4 sm:$0xff]  }
  0xa5   : > { %758 = vmatprep.subr.bf16.mxu0 %v7194_v5  ;;  %v7211_v21 = vld [vmem:[#allocation5 + $0xe0] ss:$16 sps:$4 sm:$0xff]   ;;  %951 = vmatprep.subr.bf16.mxu1 %v7227_v19  ;;  %v7233_v25 = vld [vmem:[#allocation5 + $0x68] ss:$16 sps:$4 sm:$0xff]   ;;  %v7234_v26 = vld [vmem:[#allocation5 + $0x8c] ss:$16 sps:$4 sm:$0xff]  }
  0xa6   : > { %v7212_v24 = vld [vmem:[%s8245_s22] sm:$0xff]   ;;  %v7236_v27 = vld [vmem:[#allocation5 + $0x88] ss:$16 sps:$4 sm:$0xff]   ;;  %v7238_v30 = vld [vmem:[#allocation5 + $0xac] ss:$16 sps:$4 sm:$0xff]   ;;  %s9014_s18 = scalar_lea.vmem [#allocation11], %s5849_s21 }
  0xa7   : > { %v7248_v28 = vld [vmem:[#allocation7] ss:$16 sps:$4 sm:$0xff]   ;;  %v7250_v29 = vld [vmem:[#allocation7 + $0x4] ss:$16 sps:$4 sm:$0xff]   ;;  %v7240_v34 = vld [vmem:[#allocation5 + $0xa8] ss:$16 sps:$4 sm:$0xff]  }
  0xa8   : > { %759 = vmatpush1.bf16.msra.mxu0 %v7196_v6  ;;  %952 = vmatpush1.bf16.msra.mxu1 %v7229_v22  ;;  %v7254_v32 = vld [vmem:[#allocation7 + $0x24] ss:$16 sps:$4 sm:$0xff]   ;;  %v7252_v33 = vld [vmem:[#allocation7 + $0x20] ss:$16 sps:$4 sm:$0xff]   ;;  %v7241_v35 = vld [vmem:[#allocation5 + $0xcc] ss:$16 sps:$4 sm:$0xff]  }
  0xa9   : > { %760 = vmatprep.subr.bf16.mxu0 %v7197_v7  ;;  %953 = vmatprep.subr.bf16.mxu1 %v7231_v23  ;;  %v7258_v36 = vld [vmem:[#allocation7 + $0x44] ss:$16 sps:$4 sm:$0xff]   ;;  %v7243_v37 = vld [vmem:[#allocation5 + $0xc8] ss:$16 sps:$4 sm:$0xff]   ;;  %v7256_v38 = vld [vmem:[#allocation7 + $0x40] ss:$16 sps:$4 sm:$0xff]  }
  0xaa   : > { %v7262_v39 = vld [vmem:[#allocation7 + $0x64] ss:$16 sps:$4 sm:$0xff]   ;;  %v7245_v40 = vld [vmem:[#allocation5 + $0xec] ss:$16 sps:$4 sm:$0xff]   ;;  %v7260_v41 = vld [vmem:[#allocation7 + $0x60] ss:$16 sps:$4 sm:$0xff]  }
  0xab   : > { %v7214_v42 = vld [vmem:[%s8245_s22 + $0x10] sm:$0xff]   ;;  %v7247_v43 = vld [vmem:[#allocation5 + $0xe8] ss:$16 sps:$4 sm:$0xff]   ;;  %v7281_v47 = vld [vmem:[#allocation7 + $0xc] ss:$16 sps:$4 sm:$0xff]   ;;  %s6262_s16 = sshll.u32 %s8034_s13, 11 }
  0xac   : > { %761 = vmatpush1.bf16.msra.mxu0 %v7199_v8  ;;  %954 = vmatpush1.bf16.msra.mxu1 %v7233_v25  ;;  %v7266_v44 = vld [vmem:[#allocation7 + $0x84] ss:$16 sps:$4 sm:$0xff]   ;;  %v7264_v45 = vld [vmem:[#allocation7 + $0x80] ss:$16 sps:$4 sm:$0xff]   ;;  %v7279_v48 = vld [vmem:[#allocation7 + $0x8] ss:$16 sps:$4 sm:$0xff]  }
  0xad   : > { %762 = vmatprep.subr.bf16.mxu0 %v7200_v9  ;;  %955 = vmatprep.subr.bf16.mxu1 %v7234_v26  ;;  %v7269_v46 = vld [vmem:[#allocation7 + $0xa4] ss:$16 sps:$4 sm:$0xff]   ;;  %v7284_v49 = vld [vmem:[#allocation7 + $0x2c] ss:$16 sps:$4 sm:$0xff]   ;;  %v7267_v50 = vld [vmem:[#allocation7 + $0xa0] ss:$16 sps:$4 sm:$0xff]  }
  0xae   : > { %v7215_v51 = vld [vmem:[%s8245_s22 + $0x18] sm:$0xff]   ;;  %v7272_v52 = vld [vmem:[#allocation7 + $0xc4] ss:$16 sps:$4 sm:$0xff]   ;;  %v7270_v55 = vld [vmem:[#allocation7 + $0xc0] ss:$16 sps:$4 sm:$0xff]   ;;  %s5727_s23 = sshll.u32 %s9014_s18, 4  ;;  %s9063_s23 = int_to_ptr.vmem [resolvable:$true] %s5727_s23 }
  0xaf   : > { %v7282_v53 = vld [vmem:[#allocation7 + $0x28] ss:$16 sps:$4 sm:$0xff]   ;;  %v7290_v54 = vld [vmem:[#allocation7 + $0x4c] ss:$16 sps:$4 sm:$0xff]   ;;  %v7275_v56 = vld [vmem:[#allocation7 + $0xe4] ss:$16 sps:$4 sm:$0xff]  }
  0xb0   : > { %763 = vmatpush1.bf16.msra.mxu0 %v7202_v10  ;;  %956 = vmatpush1.bf16.msra.mxu1 %v7236_v27  ;;  %v7288_v57 = vld [vmem:[#allocation7 + $0x48] ss:$16 sps:$4 sm:$0xff]   ;;  %v7293_v58 = vld [vmem:[#allocation7 + $0x6c] ss:$16 sps:$4 sm:$0xff]   ;;  %v7273_v59 = vld [vmem:[#allocation7 + $0xe0] ss:$16 sps:$4 sm:$0xff]  }
  0xb1   : > { %764 = vmatprep.subr.bf16.mxu0 %v7203_v11  ;;  %957 = vmatprep.subr.bf16.mxu1 %v7238_v30  ;;  %v7216_v60 = vld [vmem:[%s8245_s22 + $0x20] sm:$0xff]   ;;  %v7291_v62 = vld [vmem:[#allocation7 + $0x68] ss:$16 sps:$4 sm:$0xff]   ;;  %v7299_v63 = vld [vmem:[#allocation7 + $0x8c] ss:$16 sps:$4 sm:$0xff]   ;;  %s5714_s17 = scalar_lea.sflag [#allocation4], %s8239_s27 }
  0xb2   : > { %v7278_v61 = vld [vmem:[#allocation7 + $0x104] ss:$16 sps:$4 sm:$0xff]   ;;  %v7276_v1 = vld [vmem:[#allocation7 + $0x100] ss:$16 sps:$4 sm:$0xff]   ;;  %v7297_v3 = vld [vmem:[#allocation7 + $0x88] ss:$16 sps:$4 sm:$0xff]  }
  0xb3   : > { %v7287_v2 = vld [vmem:[#allocation7 + $0x124] ss:$16 sps:$4 sm:$0xff]   ;;  %v7302_v4 = vld [vmem:[#allocation7 + $0xac] ss:$16 sps:$4 sm:$0xff]   ;;  %v7285_v5 = vld [vmem:[#allocation7 + $0x120] ss:$16 sps:$4 sm:$0xff]  }
  0xb4   : > { %765 = vmatpush1.bf16.msra.mxu0 %v7205_v12  ;;  %958 = vmatpush1.bf16.msra.mxu1 %v7240_v34  ;;  %v7217_v6 = vld [vmem:[%s8245_s22 + $0x28] sm:$0xff]   ;;  %v7296_v7 = vld [vmem:[#allocation7 + $0x144] ss:$16 sps:$4 sm:$0xff]   ;;  %v7294_v10 = vld [vmem:[#allocation7 + $0x140] ss:$16 sps:$4 sm:$0xff]   ;;  %s7874_s25 = scalar_lea.vmem %s9063_s23, 2048 }
  0xb5   : > { %766 = vmatprep.subr.bf16.mxu0 %v7206_v15  ;;  %959 = vmatprep.subr.bf16.mxu1 %v7241_v35  ;;  %v7300_v8 = vld [vmem:[#allocation7 + $0xa8] ss:$16 sps:$4 sm:$0xff]   ;;  %v7308_v9 = vld [vmem:[#allocation7 + $0xcc] ss:$16 sps:$4 sm:$0xff]   ;;  %v7305_v11 = vld [vmem:[#allocation7 + $0x164] ss:$16 sps:$4 sm:$0xff]   ;;  %p7875_p10 = scmp.ne.s32.totalorder %s9063_s23, %s7874_s25 }
  0xb6   : > { %v7303_v12 = vld [vmem:[#allocation7 + $0x160] ss:$16 sps:$4 sm:$0xff]   ;;  %v7306_v13 = vld [vmem:[#allocation7 + $0xc8] ss:$16 sps:$4 sm:$0xff]   ;;  %v7311_v14 = vld [vmem:[#allocation7 + $0xec] ss:$16 sps:$4 sm:$0xff]  }
  0xb7   : > { %v7218_v15 = vld [vmem:[%s8245_s22 + $0x30] sm:$0xff]   ;;  %v7309_v17 = vld [vmem:[#allocation7 + $0xe8] ss:$16 sps:$4 sm:$0xff]   ;;  %v7320_v22 = vld [vmem:[#allocation7 + $0x12c] ss:$16 sps:$4 sm:$0xff]   ;;  %p7876_p5 = pnand %p7875_p10, %p8187_p3  ;;  %s7960_s13 = smov [#allocation11]  }
  0xb8   : > { %767 = vmatpush1.bf16.msra.mxu0 %v7208_v18  ;;  %960 = vmatpush1.bf16.msra.mxu1 %v7243_v37  ;;  %v7314_v16 = vld [vmem:[#allocation7 + $0x184] ss:$16 sps:$4 sm:$0xff]   ;;  %v7317_v18 = vld [vmem:[#allocation7 + $0x10c] ss:$16 sps:$4 sm:$0xff]   ;;  %v7312_v19 = vld [vmem:[#allocation7 + $0x180] ss:$16 sps:$4 sm:$0xff]  }
  0xb9   : > { %768 = vmatprep.subr.bf16.mxu0 %v7209_v20  ;;  %961 = vmatprep.subr.bf16.mxu1 %v7245_v40  ;;  %v7323_v20 = vld [vmem:[#allocation7 + $0x1a4] ss:$16 sps:$4 sm:$0xff]   ;;  %v7321_v23 = vld [vmem:[#allocation7 + $0x1a0] ss:$16 sps:$4 sm:$0xff]   ;;  %v7318_v26 = vld [vmem:[#allocation7 + $0x128] ss:$16 sps:$4 sm:$0xff]   ;;  %p7877_p7 = pneg %p7876_p5 }
  0xba   : > { %v7332_v25 = vld [vmem:[#allocation7 + $0x1c4] ss:$16 sps:$4 sm:$0xff]   ;;  %v7326_v27 = vld [vmem:[#allocation7 + $0x14c] ss:$16 sps:$4 sm:$0xff]   ;;  %v7333_v34 = vld [vmem:[#allocation7 + $0x188] ss:$16 sps:$4 sm:$0xff]  }
  0xbb   : > { %v7329_v30 = vld [vmem:[#allocation7 + $0x16c] ss:$16 sps:$4 sm:$0xff]   ;;  %v7336_v37 = vld [vmem:[#allocation7 + $0x1a8] ss:$16 sps:$4 sm:$0xff]   ;;  %s7878_s14 = sshll.u32 %s7960_s13, 4  ;;  %s7879_s14 = int_to_ptr.vmem [resolvable:$false] %s7878_s14 }
  0xbc   : > { %769 = vmatpush1.bf16.msra.mxu0 %v7211_v21  ;;  %962 = vmatpush1.bf16.msra.mxu1 %v7247_v43  ;;  %v7315_v21 = vld [vmem:[#allocation7 + $0x108] ss:$16 sps:$4 sm:$0xff]   ;;  %v7338_v35 = vld [vmem:[#allocation7 + $0x1ac] ss:$16 sps:$4 sm:$0xff]   ;;  %s7880_s19 = scalar_lea.vmem %s7879_s14, 4096  ;;  %p7881_p12 = scmp.lt.s32.totalorder %s9063_s23, %s7879_s14 }
  0xbd   : > { %2122 = vmatprep.subr.bf16.mxu0 %v7250_v29  ;;  %2508 = vmatprep.subr.bf16.mxu1 %v7281_v47  ;;  %v7324_v29 = vld [vmem:[#allocation7 + $0x148] ss:$16 sps:$4 sm:$0xff]   ;;  %v7344_v40 = vld [vmem:[#allocation7 + $0x1cc] ss:$16 sps:$4 sm:$0xff]   ;;  %p7882_p1 = scmp.lt.s32.totalorder %s7880_s19, %s7874_s25 }
  0xbe   : > { %v7347_v43 = vld [vmem:[#allocation7 + $0x1ec] ss:$16 sps:$4 sm:$0xff]  }
  0xbf   : > { %787 = vmatmul.mubr.bf16.vlgmr.msra.gmra.mrb[0].mxu0 %v7212_v24  ;;  %980 = vmatmul.mubr.bf16.vlgmr.msra.gmra.mrb[0].mxu1 %v7212_v24  ;;  %v7219_v24 = vld [vmem:[%s8245_s22 + $0x38] sm:$0xff]   ;;  %v7255_v47 = vld [vmem:[%s8245_s22 + $0x68] sm:$0xff]   ;;  %p7883_p2 = por %p7882_p1, %p7881_p12 }
  0xc0   : > { %796 = vmatprep.mubr.bf16.mxu0 %v7959_v0  ;;  %2123 = vmatpush1.bf16.msra.mxu0 %v7248_v28  ;;  %v7330_v28 = vld [vmem:[#allocation7 + $0x1c0] ss:$16 sps:$4 sm:$0xff]  }
  0xc1   : > { %2124 = vmatprep.subr.bf16.mxu0 %v7254_v32  ;;  %989 = vmatprep.mubr.bf16.mxu1 %v7959_v0  ;;  %v7327_v32 = vld [vmem:[#allocation7 + $0x168] ss:$16 sps:$4 sm:$0xff]   ;;  %p7884_p13 = pnand %p7883_p2, %p7877_p7 }
  0xc2   : > { %2509 = vmatpush1.bf16.msra.mxu1 %v7279_v48  ;;  %v7350_v48 = vld [vmem:[#allocation7 + $0x204] ss:$16 sps:$4 sm:$0xff]  }
  0xc3   : > { %2510 = vmatprep.subr.bf16.mxu1 %v7284_v49  ;;  %v7259_v49 = vld [vmem:[%s8245_s22 + $0x70] sm:$0xff]  }
  0xc4   : > { %2125 = vmatpush1.bf16.msra.mxu0 %v7252_v33  ;;  %v7335_v33 = vld [vmem:[#allocation7 + $0x18c] ss:$16 sps:$4 sm:$0xff]  }
  0xc5   : > { %2126 = vmatprep.subr.bf16.mxu0 %v7258_v36  ;;  %v7230_v36 = vld [vmem:[%s8245_s22 + $0x48] sm:$0xff]  }
  0xc6   : > { %2511 = vmatpush1.bf16.msra.mxu1 %v7282_v53 }
  0xc7   : > { %797 = vmatmul.mubr.bf16.gmra.mrb[4].mxu0 %v7213_v31  ;;  %2512 = vmatprep.subr.bf16.mxu1 %v7290_v54 }
  0xc8   : > { %806 = vmatprep.mubr.bf16.mxu0 %v7959_v0  ;;  %2127 = vmatpush1.bf16.msra.mxu0 %v7256_v38  ;;  %v7237_v38 = vld [vmem:[%s8245_s22 + $0x50] sm:$0xff]  }
  0xc9   : > { %2128 = vmatprep.subr.bf16.mxu0 %v7262_v39  ;;  %990 = vmatmul.mubr.bf16.gmra.mrb[4].mxu1 %v7213_v31  ;;  %v7223_v31 = vld [vmem:[%s8245_s22 + $0x40] sm:$0xff]   ;;  %v7244_v39 = vld [vmem:[%s8245_s22 + $0x58] sm:$0xff]  }
  0xca   : > { %999 = vmatprep.mubr.bf16.mxu1 %v7959_v0  ;;  %2513 = vmatpush1.bf16.msra.mxu1 %v7288_v57 }
  0xcb   : > { %2514 = vmatprep.subr.bf16.mxu1 %v7293_v58 }
  0xcc   : > { %2129 = vmatpush1.bf16.msra.mxu0 %v7260_v41  ;;  %v7342_v41 = vld [vmem:[#allocation7 + $0x1c8] ss:$16 sps:$4 sm:$0xff]  }
  0xcd   : > { %2130 = vmatprep.subr.bf16.mxu0 %v7266_v44  ;;  %v7339_v44 = vld [vmem:[#allocation7 + $0x1e0] ss:$16 sps:$4 sm:$0xff]  }
  0xce   : > { %2515 = vmatpush1.bf16.msra.mxu1 %v7291_v62 }
  0xcf   : > { %807 = vmatmul.mubr.bf16.gmra.mrb[8].mxu0 %v7214_v42  ;;  %2516 = vmatprep.subr.bf16.mxu1 %v7299_v63 }
  0xd0   : > { %816 = vmatprep.mubr.bf16.mxu0 %v7959_v0  ;;  %2131 = vmatpush1.bf16.msra.mxu0 %v7264_v45  ;;  %v7345_v45 = vld [vmem:[#allocation7 + $0x1e8] ss:$16 sps:$4 sm:$0xff]  }
  0xd1   : > { %2132 = vmatprep.subr.bf16.mxu0 %v7269_v46  ;;  %1000 = vmatmul.mubr.bf16.gmra.mrb[8].mxu1 %v7214_v42  ;;  %v7341_v42 = vld [vmem:[#allocation7 + $0x1e4] ss:$16 sps:$4 sm:$0xff]  }
  0xd2   : > { %1009 = vmatprep.mubr.bf16.mxu1 %v7959_v0  ;;  %2517 = vmatpush1.bf16.msra.mxu1 %v7297_v3  ;;  %v7251_v46 = vld [vmem:[%s8245_s22 + $0x60] sm:$0xff]  }
  0xd3   : > { %2518 = vmatprep.subr.bf16.mxu1 %v7302_v4 }
  0xd4   : > { %2133 = vmatpush1.bf16.msra.mxu0 %v7267_v50  ;;  %v7263_v50 = vld [vmem:[%s8245_s22 + $0x78] sm:$0xff]   ;;  %s9141_s22 = sld [smem:[#allocation18_spill]] }
  0xd5   : > { %2134 = vmatprep.subr.bf16.mxu0 %v7272_v52  ;;  %v478_v52 = vlaneseq }
  0xd6   : > { %2519 = vmatpush1.bf16.msra.mxu1 %v7300_v8 }
  0xd7   : > { %817 = vmatmul.mubr.bf16.gmra.mrb[12].mxu0 %v7215_v51  ;;  %2520 = vmatprep.subr.bf16.mxu1 %v7308_v9  ;;  %v479_v53 = vshrl.u32 %v478_v52, 7 }
  0xd8   : > { %826 = vmatprep.mubr.bf16.mxu0 %v7959_v0  ;;  %2135 = vmatpush1.bf16.msra.mxu0 %v7270_v55  ;;  %v476_v55 = vld [vmem:[%s9110_s2] sm:$0xf] }
  0xd9   : > { %2136 = vmatprep.subr.bf16.mxu0 %v7275_v56  ;;  %1010 = vmatmul.mubr.bf16.gmra.mrb[12].mxu1 %v7215_v51  ;;  %v7377_v51 = vld [vmem:[#allocation7 + $0x20c] ss:$16 sps:$4 sm:$0xff]   ;;  %v8307_v54 = vsub.s32 0, %v479_v53  ;;  %v8312_v56 = vsub.s32 1, %v479_v53 }
  0xda   : > { %1019 = vmatprep.mubr.bf16.mxu1 %v7959_v0  ;;  %2521 = vmatpush1.bf16.msra.mxu1 %v7306_v13  ;;  %s9061_s15 = scalar_lea.hbm %s9141_s22, %s6262_s16 }
  0xdb   : > { %2522 = vmatprep.subr.bf16.mxu1 %v7311_v14  ;;  %v8315_v57 = vrot.slane %v476_v55, %v8307_v54  ;;  %v8318_v58 = vrot.slane %v476_v55, %v8312_v56  ;;  %v7353_v14 = vld [vmem:[#allocation7 + $0x224] ss:$16 sps:$4 sm:$0xff]  }
  0xdc   : > { %2137 = vmatpush1.bf16.msra.mxu0 %v7273_v59 }
  0xdd   : > { %2138 = vmatprep.subr.bf16.mxu0 %v7278_v61 }
  0xde   : > { %2523 = vmatpush1.bf16.msra.mxu1 %v7309_v17 }
  0xdf   : > { %827 = vmatmul.mubr.bf16.gmra.mrb[16].mxu0 %v7216_v60  ;;  %2524 = vmatprep.subr.bf16.mxu1 %v7317_v18 }
  0xe0   : > { %836 = vmatprep.mubr.bf16.mxu0 %v7959_v0  ;;  %2139 = vmatpush1.bf16.msra.mxu0 %v7276_v1 }
  0xe1   : > { %2140 = vmatprep.subr.bf16.mxu0 %v7287_v2  ;;  %1020 = vmatmul.mubr.bf16.gmra.mrb[16].mxu1 %v7216_v60 }
  0xe2   : > { %1029 = vmatprep.mubr.bf16.mxu1 %v7959_v0  ;;  %2525 = vmatpush1.bf16.msra.mxu1 %v7315_v21 }
  0xe3   : > { %2526 = vmatprep.subr.bf16.mxu1 %v7320_v22  ;;  %v7356_v22 = vld [vmem:[#allocation7 + $0x244] ss:$16 sps:$4 sm:$0xff]  }
  0xe4   : > { %2141 = vmatpush1.bf16.msra.mxu0 %v7285_v5 }
  0xe5   : > { %2142 = vmatprep.subr.bf16.mxu0 %v7296_v7 }
  0xe6   : > { %2527 = vmatpush1.bf16.msra.mxu1 %v7318_v26 }
  0xe7   : > { %837 = vmatmul.mubr.bf16.gmra.mrb[20].mxu0 %v7217_v6  ;;  %2528 = vmatprep.subr.bf16.mxu1 %v7326_v27  ;;  %v7386_v27 = vld [vmem:[#allocation7 + $0x24c] ss:$16 sps:$4 sm:$0xff]  }
  0xe8   : > { %846 = vmatprep.mubr.bf16.mxu0 %v7959_v0  ;;  %2143 = vmatpush1.bf16.msra.mxu0 %v7294_v10  ;;  %v7348_v10 = vld [vmem:[#allocation7 + $0x200] ss:$16 sps:$4 sm:$0xff]  }
  0xe9   : > { %2144 = vmatprep.subr.bf16.mxu0 %v7305_v11  ;;  %1030 = vmatmul.mubr.bf16.gmra.mrb[20].mxu1 %v7217_v6  ;;  %v7375_v11 = vld [vmem:[#allocation7 + $0x208] ss:$16 sps:$4 sm:$0xff]  }
  0xea   : > { %1039 = vmatprep.mubr.bf16.mxu1 %v7959_v0  ;;  %2529 = vmatpush1.bf16.msra.mxu1 %v7324_v29 }
  0xeb   : > { %2530 = vmatprep.subr.bf16.mxu1 %v7329_v30 }
  0xec   : > { %2145 = vmatpush1.bf16.msra.mxu0 %v7303_v12 }
  0xed   : > { %2146 = vmatprep.subr.bf16.mxu0 %v7314_v16 }
  0xee   : > { %2531 = vmatpush1.bf16.msra.mxu1 %v7327_v32 }
  0xef   : > { %847 = vmatmul.mubr.bf16.gmra.mrb[24].mxu0 %v7218_v15  ;;  %2532 = vmatprep.subr.bf16.mxu1 %v7335_v33 }
  0xf0   : > { %856 = vmatprep.mubr.bf16.mxu0 %v7959_v0  ;;  %2147 = vmatpush1.bf16.msra.mxu0 %v7312_v19 }
  0xf1   : > { %2148 = vmatprep.subr.bf16.mxu0 %v7323_v20  ;;  %1040 = vmatmul.mubr.bf16.gmra.mrb[24].mxu1 %v7218_v15  ;;  %v7380_v15 = vld [vmem:[#allocation7 + $0x22c] ss:$16 sps:$4 sm:$0xff]   ;;  %v7351_v20 = vld [vmem:[#allocation7 + $0x220] ss:$16 sps:$4 sm:$0xff]  }
  0xf2   : > { %1049 = vmatprep.mubr.bf16.mxu1 %v7959_v0  ;;  %2533 = vmatpush1.bf16.msra.mxu1 %v7333_v34  ;;  %v7354_v34 = vld [vmem:[#allocation7 + $0x240] ss:$16 sps:$4 sm:$0xff]  }
  0xf3   : > { %2534 = vmatprep.subr.bf16.mxu1 %v7338_v35  ;;  %v7384_v35 = vld [vmem:[#allocation7 + $0x248] ss:$16 sps:$4 sm:$0xff]  }
  0xf4   : > { %2149 = vmatpush1.bf16.msra.mxu0 %v7321_v23  ;;  %v7378_v23 = vld [vmem:[#allocation7 + $0x228] ss:$16 sps:$4 sm:$0xff]  }
  0xf5   : > { %2150 = vmatprep.subr.bf16.mxu0 %v7332_v25 }
  0xf6   : > { %2535 = vmatpush1.bf16.msra.mxu1 %v7336_v37 }
  0xf7   : > { %857 = vmatmul.mubr.bf16.gmra.mrb[28].mxu0 %v7219_v24  ;;  %2536 = vmatprep.subr.bf16.mxu1 %v7344_v40  ;;  %v7389_v40 = vld [vmem:[#allocation7 + $0x26c] ss:$16 sps:$4 sm:$0xff]  }
  0xf8   : > { %866 = vmatprep.mubr.bf16.mxu0 %v7959_v0  ;;  %2151 = vmatpush1.bf16.msra.mxu0 %v7330_v28  ;;  %v8330_v28 = vsub.s32 3, %v479_v53 }
  0xf9   : > { %1050 = vmatmul.mubr.bf16.gmra.mrb[28].mxu1 %v7219_v24  ;;  %2152 = vmatprep.subr.bf16.mxu0 %v7341_v42  ;;  %v8328_v24 = vsub.s32 2, %v479_v53 }
  0xfa   : > { %1059 = vmatprep.mubr.bf16.mxu1 %v7959_v0  ;;  %2537 = vmatpush1.bf16.msra.mxu1 %v7342_v41  ;;  %v8337_v41 = vrot.slane %v476_v55, %v8330_v28 }
  0xfb   : > { %2538 = vmatprep.subr.bf16.mxu1 %v7347_v43 }
  0xfc   : > { %2153 = vmatpush1.bf16.msra.mxu0 %v7339_v44 }
  0xfd   : > { %2315 = vmatprep.subr.bf16.mxu0 %v7350_v48 }
  0xfe   : > { %2539 = vmatpush1.bf16.msra.mxu1 %v7345_v45 }
  0xff   : > { %867 = vmatmul.mubr.bf16.gmra.mrb[32].mxu0 %v7223_v31  ;;  %2701 = vmatprep.subr.bf16.mxu1 %v7377_v51 }
 0x100   : > { %876 = vmatprep.mubr.bf16.mxu0 %v7959_v0 }
 0x101   : > { %1060 = vmatmul.mubr.bf16.gmra.mrb[32].mxu1 %v7223_v31 }
 0x102   : > { %1069 = vmatprep.mubr.bf16.mxu1 %v7959_v0 }
 0x107   : > { %877 = vmatmul.mubr.bf16.gmra.mrb[36].mxu0 %v7230_v36 }
 0x108   : > { %886 = vmatprep.mubr.bf16.mxu0 %v7959_v0 }
 0x109   : > { %1070 = vmatmul.mubr.bf16.gmra.mrb[36].mxu1 %v7230_v36  ;;  %v8333_v36 = vrot.slane %v476_v55, %v8328_v24 }
 0x10a   : > { %1079 = vmatprep.mubr.bf16.mxu1 %v7959_v0 }
 0x10f   : > { %887 = vmatmul.mubr.bf16.gmra.mrb[40].mxu0 %v7237_v38 }
 0x110   : > { %896 = vmatprep.mubr.bf16.mxu0 %v7959_v0 }
 0x111   : > { %1080 = vmatmul.mubr.bf16.gmra.mrb[40].mxu1 %v7237_v38 }
 0x112   : > { %1089 = vmatprep.mubr.bf16.mxu1 %v7959_v0 }
 0x117   : > { %897 = vmatmul.mubr.bf16.gmra.mrb[44].mxu0 %v7244_v39 }
 0x118   : > { %906 = vmatprep.mubr.bf16.mxu0 %v7959_v0 }
 0x119   : > { %1090 = vmatmul.mubr.bf16.gmra.mrb[44].mxu1 %v7244_v39  ;;  %v7359_v39 = vld [vmem:[#allocation7 + $0x264] ss:$16 sps:$4 sm:$0xff]  }
 0x11a   : > { %1099 = vmatprep.mubr.bf16.mxu1 %v7959_v0 }
 0x11f   : > { %907 = vmatmul.mubr.bf16.gmra.mrb[48].mxu0 %v7251_v46 }
 0x120   : > { %916 = vmatprep.mubr.bf16.mxu0 %v7959_v0 }
 0x121   : > { %1100 = vmatmul.mubr.bf16.gmra.mrb[48].mxu1 %v7251_v46  ;;  %v7357_v46 = vld [vmem:[#allocation7 + $0x260] ss:$16 sps:$4 sm:$0xff]  }
 0x122   : > { %1109 = vmatprep.mubr.bf16.mxu1 %v7959_v0 }
 0x127   : > { %917 = vmatmul.mubr.bf16.gmra.mrb[52].mxu0 %v7255_v47 }
 0x128   : > { %926 = vmatprep.mubr.bf16.mxu0 %v7959_v0 }
 0x129   : > { %1110 = vmatmul.mubr.bf16.gmra.mrb[52].mxu1 %v7255_v47 }
 0x12a   : > { %1119 = vmatprep.mubr.bf16.mxu1 %v7959_v0 }
 0x12f   : > { %927 = vmatmul.mubr.bf16.gmra.mrb[56].mxu0 %v7259_v49 }
 0x130   : > { %936 = vmatprep.mubr.bf16.mxu0 %v7959_v0 }
 0x131   : > { %1120 = vmatmul.mubr.bf16.gmra.mrb[56].mxu1 %v7259_v49  ;;  %v7362_v49 = vld [vmem:[#allocation7 + $0x284] ss:$16 sps:$4 sm:$0xff]  }
 0x132   : > { %1129 = vmatprep.mubr.bf16.mxu1 %v7959_v0 }
 0x137   : > { %937 = vmatmul.mubr.bf16.gmra.mrb[60].mxu0 %v7263_v50 }
 0x139   : > { %1130 = vmatmul.mubr.bf16.gmra.mrb[60].mxu1 %v7263_v50  ;;  %v7387_v50 = vld [vmem:[#allocation7 + $0x268] ss:$16 sps:$4 sm:$0xff]  }
 0x192   : > { %v788_v0 = vpop.f32.mrb[0].mxu0  ;;  %v981_v47 = vpop.f32.mrb[0].mxu1 }
 0x193   : > { %v789_v59 = vadd.f32 %v788_v0, %v8315_v57  ;;  %v790_v60 = vpop.f32.mrb[1].mxu0  ;;  %v982_v51 = vadd.f32 %v981_v47, %v8333_v36  ;;  %v983_v52 = vpop.f32.mrb[1].mxu1  ;;  %v7395_v0 = vld [vmem:[#allocation7 + $0x28c] ss:$16 sps:$4 sm:$0xff]  }
 0x194   : > { %v791_v61 = vadd.f32 %v790_v60, %v8318_v58  ;;  %v792_v62 = vpop.f32.mrb[2].mxu0  ;;  %v985_v60 = vpop.f32.mrb[2].mxu1 }
 0x195   : > { %v793_v63 = vadd.f32 %v792_v62, %v8315_v57  ;;  %v794_v1 = vpop.f32.mrb[3].mxu0  ;;  %v1140_v3 = vmax.f32 %v789_v59, 0.0  ;;  %v984_v59 = vadd.f32 %v983_v52, %v8337_v41 }
 0x196   : > { %v795_v2 = vadd.f32 %v794_v1, %v8318_v58  ;;  %v1141_v5 = vmax.f32 %v791_v61, 0.0  ;;  %v986_v1 = vadd.f32 %v985_v60, %v8333_v36 }
 0x197   : > { %v1144_v4 = vmax.f32 %v793_v63, 0.0  ;;  %v1142_v63 = vmax.f32 %v982_v51, 0.0 }
 0x198   : > { %v1145_v6 = vmax.f32 %v795_v2, 0.0  ;;  %v987_v2 = vpop.f32.mrb[3].mxu1 }
 0x199   : > { %v1268_v7 = vpack.c.bf16 %v1144_v4, %v1140_v3  ;;  %v1143_v4 = vmax.f32 %v984_v59, 0.0 }
 0x19a   : > { %v1269_v8 = vpack.c.bf16 %v1145_v6, %v1141_v5  ;;  %v798_v9 = vpop.f32.mrb[4].mxu0  ;;  %v988_v5 = vadd.f32 %v987_v2, %v8337_v41 }
 0x19b   : > { %v799_v12 = vadd.f32 %v798_v9, %v8315_v57  ;;  %v800_v13 = vpop.f32.mrb[5].mxu0  ;;  %v7393_v9 = vld [vmem:[#allocation7 + $0x288] ss:$16 sps:$4 sm:$0xff]  }
 0x19c   : > { %v801_v16 = vadd.f32 %v800_v13, %v8318_v58  ;;  %v802_v17 = vpop.f32.mrb[6].mxu0  ;;  %2154 = vmatprep.mubr.bf16.mxu0 %v1269_v8  ;;  %2540 = vmatprep.mubr.bf16.mxu1 %v1269_v8  ;;  %v7360_v8 = vld [vmem:[#allocation7 + $0x280] ss:$16 sps:$4 sm:$0xff]   ;;  %v7365_v13 = vld [vmem:[#allocation7 + $0x2a4] ss:$16 sps:$4 sm:$0xff]  }
 0x19d   : > { %v803_v18 = vadd.f32 %v802_v17, %v8315_v57  ;;  %v804_v19 = vpop.f32.mrb[7].mxu0  ;;  %2155 = vmatmul.mubr.bf16.vlgmr.msra.gmra.mrb[64].mxu0 %v1268_v7  ;;  %2541 = vmatmul.mubr.bf16.vlgmr.msra.gmra.mrb[64].mxu1 %v1268_v7  ;;  %v1148_v25 = vmax.f32 %v799_v12, 0.0 }
 0x19e   : > { %v805_v21 = vadd.f32 %v804_v19, %v8318_v58  ;;  %2316 = vmatpush1.bf16.msra.mxu0 %v7348_v10  ;;  %2702 = vmatpush1.bf16.msra.mxu1 %v7375_v11  ;;  %v1149_v29 = vmax.f32 %v801_v16, 0.0  ;;  %v1146_v10 = vmax.f32 %v986_v1, 0.0  ;;  %v7369_v1 = vld [vmem:[#allocation7 + $0x2e0] ss:$16 sps:$4 sm:$0xff]  }
 0x19f   : > { %v1152_v26 = vmax.f32 %v803_v18, 0.0  ;;  %2317 = vmatprep.subr.bf16.mxu0 %v7353_v14  ;;  %2703 = vmatprep.subr.bf16.mxu1 %v7380_v15  ;;  %v7398_v14 = vld [vmem:[#allocation7 + $0x2ac] ss:$16 sps:$4 sm:$0xff]   ;;  %v1147_v15 = vmax.f32 %v988_v5, 0.0  ;;  %v7374_v5 = vld [vmem:[#allocation7 + $0x304] ss:$16 sps:$4 sm:$0xff]  }
 0x1a0   : > { %v1153_v30 = vmax.f32 %v805_v21, 0.0  ;;  %v8348_v18 = vpack.c.bf16 %v1146_v10, %v1142_v63  ;;  %v7363_v21 = vld [vmem:[#allocation7 + $0x2a0] ss:$16 sps:$4 sm:$0xff]  }
 0x1a1   : > { %v1272_v31 = vpack.c.bf16 %v1152_v26, %v1148_v25  ;;  %v7368_v26 = vld [vmem:[#allocation7 + $0x2c4] ss:$16 sps:$4 sm:$0xff]  }
 0x1a2   : > { %v1273_v32 = vpack.c.bf16 %v1153_v30, %v1149_v29  ;;  %v808_v33 = vpop.f32.mrb[8].mxu0  ;;  %2318 = vmatpush1.bf16.msra.mxu0 %v7351_v20  ;;  %2704 = vmatpush1.bf16.msra.mxu1 %v7378_v23  ;;  %v991_v23 = vpop.f32.mrb[4].mxu1 }
 0x1a3   : > { %v809_v37 = vadd.f32 %v808_v33, %v8315_v57  ;;  %v810_v38 = vpop.f32.mrb[9].mxu0  ;;  %2319 = vmatprep.subr.bf16.mxu0 %v7356_v22  ;;  %2705 = vmatprep.subr.bf16.mxu1 %v7386_v27  ;;  %v8351_v22 = vpack.c.bf16 %v1147_v15, %v1143_v4  ;;  %v7396_v27 = vld [vmem:[#allocation7 + $0x2a8] ss:$16 sps:$4 sm:$0xff]   ;;  %v992_v29 = vadd.f32 %v991_v23, %v8333_v36  ;;  %v993_v30 = vpop.f32.mrb[5].mxu1  ;;  %v7404_v33 = vld [vmem:[#allocation7 + $0x2cc] ss:$16 sps:$4 sm:$0xff]  }
 0x1a4   : > { %v811_v42 = vadd.f32 %v810_v38, %v8318_v58  ;;  %v812_v43 = vpop.f32.mrb[10].mxu0  ;;  %2164 = vmatprep.mubr.bf16.mxu0 %v1273_v32  ;;  %2550 = vmatprep.mubr.bf16.mxu1 %v1273_v32 }
 0x1a5   : > { %v813_v44 = vadd.f32 %v812_v43, %v8315_v57  ;;  %v814_v45 = vpop.f32.mrb[11].mxu0  ;;  %2165 = vmatmul.mubr.bf16.gmra.mrb[68].mxu0 %v1272_v31  ;;  %2551 = vmatmul.mubr.bf16.gmra.mrb[68].mxu1 %v1272_v31  ;;  %v1156_v53 = vmax.f32 %v809_v37, 0.0 }
 0x1a6   : > { %v815_v48 = vadd.f32 %v814_v45, %v8318_v58  ;;  %2320 = vmatpush1.bf16.msra.mxu0 %v7354_v34  ;;  %2706 = vmatpush1.bf16.msra.mxu1 %v7384_v35  ;;  %v1157_v61 = vmax.f32 %v811_v42, 0.0  ;;  %v994_v34 = vadd.f32 %v993_v30, %v8337_v41  ;;  %v995_v35 = vpop.f32.mrb[6].mxu1 }
 0x1a7   : > { %v1160_v55 = vmax.f32 %v813_v44, 0.0  ;;  %2321 = vmatprep.subr.bf16.mxu0 %v7359_v39  ;;  %2707 = vmatprep.subr.bf16.mxu1 %v7389_v40  ;;  %v1150_v39 = vmax.f32 %v992_v29, 0.0  ;;  %v996_v40 = vadd.f32 %v995_v35, %v8333_v36  ;;  %v997_v42 = vpop.f32.mrb[7].mxu1  ;;  %v7411_v29 = vld [vmem:[#allocation7 + $0x308] ss:$16 sps:$4 sm:$0xff]  }
 0x1a8   : > { %v1161_v62 = vmax.f32 %v815_v48, 0.0  ;;  %v1151_v44 = vmax.f32 %v994_v34, 0.0  ;;  %v998_v45 = vadd.f32 %v997_v42, %v8337_v41  ;;  %v7366_v48 = vld [vmem:[#allocation7 + $0x2c0] ss:$16 sps:$4 sm:$0xff]   ;;  %v7416_v34 = vld [vmem:[#allocation7 + $0x32c] ss:$16 sps:$4 sm:$0xff]  }
 0x1a9   : > { %v1276_v3 = vpack.c.bf16 %v1160_v55, %v1156_v53  ;;  %v7371_v53 = vld [vmem:[#allocation7 + $0x2e4] ss:$16 sps:$4 sm:$0xff]   ;;  %v7407_v55 = vld [vmem:[#allocation7 + $0x2ec] ss:$16 sps:$4 sm:$0xff]  }
 0x1aa   : > { %v1277_v6 = vpack.c.bf16 %v1161_v62, %v1157_v61  ;;  %v818_v7 = vpop.f32.mrb[12].mxu0  ;;  %2322 = vmatpush1.bf16.msra.mxu0 %v7357_v46  ;;  %2708 = vmatpush1.bf16.msra.mxu1 %v7387_v50  ;;  %v1154_v50 = vmax.f32 %v996_v40, 0.0 }
 0x1ab   : > { %v819_v11 = vadd.f32 %v818_v7, %v8315_v57  ;;  %v820_v12 = vpop.f32.mrb[13].mxu0  ;;  %2323 = vmatprep.subr.bf16.mxu0 %v7362_v49  ;;  %2709 = vmatprep.subr.bf16.mxu1 %v7395_v0  ;;  %v7402_v49 = vld [vmem:[#allocation7 + $0x2c8] ss:$16 sps:$4 sm:$0xff]   ;;  %v1155_v0 = vmax.f32 %v998_v45, 0.0 }
 0x1ac   : > { %v821_v16 = vadd.f32 %v820_v12, %v8318_v58  ;;  %v822_v17 = vpop.f32.mrb[14].mxu0  ;;  %2174 = vmatprep.mubr.bf16.mxu0 %v1277_v6  ;;  %2560 = vmatprep.mubr.bf16.mxu1 %v1277_v6  ;;  %v8360_v61 = vpack.c.bf16 %v1154_v50, %v1150_v39  ;;  %v7405_v6 = vld [vmem:[#allocation7 + $0x2e8] ss:$16 sps:$4 sm:$0xff]  }
 0x1ad   : > { %v823_v19 = vadd.f32 %v822_v17, %v8315_v57  ;;  %v824_v20 = vpop.f32.mrb[15].mxu0  ;;  %2175 = vmatmul.mubr.bf16.gmra.mrb[72].mxu0 %v1276_v3  ;;  %2561 = vmatmul.mubr.bf16.gmra.mrb[72].mxu1 %v1276_v3  ;;  %v1164_v31 = vmax.f32 %v819_v11, 0.0  ;;  %v8363_v2 = vpack.c.bf16 %v1155_v0, %v1151_v44  ;;  %v1001_v3 = vpop.f32.mrb[8].mxu1  ;;  %v7413_v11 = vld [vmem:[#allocation7 + $0x30c] ss:$16 sps:$4 sm:$0xff]  }
 0x1ae   : > { %v825_v25 = vadd.f32 %v824_v20, %v8318_v58  ;;  %2324 = vmatpush1.bf16.msra.mxu0 %v7360_v8  ;;  %2710 = vmatpush1.bf16.msra.mxu1 %v7393_v9  ;;  %v1165_v37 = vmax.f32 %v821_v16, 0.0  ;;  %v1002_v7 = vadd.f32 %v1001_v3, %v8333_v36  ;;  %v1003_v8 = vpop.f32.mrb[9].mxu1 }
 0x1af   : > { %v1168_v32 = vmax.f32 %v823_v19, 0.0  ;;  %2325 = vmatprep.subr.bf16.mxu0 %v7365_v13  ;;  %2711 = vmatprep.subr.bf16.mxu1 %v7398_v14  ;;  %v1004_v12 = vadd.f32 %v1003_v8, %v8337_v41  ;;  %v1005_v13 = vpop.f32.mrb[10].mxu1  ;;  %v7390_v8 = vld [vmem:[#allocation7 + $0x340] ss:$16 sps:$4 sm:$0xff]  }
 0x1b0   : > { %v1169_v38 = vmax.f32 %v825_v25, 0.0  ;;  %v1158_v16 = vmax.f32 %v1002_v7, 0.0  ;;  %v1006_v17 = vadd.f32 %v1005_v13, %v8333_v36  ;;  %v1007_v19 = vpop.f32.mrb[11].mxu1  ;;  %v7401_v13 = vld [vmem:[#allocation7 + $0x364] ss:$16 sps:$4 sm:$0xff]  }
 0x1b1   : > { %v1280_v43 = vpack.c.bf16 %v1168_v32, %v1164_v31  ;;  %v1008_v23 = vadd.f32 %v1007_v19, %v8337_v41  ;;  %v1011_v45 = vpop.f32.mrb[12].mxu1 }
 0x1b2   : > { %v1281_v46 = vpack.c.bf16 %v1169_v38, %v1165_v37  ;;  %v828_v47 = vpop.f32.mrb[16].mxu0  ;;  %2326 = vmatpush1.bf16.msra.mxu0 %v7363_v21  ;;  %2712 = vmatpush1.bf16.msra.mxu1 %v7396_v27  ;;  %v1159_v21 = vmax.f32 %v1004_v12, 0.0  ;;  %v7372_v27 = vld [vmem:[#allocation7 + $0x300] ss:$16 sps:$4 sm:$0xff]   ;;  %v1162_v30 = vmax.f32 %v1006_v17, 0.0  ;;  %v1013_v50 = vpop.f32.mrb[13].mxu1 }
 0x1b3   : > { %v829_v51 = vadd.f32 %v828_v47, %v8315_v57  ;;  %v830_v52 = vpop.f32.mrb[17].mxu0  ;;  %2327 = vmatprep.subr.bf16.mxu0 %v7368_v26  ;;  %2713 = vmatprep.subr.bf16.mxu1 %v7404_v33  ;;  %v7383_v33 = vld [vmem:[#allocation7 + $0x324] ss:$16 sps:$4 sm:$0xff]   ;;  %v1163_v35 = vmax.f32 %v1008_v23, 0.0  ;;  %v1015_v0 = vpop.f32.mrb[14].mxu1 }
 0x1b4   : > { %v831_v59 = vadd.f32 %v830_v52, %v8318_v58  ;;  %v832_v60 = vpop.f32.mrb[18].mxu0  ;;  %2184 = vmatprep.mubr.bf16.mxu0 %v1281_v46  ;;  %2570 = vmatprep.mubr.bf16.mxu1 %v1281_v46  ;;  %v8372_v39 = vpack.c.bf16 %v1162_v30, %v1158_v16  ;;  %v7392_v47 = vld [vmem:[#allocation7 + $0x344] ss:$16 sps:$4 sm:$0xff]   ;;  %v7399_v23 = vld [vmem:[#allocation7 + $0x360] ss:$16 sps:$4 sm:$0xff]  }
 0x1b5   : > { %v833_v62 = vadd.f32 %v832_v60, %v8315_v57  ;;  %v834_v63 = vpop.f32.mrb[19].mxu0  ;;  %2185 = vmatmul.mubr.bf16.gmra.mrb[76].mxu0 %v1280_v43  ;;  %2571 = vmatmul.mubr.bf16.gmra.mrb[76].mxu1 %v1280_v43  ;;  %v1172_v9 = vmax.f32 %v829_v51, 0.0  ;;  %v7381_v43 = vld [vmem:[#allocation7 + $0x320] ss:$16 sps:$4 sm:$0xff]   ;;  %v8375_v44 = vpack.c.bf16 %v1163_v35, %v1159_v21  ;;  %v7423_v30 = vld [vmem:[#allocation7 + $0x368] ss:$16 sps:$4 sm:$0xff]  }
 0x1b6   : > { %v835_v4 = vadd.f32 %v834_v63, %v8318_v58  ;;  %2328 = vmatpush1.bf16.msra.mxu0 %v7366_v48  ;;  %2714 = vmatpush1.bf16.msra.mxu1 %v7402_v49  ;;  %v1173_v14 = vmax.f32 %v831_v59, 0.0  ;;  %v7414_v48 = vld [vmem:[#allocation7 + $0x328] ss:$16 sps:$4 sm:$0xff]   ;;  %v1012_v49 = vadd.f32 %v1011_v45, %v8333_v36  ;;  %v1016_v63 = vadd.f32 %v1015_v0, %v8333_v36  ;;  %v7431_v35 = vld [vmem:[#allocation7 + $0x38c] ss:$16 sps:$4 sm:$0xff]  }
 0x1b7   : > { %v1176_v10 = vmax.f32 %v833_v62, 0.0  ;;  %2329 = vmatprep.subr.bf16.mxu0 %v7371_v53  ;;  %2715 = vmatprep.subr.bf16.mxu1 %v7407_v55  ;;  %v7422_v53 = vld [vmem:[#allocation7 + $0x34c] ss:$16 sps:$4 sm:$0xff]   ;;  %v1014_v55 = vadd.f32 %v1013_v50, %v8337_v41 }
 0x1b8   : > { %v1177_v15 = vmax.f32 %v835_v4, 0.0  ;;  %v1166_v62 = vmax.f32 %v1012_v49, 0.0 }
 0x1b9   : > { %v1284_v20 = vpack.c.bf16 %v1176_v10, %v1172_v9  ;;  %v1167_v4 = vmax.f32 %v1014_v55, 0.0  ;;  %v7420_v9 = vld [vmem:[#allocation7 + $0x348] ss:$16 sps:$4 sm:$0xff]   ;;  %v1170_v10 = vmax.f32 %v1016_v63, 0.0 }
 0x1ba   : > { %v1285_v25 = vpack.c.bf16 %v1177_v15, %v1173_v14  ;;  %v838_v26 = vpop.f32.mrb[20].mxu0  ;;  %2330 = vmatpush1.bf16.msra.mxu0 %v7369_v1  ;;  %2716 = vmatpush1.bf16.msra.mxu1 %v7405_v6  ;;  %v1017_v1 = vpop.f32.mrb[15].mxu1  ;;  %v7425_v14 = vld [vmem:[#allocation7 + $0x36c] ss:$16 sps:$4 sm:$0xff]  }
 0x1bb   : > { %v839_v31 = vadd.f32 %v838_v26, %v8315_v57  ;;  %v840_v32 = vpop.f32.mrb[21].mxu0  ;;  %2331 = vmatprep.subr.bf16.mxu0 %v7374_v5  ;;  %2717 = vmatprep.subr.bf16.mxu1 %v7413_v11  ;;  %v1018_v5 = vadd.f32 %v1017_v1, %v8337_v41  ;;  %v8384_v19 = vpack.c.bf16 %v1170_v10, %v1166_v62  ;;  %v1021_v26 = vpop.f32.mrb[16].mxu1  ;;  %v7434_v62 = vld [vmem:[#allocation7 + $0x3ac] ss:$16 sps:$4 sm:$0xff]  }
 0x1bc   : > { %v841_v37 = vadd.f32 %v840_v32, %v8318_v58  ;;  %v842_v38 = vpop.f32.mrb[22].mxu0  ;;  %2194 = vmatprep.mubr.bf16.mxu0 %v1285_v25  ;;  %2580 = vmatprep.mubr.bf16.mxu1 %v1285_v25  ;;  %v1023_v32 = vpop.f32.mrb[17].mxu1 }
 0x1bd   : > { %v843_v40 = vadd.f32 %v842_v38, %v8315_v57  ;;  %v844_v42 = vpop.f32.mrb[23].mxu0  ;;  %2195 = vmatmul.mubr.bf16.gmra.mrb[80].mxu0 %v1284_v20  ;;  %2581 = vmatmul.mubr.bf16.gmra.mrb[80].mxu1 %v1284_v20  ;;  %v1180_v51 = vmax.f32 %v839_v31, 0.0  ;;  %v1171_v15 = vmax.f32 %v1018_v5, 0.0  ;;  %v1022_v31 = vadd.f32 %v1021_v26, %v8333_v36  ;;  %v1025_v38 = vpop.f32.mrb[18].mxu1 }
 0x1be   : > { %v845_v46 = vadd.f32 %v844_v42, %v8318_v58  ;;  %2332 = vmatpush1.bf16.msra.mxu0 %v7372_v27  ;;  %2718 = vmatpush1.bf16.msra.mxu1 %v7411_v29  ;;  %v1181_v59 = vmax.f32 %v841_v37, 0.0  ;;  %v7410_v29 = vld [vmem:[#allocation7 + $0x384] ss:$16 sps:$4 sm:$0xff]   ;;  %v1024_v37 = vadd.f32 %v1023_v32, %v8337_v41  ;;  %v1026_v45 = vadd.f32 %v1025_v38, %v8333_v36  ;;  %v7438_v38 = vld [vmem:[#allocation7 + $0x3c8] ss:$16 sps:$4 sm:$0xff]  }
 0x1bf   : > { %v1184_v52 = vmax.f32 %v843_v40, 0.0  ;;  %2333 = vmatprep.subr.bf16.mxu0 %v7383_v33  ;;  %2719 = vmatprep.subr.bf16.mxu1 %v7416_v34  ;;  %v8387_v25 = vpack.c.bf16 %v1171_v15, %v1167_v4 }
 0x1c0   : > { %v1185_v60 = vmax.f32 %v845_v46, 0.0  ;;  %v1027_v46 = vpop.f32.mrb[19].mxu1  ;;  %v1178_v55 = vmax.f32 %v1026_v45, 0.0  ;;  %v7437_v45 = vld [vmem:[#allocation7 + $0x3e4] ss:$16 sps:$4 sm:$0xff]  }
 0x1c1   : > { %v1288_v3 = vpack.c.bf16 %v1184_v52, %v1180_v51  ;;  %v1028_v49 = vadd.f32 %v1027_v46, %v8337_v41  ;;  %v7408_v52 = vld [vmem:[#allocation7 + $0x380] ss:$16 sps:$4 sm:$0xff]   ;;  %v7443_v46 = vld [vmem:[#allocation7 + $0x3ec] ss:$16 sps:$4 sm:$0xff]  }
 0x1c2   : > { %v1289_v6 = vpack.c.bf16 %v1185_v60, %v1181_v59  ;;  %v848_v7 = vpop.f32.mrb[24].mxu0  ;;  %2334 = vmatpush1.bf16.msra.mxu0 %v7381_v43  ;;  %2720 = vmatpush1.bf16.msra.mxu1 %v7414_v48  ;;  %v1174_v43 = vmax.f32 %v1022_v31, 0.0  ;;  %v1175_v48 = vmax.f32 %v1024_v37, 0.0  ;;  %v7419_v60 = vld [vmem:[#allocation7 + $0x3a4] ss:$16 sps:$4 sm:$0xff]  }
 0x1c3   : > { %v849_v11 = vadd.f32 %v848_v7, %v8315_v57  ;;  %v850_v12 = vpop.f32.mrb[25].mxu0  ;;  %2335 = vmatprep.subr.bf16.mxu0 %v7392_v47  ;;  %2721 = vmatprep.subr.bf16.mxu1 %v7422_v53  ;;  %v7429_v53 = vld [vmem:[#allocation7 + $0x388] ss:$16 sps:$4 sm:$0xff]   ;;  %v1179_v63 = vmax.f32 %v1028_v49, 0.0  ;;  %v7417_v7 = vld [vmem:[#allocation7 + $0x3a0] ss:$16 sps:$4 sm:$0xff]  }
 0x1c4   : > { %v851_v16 = vadd.f32 %v850_v12, %v8318_v58  ;;  %v852_v17 = vpop.f32.mrb[26].mxu0  ;;  %2204 = vmatprep.mubr.bf16.mxu0 %v1289_v6  ;;  %2590 = vmatprep.mubr.bf16.mxu1 %v1289_v6  ;;  %v8396_v4 = vpack.c.bf16 %v1178_v55, %v1174_v43  ;;  %v7432_v12 = vld [vmem:[#allocation7 + $0x3a8] ss:$16 sps:$4 sm:$0xff]   ;;  %v7426_v37 = vld [vmem:[#allocation7 + $0x3c0] ss:$16 sps:$4 sm:$0xff]  }
 0x1c5   : > { %v853_v20 = vadd.f32 %v852_v17, %v8315_v57  ;;  %v854_v21 = vpop.f32.mrb[27].mxu0  ;;  %2205 = vmatmul.mubr.bf16.gmra.mrb[84].mxu0 %v1288_v3  ;;  %2591 = vmatmul.mubr.bf16.gmra.mrb[84].mxu1 %v1288_v3  ;;  %v1188_v33 = vmax.f32 %v849_v11, 0.0  ;;  %v7428_v11 = vld [vmem:[#allocation7 + $0x3c4] ss:$16 sps:$4 sm:$0xff]   ;;  %v7440_v17 = vld [vmem:[#allocation7 + $0x3cc] ss:$16 sps:$4 sm:$0xff]  }
 0x1c6   : > { %v855_v27 = vadd.f32 %v854_v21, %v8318_v58  ;;  %2336 = vmatpush1.bf16.msra.mxu0 %v7390_v8  ;;  %2722 = vmatpush1.bf16.msra.mxu1 %v7420_v9  ;;  %v1189_v40 = vmax.f32 %v851_v16, 0.0  ;;  %v8399_v8 = vpack.c.bf16 %v1179_v63, %v1175_v48  ;;  %v1031_v9 = vpop.f32.mrb[20].mxu1 }
 0x1c7   : > { %v1192_v34 = vmax.f32 %v853_v20, 0.0  ;;  %2337 = vmatprep.subr.bf16.mxu0 %v7401_v13  ;;  %2723 = vmatprep.subr.bf16.mxu1 %v7425_v14  ;;  %v1032_v13 = vadd.f32 %v1031_v9, %v8333_v36  ;;  %v1033_v14 = vpop.f32.mrb[21].mxu1 }
 0x1c8   : > { %v1193_v42 = vmax.f32 %v855_v27, 0.0  ;;  %v1034_v20 = vadd.f32 %v1033_v14, %v8337_v41  ;;  %v1035_v21 = vpop.f32.mrb[22].mxu1 }
 0x1c9   : > { %v1292_v47 = vpack.c.bf16 %v1192_v34, %v1188_v33  ;;  %v1182_v27 = vmax.f32 %v1032_v13, 0.0 }
 0x1ca   : > { %v1293_v50 = vpack.c.bf16 %v1193_v42, %v1189_v40  ;;  %v858_v51 = vpop.f32.mrb[28].mxu0  ;;  %2338 = vmatpush1.bf16.msra.mxu0 %v7399_v23  ;;  %2724 = vmatpush1.bf16.msra.mxu1 %v7423_v30  ;;  %v1037_v30 = vpop.f32.mrb[23].mxu1  ;;  %v1183_v32 = vmax.f32 %v1034_v20, 0.0 }
 0x1cb   : > { %v859_v0 = vadd.f32 %v858_v51, %v8315_v57  ;;  %v860_v59 = vpop.f32.mrb[29].mxu0  ;;  %2339 = vmatprep.subr.bf16.mxu0 %v7410_v29  ;;  %2725 = vmatprep.subr.bf16.mxu1 %v7431_v35  ;;  %v1036_v29 = vadd.f32 %v1035_v21, %v8333_v36  ;;  %v1038_v33 = vadd.f32 %v1037_v30, %v8337_v41  ;;  %v1041_v55 = vpop.f32.mrb[24].mxu1 }
 0x1cc   : > { %v861_v1 = vadd.f32 %v860_v59, %v8318_v58  ;;  %v862_v3 = vpop.f32.mrb[30].mxu0  ;;  %2214 = vmatprep.mubr.bf16.mxu0 %v1293_v50  ;;  %2600 = vmatprep.mubr.bf16.mxu1 %v1293_v50  ;;  %v7435_v59 = vld [vmem:[#allocation7 + $0x3e0] ss:$16 sps:$4 sm:$0xff]   ;;  %v1043_v63 = vpop.f32.mrb[25].mxu1 }
 0x1cd   : > { %v863_v5 = vadd.f32 %v862_v3, %v8315_v57  ;;  %v864_v6 = vpop.f32.mrb[31].mxu0  ;;  %2215 = vmatmul.mubr.bf16.gmra.mrb[88].mxu0 %v1292_v47  ;;  %2601 = vmatmul.mubr.bf16.gmra.mrb[88].mxu1 %v1292_v47  ;;  %v1196_v15 = vmax.f32 %v859_v0, 0.0  ;;  %v1186_v40 = vmax.f32 %v1036_v29, 0.0  ;;  %v1187_v47 = vmax.f32 %v1038_v33, 0.0 }
 0x1ce   : > { %v865_v10 = vadd.f32 %v864_v6, %v8318_v58  ;;  %2340 = vmatpush1.bf16.msra.mxu0 %v7408_v52  ;;  %2726 = vmatpush1.bf16.msra.mxu1 %v7429_v53  ;;  %v1197_v23 = vmax.f32 %v861_v1, 0.0  ;;  %v1045_v6 = vpop.f32.mrb[26].mxu1 }
 0x1cf   : > { %v1200_v16 = vmax.f32 %v863_v5, 0.0  ;;  %2341 = vmatprep.subr.bf16.mxu0 %v7419_v60  ;;  %2727 = vmatprep.subr.bf16.mxu1 %v7434_v62  ;;  %v8408_v50 = vpack.c.bf16 %v1186_v40, %v1182_v27  ;;  %v8411_v53 = vpack.c.bf16 %v1187_v47, %v1183_v32  ;;  %v7441_v60 = vld [vmem:[#allocation7 + $0x3e8] ss:$16 sps:$4 sm:$0xff]   ;;  %v1042_v62 = vadd.f32 %v1041_v55, %v8333_v36 }
 0x1d0   : > { %v1201_v26 = vmax.f32 %v865_v10, 0.0  ;;  %v1044_v5 = vadd.f32 %v1043_v63, %v8337_v41 }
 0x1d1   : > { %v1296_v31 = vpack.c.bf16 %v1200_v16, %v1196_v15  ;;  %v1190_v10 = vmax.f32 %v1042_v62, 0.0 }
 0x1d2   : > { %v1297_v34 = vpack.c.bf16 %v1201_v26, %v1197_v23  ;;  %v868_v35 = vpop.f32.mrb[32].mxu0  ;;  %2342 = vmatpush1.bf16.msra.mxu0 %v7417_v7  ;;  %2728 = vmatpush1.bf16.msra.mxu1 %v7432_v12  ;;  %v1047_v12 = vpop.f32.mrb[27].mxu1  ;;  %v1191_v14 = vmax.f32 %v1044_v5, 0.0 }
 0x1d3   : > { %v869_v42 = vadd.f32 %v868_v35, %v8315_v57  ;;  %v870_v43 = vpop.f32.mrb[33].mxu0  ;;  %2343 = vmatprep.subr.bf16.mxu0 %v7428_v11  ;;  %2729 = vmatprep.subr.bf16.mxu1 %v7440_v17  ;;  %v1046_v11 = vadd.f32 %v1045_v6, %v8333_v36  ;;  %v1048_v15 = vadd.f32 %v1047_v12, %v8337_v41 }
 0x1d4   : > { %v871_v48 = vadd.f32 %v870_v43, %v8318_v58  ;;  %v872_v49 = vpop.f32.mrb[34].mxu0  ;;  %2224 = vmatprep.mubr.bf16.mxu0 %v1297_v34  ;;  %2610 = vmatprep.mubr.bf16.mxu1 %v1297_v34  ;;  %v1051_v34 = vpop.f32.mrb[28].mxu1 }
 0x1d5   : > { %v873_v51 = vadd.f32 %v872_v49, %v8315_v57  ;;  %v874_v52 = vpop.f32.mrb[35].mxu0  ;;  %2225 = vmatmul.mubr.bf16.gmra.mrb[92].mxu0 %v1296_v31  ;;  %2611 = vmatmul.mubr.bf16.gmra.mrb[92].mxu1 %v1296_v31  ;;  %v1204_v1 = vmax.f32 %v869_v42, 0.0  ;;  %v1194_v20 = vmax.f32 %v1046_v11, 0.0  ;;  %v1195_v26 = vmax.f32 %v1048_v15, 0.0 }
 0x1d6   : > { %v875_v0 = vadd.f32 %v874_v52, %v8318_v58  ;;  %2344 = vmatpush1.bf16.msra.mxu0 %v7426_v37  ;;  %2730 = vmatpush1.bf16.msra.mxu1 %v7438_v38  ;;  %v1205_v7 = vmax.f32 %v871_v48, 0.0  ;;  %v1052_v37 = vadd.f32 %v1051_v34, %v8333_v36  ;;  %v1053_v38 = vpop.f32.mrb[29].mxu1 }
 0x1d7   : > { %v1208_v3 = vmax.f32 %v873_v51, 0.0  ;;  %2345 = vmatprep.subr.bf16.mxu0 %v7437_v45  ;;  %2731 = vmatprep.subr.bf16.mxu1 %v7443_v46  ;;  %v8420_v30 = vpack.c.bf16 %v1194_v20, %v1190_v10  ;;  %v8423_v33 = vpack.c.bf16 %v1195_v26, %v1191_v14  ;;  %v1054_v43 = vadd.f32 %v1053_v38, %v8337_v41  ;;  %v1055_v45 = vpop.f32.mrb[30].mxu1 }
 0x1d8   : > { %v1209_v9 = vmax.f32 %v875_v0, 0.0  ;;  %v1198_v48 = vmax.f32 %v1052_v37, 0.0  ;;  %v1056_v49 = vadd.f32 %v1055_v45, %v8333_v36  ;;  %v1057_v51 = vpop.f32.mrb[31].mxu1 }
 0x1d9   : > { %v1300_v13 = vpack.c.bf16 %v1208_v3, %v1204_v1  ;;  %v1199_v55 = vmax.f32 %v1054_v43, 0.0  ;;  %v1058_v0 = vadd.f32 %v1057_v51, %v8337_v41  ;;  %v1061_v12 = vpop.f32.mrb[32].mxu1 }
 0x1da   : > { %v1301_v16 = vpack.c.bf16 %v1209_v9, %v1205_v7  ;;  %v878_v17 = vpop.f32.mrb[36].mxu0  ;;  %2346 = vmatpush1.bf16.msra.mxu0 %v7435_v59  ;;  %2732 = vmatpush1.bf16.msra.mxu1 %v7441_v60  ;;  %v1202_v62 = vmax.f32 %v1056_v49, 0.0  ;;  %v1062_v14 = vadd.f32 %v1061_v12, %v8333_v36  ;;  %v1063_v15 = vpop.f32.mrb[33].mxu1 }
 0x1db   : > { %v879_v21 = vadd.f32 %v878_v17, %v8315_v57  ;;  %v880_v23 = vpop.f32.mrb[37].mxu0  ;;  %v1203_v3 = vmax.f32 %v1058_v0, 0.0  ;;  %v1064_v20 = vadd.f32 %v1063_v15, %v8337_v41 }
 0x1dc   : > { %v881_v27 = vadd.f32 %v880_v23, %v8318_v58  ;;  %v882_v29 = vpop.f32.mrb[38].mxu0  ;;  %2234 = vmatprep.mubr.bf16.mxu0 %v1301_v16  ;;  %2620 = vmatprep.mubr.bf16.mxu1 %v1301_v16  ;;  %v8432_v7 = vpack.c.bf16 %v1202_v62, %v1198_v48 }
 0x1dd   : > { %v883_v31 = vadd.f32 %v882_v29, %v8315_v57  ;;  %v884_v32 = vpop.f32.mrb[39].mxu0  ;;  %2235 = vmatmul.mubr.bf16.gmra.mrb[96].mxu0 %v1300_v13  ;;  %2621 = vmatmul.mubr.bf16.gmra.mrb[96].mxu1 %v1300_v13  ;;  %v1212_v40 = vmax.f32 %v879_v21, 0.0  ;;  %v8435_v11 = vpack.c.bf16 %v1203_v3, %v1199_v55  ;;  %v1065_v21 = vpop.f32.mrb[34].mxu1  ;;  %v1207_v34 = vmax.f32 %v1064_v20, 0.0 }
 0x1de   : > { %v885_v35 = vadd.f32 %v884_v32, %v8318_v58  ;;  %v1213_v46 = vmax.f32 %v881_v27, 0.0  ;;  %v1206_v27 = vmax.f32 %v1062_v14, 0.0  ;;  %v1066_v29 = vadd.f32 %v1065_v21, %v8333_v36 }
 0x1df   : > { %v1216_v42 = vmax.f32 %v883_v31, 0.0  ;;  %v1067_v31 = vpop.f32.mrb[35].mxu1 }
 0x1e0   : > { %v1217_v47 = vmax.f32 %v885_v35, 0.0  ;;  %v1068_v35 = vadd.f32 %v1067_v31, %v8337_v41  ;;  %v1071_v55 = vpop.f32.mrb[36].mxu1 }
 0x1e1   : > { %v1304_v52 = vpack.c.bf16 %v1216_v42, %v1212_v40  ;;  %v1210_v40 = vmax.f32 %v1066_v29, 0.0 }
 0x1e2   : > { %v1305_v59 = vpack.c.bf16 %v1217_v47, %v1213_v46  ;;  %v888_v60 = vpop.f32.mrb[40].mxu0  ;;  %v1211_v45 = vmax.f32 %v1068_v35, 0.0 }
 0x1e3   : > { %v889_v63 = vadd.f32 %v888_v60, %v8315_v57  ;;  %v890_v1 = vpop.f32.mrb[41].mxu0  ;;  %v8444_v48 = vpack.c.bf16 %v1210_v40, %v1206_v27  ;;  %v1073_v60 = vpop.f32.mrb[37].mxu1 }
 0x1e4   : > { %v891_v5 = vadd.f32 %v890_v1, %v8318_v58  ;;  %v892_v6 = vpop.f32.mrb[42].mxu0  ;;  %2244 = vmatprep.mubr.bf16.mxu0 %v1305_v59  ;;  %2630 = vmatprep.mubr.bf16.mxu1 %v1305_v59  ;;  %v1072_v59 = vadd.f32 %v1071_v55, %v8333_v36  ;;  %v1074_v1 = vadd.f32 %v1073_v60, %v8337_v41  ;;  %v1075_v3 = vpop.f32.mrb[38].mxu1 }
 0x1e5   : > { %v893_v9 = vadd.f32 %v892_v6, %v8315_v57  ;;  %v894_v10 = vpop.f32.mrb[43].mxu0  ;;  %2245 = vmatmul.mubr.bf16.gmra.mrb[100].mxu0 %v1304_v52  ;;  %2631 = vmatmul.mubr.bf16.gmra.mrb[100].mxu1 %v1304_v52  ;;  %v1220_v16 = vmax.f32 %v889_v63, 0.0  ;;  %v8447_v52 = vpack.c.bf16 %v1211_v45, %v1207_v34  ;;  %v1077_v12 = vpop.f32.mrb[39].mxu1 }
 0x1e6   : > { %v895_v13 = vadd.f32 %v894_v10, %v8318_v58  ;;  %v1221_v23 = vmax.f32 %v891_v5, 0.0  ;;  %v1076_v10 = vadd.f32 %v1075_v3, %v8333_v36  ;;  %v1215_v14 = vmax.f32 %v1074_v1, 0.0 }
 0x1e7   : > { %v1224_v17 = vmax.f32 %v893_v9, 0.0  ;;  %v1214_v9 = vmax.f32 %v1072_v59, 0.0  ;;  %v1078_v15 = vadd.f32 %v1077_v12, %v8337_v41 }
 0x1e8   : > { %v1225_v26 = vmax.f32 %v895_v13, 0.0  ;;  %v1218_v20 = vmax.f32 %v1076_v10, 0.0 }
 0x1e9   : > { %v1308_v32 = vpack.c.bf16 %v1224_v17, %v1220_v16 }
 0x1ea   : > { %v1309_v37 = vpack.c.bf16 %v1225_v26, %v1221_v23  ;;  %v898_v38 = vpop.f32.mrb[44].mxu0  ;;  %v1219_v26 = vmax.f32 %v1078_v15, 0.0  ;;  %v8456_v31 = vpack.c.bf16 %v1218_v20, %v1214_v9 }
 0x1eb   : > { %v899_v42 = vadd.f32 %v898_v38, %v8315_v57  ;;  %v900_v43 = vpop.f32.mrb[45].mxu0 }
 0x1ec   : > { %v901_v46 = vadd.f32 %v900_v43, %v8318_v58  ;;  %v902_v47 = vpop.f32.mrb[46].mxu0  ;;  %2254 = vmatprep.mubr.bf16.mxu0 %v1309_v37  ;;  %2640 = vmatprep.mubr.bf16.mxu1 %v1309_v37  ;;  %v8459_v35 = vpack.c.bf16 %v1219_v26, %v1215_v14  ;;  %v1081_v37 = vpop.f32.mrb[40].mxu1  ;;  %v7446_v43 = vld [vmem:[#allocation8 + $0x4] ss:$16 sps:$4 sm:$0xff]  }
 0x1ed   : > { %v903_v49 = vadd.f32 %v902_v47, %v8315_v57  ;;  %v904_v51 = vpop.f32.mrb[47].mxu0  ;;  %2255 = vmatmul.mubr.bf16.gmra.mrb[104].mxu0 %v1308_v32  ;;  %2641 = vmatmul.mubr.bf16.gmra.mrb[104].mxu1 %v1308_v32  ;;  %v1228_v62 = vmax.f32 %v899_v42, 0.0  ;;  %v1082_v40 = vadd.f32 %v1081_v37, %v8333_v36  ;;  %v1083_v42 = vpop.f32.mrb[41].mxu1 }
 0x1ee   : > { %v905_v0 = vadd.f32 %v904_v51, %v8318_v58  ;;  %v1229_v5 = vmax.f32 %v901_v46, 0.0  ;;  %v1084_v47 = vadd.f32 %v1083_v42, %v8337_v41  ;;  %v7449_v51 = vld [vmem:[#allocation8 + $0xc] ss:$16 sps:$4 sm:$0xff]   ;;  %3876 = vmatprep.subr.bf16.mxu0 %v7446_v43 }
 0x1ef   : > { %v1232_v63 = vmax.f32 %v903_v49, 0.0  ;;  %v1085_v49 = vpop.f32.mrb[42].mxu1  ;;  %v1222_v59 = vmax.f32 %v1082_v40, 0.0  ;;  %4262 = vmatprep.subr.bf16.mxu1 %v7449_v51 }
 0x1f0   : > { %v1233_v6 = vmax.f32 %v905_v0, 0.0  ;;  %v1086_v60 = vadd.f32 %v1085_v49, %v8333_v36  ;;  %v1223_v1 = vmax.f32 %v1084_v47, 0.0 }
 0x1f1   : > { %v1312_v13 = vpack.c.bf16 %v1232_v63, %v1228_v62  ;;  %v1087_v62 = vpop.f32.mrb[43].mxu1 }
 0x1f2   : > { %v1313_v16 = vpack.c.bf16 %v1233_v6, %v1229_v5  ;;  %v908_v17 = vpop.f32.mrb[48].mxu0  ;;  %v1088_v3 = vadd.f32 %v1087_v62, %v8337_v41  ;;  %v1226_v9 = vmax.f32 %v1086_v60, 0.0 }
 0x1f3   : > { %v909_v21 = vadd.f32 %v908_v17, %v8315_v57  ;;  %v910_v23 = vpop.f32.mrb[49].mxu0 }
 0x1f4   : > { %v911_v27 = vadd.f32 %v910_v23, %v8318_v58  ;;  %v912_v29 = vpop.f32.mrb[50].mxu0  ;;  %2264 = vmatprep.mubr.bf16.mxu0 %v1313_v16  ;;  %2650 = vmatprep.mubr.bf16.mxu1 %v1313_v16  ;;  %v8468_v16 = vpack.c.bf16 %v1226_v9, %v1222_v59  ;;  %v1091_v23 = vpop.f32.mrb[44].mxu1 }
 0x1f5   : > { %v913_v32 = vadd.f32 %v912_v29, %v8315_v57  ;;  %v914_v34 = vpop.f32.mrb[51].mxu0  ;;  %2265 = vmatmul.mubr.bf16.gmra.mrb[108].mxu0 %v1312_v13  ;;  %2651 = vmatmul.mubr.bf16.gmra.mrb[108].mxu1 %v1312_v13  ;;  %v1236_v45 = vmax.f32 %v909_v21, 0.0  ;;  %v1227_v13 = vmax.f32 %v1088_v3, 0.0  ;;  %v1093_v29 = vpop.f32.mrb[45].mxu1 }
 0x1f6   : > { %v915_v38 = vadd.f32 %v914_v34, %v8318_v58  ;;  %v1237_v55 = vmax.f32 %v911_v27, 0.0  ;;  %v1092_v27 = vadd.f32 %v1091_v23, %v8333_v36  ;;  %v1094_v37 = vadd.f32 %v1093_v29, %v8337_v41 }
 0x1f7   : > { %v1240_v46 = vmax.f32 %v913_v32, 0.0  ;;  %v8471_v21 = vpack.c.bf16 %v1227_v13, %v1223_v1 }
 0x1f8   : > { %v1241_v0 = vmax.f32 %v915_v38, 0.0  ;;  %v1095_v38 = vpop.f32.mrb[46].mxu1  ;;  %v1230_v43 = vmax.f32 %v1092_v27, 0.0  ;;  %v1231_v49 = vmax.f32 %v1094_v37, 0.0 }
 0x1f9   : > { %v1316_v63 = vpack.c.bf16 %v1240_v46, %v1236_v45  ;;  %v1096_v45 = vadd.f32 %v1095_v38, %v8333_v36  ;;  %v1097_v46 = vpop.f32.mrb[47].mxu1 }
 0x1fa   : > { %v1317_v5 = vpack.c.bf16 %v1241_v0, %v1237_v55  ;;  %v918_v6 = vpop.f32.mrb[52].mxu0  ;;  %v1098_v51 = vadd.f32 %v1097_v46, %v8337_v41 }
 0x1fb   : > { %v919_v10 = vadd.f32 %v918_v6, %v8315_v57  ;;  %v920_v12 = vpop.f32.mrb[53].mxu0  ;;  %v1234_v59 = vmax.f32 %v1096_v45, 0.0 }
 0x1fc   : > { %v921_v14 = vadd.f32 %v920_v12, %v8318_v58  ;;  %v922_v15 = vpop.f32.mrb[54].mxu0  ;;  %2274 = vmatprep.mubr.bf16.mxu0 %v1317_v5  ;;  %2660 = vmatprep.mubr.bf16.mxu1 %v1317_v5  ;;  %v1101_v12 = vpop.f32.mrb[48].mxu1 }
 0x1fd   : > { %v923_v17 = vadd.f32 %v922_v15, %v8315_v57  ;;  %v924_v20 = vpop.f32.mrb[55].mxu0  ;;  %2275 = vmatmul.mubr.bf16.gmra.mrb[112].mxu0 %v1316_v63  ;;  %2661 = vmatmul.mubr.bf16.gmra.mrb[112].mxu1 %v1316_v63  ;;  %v1244_v32 = vmax.f32 %v919_v10, 0.0  ;;  %v1235_v63 = vmax.f32 %v1098_v51, 0.0  ;;  %v8480_v5 = vpack.c.bf16 %v1234_v59, %v1230_v43  ;;  %v1103_v15 = vpop.f32.mrb[49].mxu1 }
 0x1fe   : > { %v925_v26 = vadd.f32 %v924_v20, %v8318_v58  ;;  %v1245_v40 = vmax.f32 %v921_v14, 0.0  ;;  %v1102_v14 = vadd.f32 %v1101_v12, %v8333_v36  ;;  %v1104_v23 = vadd.f32 %v1103_v15, %v8337_v41 }
 0x1ff   : > { %v1248_v34 = vmax.f32 %v923_v17, 0.0  ;;  %v8483_v10 = vpack.c.bf16 %v1235_v63, %v1231_v49 }
 0x200   : > { %v1249_v42 = vmax.f32 %v925_v26, 0.0  ;;  %v1105_v26 = vpop.f32.mrb[50].mxu1 }
 0x201   : > { %v1320_v47 = vpack.c.bf16 %v1248_v34, %v1244_v32  ;;  %v1238_v32 = vmax.f32 %v1102_v14, 0.0  ;;  %v1106_v34 = vadd.f32 %v1105_v26, %v8333_v36  ;;  %v1107_v37 = vpop.f32.mrb[51].mxu1 }
 0x202   : > { %v1321_v55 = vpack.c.bf16 %v1249_v42, %v1245_v40  ;;  %v928_v0 = vpop.f32.mrb[56].mxu0  ;;  %v1239_v40 = vmax.f32 %v1104_v23, 0.0  ;;  %v1108_v42 = vadd.f32 %v1107_v37, %v8337_v41 }
 0x203   : > { %v929_v60 = vadd.f32 %v928_v0, %v8315_v57  ;;  %v930_v62 = vpop.f32.mrb[57].mxu0  ;;  %v1242_v46 = vmax.f32 %v1106_v34, 0.0 }
 0x204   : > { %v931_v1 = vadd.f32 %v930_v62, %v8318_v58  ;;  %v932_v3 = vpop.f32.mrb[58].mxu0  ;;  %2284 = vmatprep.mubr.bf16.mxu0 %v1321_v55  ;;  %2670 = vmatprep.mubr.bf16.mxu1 %v1321_v55  ;;  %v1243_v51 = vmax.f32 %v1108_v42, 0.0 }
 0x205   : > { %v933_v6 = vadd.f32 %v932_v3, %v8315_v57  ;;  %v934_v9 = vpop.f32.mrb[59].mxu0  ;;  %2285 = vmatmul.mubr.bf16.gmra.mrb[116].mxu0 %v1320_v47  ;;  %2671 = vmatmul.mubr.bf16.gmra.mrb[116].mxu1 %v1320_v47  ;;  %v1252_v17 = vmax.f32 %v929_v60, 0.0  ;;  %v8492_v59 = vpack.c.bf16 %v1242_v46, %v1238_v32 }
 0x206   : > { %v935_v13 = vadd.f32 %v934_v9, %v8318_v58  ;;  %v1253_v27 = vmax.f32 %v931_v1, 0.0  ;;  %v8495_v63 = vpack.c.bf16 %v1243_v51, %v1239_v40  ;;  %v1111_v1 = vpop.f32.mrb[52].mxu1 }
 0x207   : > { %v1256_v20 = vmax.f32 %v933_v6, 0.0  ;;  %v1112_v6 = vadd.f32 %v1111_v1, %v8333_v36  ;;  %v1113_v9 = vpop.f32.mrb[53].mxu1  ;;  %v7444_v1 = vld [vmem:[#allocation8] ss:$16 sps:$4 sm:$0xff]  }
 0x208   : > { %v1257_v29 = vmax.f32 %v935_v13, 0.0  ;;  %v1114_v14 = vadd.f32 %v1113_v9, %v8337_v41  ;;  %v1115_v15 = vpop.f32.mrb[54].mxu1 }
 0x209   : > { %v1324_v38 = vpack.c.bf16 %v1256_v20, %v1252_v17  ;;  %v1246_v23 = vmax.f32 %v1112_v6, 0.0  ;;  %v1117_v26 = vpop.f32.mrb[55].mxu1 }
 0x20a   : > { %v1325_v43 = vpack.c.bf16 %v1257_v29, %v1253_v27  ;;  %v938_v45 = vpop.f32.mrb[60].mxu0  ;;  %v1247_v29 = vmax.f32 %v1114_v14, 0.0  ;;  %v1118_v32 = vadd.f32 %v1117_v26, %v8337_v41  ;;  %v1121_v42 = vpop.f32.mrb[56].mxu1 }
 0x20b   : > { %v939_v47 = vadd.f32 %v938_v45, %v8315_v57  ;;  %v940_v49 = vpop.f32.mrb[61].mxu0  ;;  %v1123_v45 = vpop.f32.mrb[57].mxu1 }
 0x20c   : > { %v941_v55 = vadd.f32 %v940_v49, %v8318_v58  ;;  %v942_v0 = vpop.f32.mrb[62].mxu0  ;;  %2294 = vmatprep.mubr.bf16.mxu0 %v1325_v43  ;;  %2680 = vmatprep.mubr.bf16.mxu1 %v1325_v43  ;;  %v1251_v37 = vmax.f32 %v1118_v32, 0.0  ;;  %v1122_v43 = vadd.f32 %v1121_v42, %v8333_v36  ;;  %v1124_v46 = vadd.f32 %v1123_v45, %v8337_v41  ;;  %v7458_v32 = vld [vmem:[#allocation8 + $0x44] ss:$16 sps:$4 sm:$0xff]   ;;  %v7459_v45 = vld [vmem:[#allocation8 + $0x48] ss:$16 sps:$4 sm:$0xff]  }
 0x20d   : > { %v943_v60 = vadd.f32 %v942_v0, %v8315_v57  ;;  %v944_v62 = vpop.f32.mrb[63].mxu0  ;;  %2295 = vmatmul.mubr.bf16.gmra.mrb[120].mxu0 %v1324_v38  ;;  %2681 = vmatmul.mubr.bf16.gmra.mrb[120].mxu1 %v1324_v38  ;;  %v1260_v12 = vmax.f32 %v939_v47, 0.0  ;;  %v1116_v57 = vadd.f32 %v1115_v15, %v8333_v36  ;;  %v1125_v47 = vpop.f32.mrb[58].mxu1 }
 0x20e   : > { %v945_v3 = vadd.f32 %v944_v62, %v8318_v58  ;;  %v1261_v17 = vmax.f32 %v941_v55, 0.0  ;;  %v8504_v40 = vpack.c.bf16 %v1251_v37, %v1247_v29  ;;  %v1254_v49 = vmax.f32 %v1122_v43, 0.0  ;;  %v1127_v55 = vpop.f32.mrb[59].mxu1  ;;  %v7456_v43 = vld [vmem:[#allocation8 + $0x40] ss:$16 sps:$4 sm:$0xff]  }
 0x20f   : > { %v1264_v13 = vmax.f32 %v943_v60, 0.0  ;;  %v1250_v58 = vmax.f32 %v1116_v57, 0.0  ;;  %v1126_v51 = vadd.f32 %v1125_v47, %v8333_v36  ;;  %v1255_v0 = vmax.f32 %v1124_v46, 0.0  ;;  %v1131_v14 = vpop.f32.mrb[60].mxu1  ;;  %v7464_v47 = vld [vmem:[#allocation8 + $0x64] ss:$16 sps:$4 sm:$0xff]  }
 0x210   : > { %v1265_v20 = vmax.f32 %v945_v3, 0.0  ;;  %v1128_v60 = vadd.f32 %v1127_v55, %v8337_v41  ;;  %v7447_v3 = vld [vmem:[#allocation8 + $0x8] ss:$16 sps:$4 sm:$0xff]   ;;  %v1132_v15 = vadd.f32 %v1131_v14, %v8333_v36  ;;  %v7470_v55 = vld [vmem:[#allocation8 + $0x84] ss:$16 sps:$4 sm:$0xff]  }
 0x211   : > { %v1328_v27 = vpack.c.bf16 %v1264_v13, %v1260_v12  ;;  %v8502_v38 = vpack.c.bf16 %v1250_v58, %v1246_v23  ;;  %v1258_v62 = vmax.f32 %v1126_v51, 0.0  ;;  %v7455_v12 = vld [vmem:[#allocation8 + $0x2c] ss:$16 sps:$4 sm:$0xff]   ;;  %v7453_v23 = vld [vmem:[#allocation8 + $0x28] ss:$16 sps:$4 sm:$0xff]  }
 0x212   : > { %v1329_v34 = vpack.c.bf16 %v1265_v20, %v1261_v17  ;;  %v1259_v6 = vmax.f32 %v1128_v60, 0.0  ;;  %v1133_v17 = vpop.f32.mrb[61].mxu1  ;;  %v7450_v20 = vld [vmem:[#allocation8 + $0x20] ss:$16 sps:$4 sm:$0xff]   ;;  %v7465_v51 = vld [vmem:[#allocation8 + $0x68] ss:$16 sps:$4 sm:$0xff]  }
 0x213   : > { %v8512_v9 = vpack.c.bf16 %v1258_v62, %v1254_v49  ;;  %v1134_v57 = vadd.f32 %v1133_v17, %v8337_v41  ;;  %v1135_v26 = vpop.f32.mrb[62].mxu1  ;;  %v7467_v49 = vld [vmem:[#allocation8 + $0x6c] ss:$16 sps:$4 sm:$0xff]   ;;  %v7468_v60 = vld [vmem:[#allocation8 + $0x80] ss:$16 sps:$4 sm:$0xff]  }
 0x214   : > { %2304 = vmatprep.mubr.bf16.mxu0 %v1329_v34  ;;  %2690 = vmatprep.mubr.bf16.mxu1 %v1329_v34  ;;  %v8516_v13 = vpack.c.bf16 %v1259_v6, %v1255_v0  ;;  %v1137_v29 = vpop.f32.mrb[63].mxu1  ;;  %v7461_v34 = vld [vmem:[#allocation8 + $0x4c] ss:$16 sps:$4 sm:$0xff]   ;;  %v7471_v62 = vld [vmem:[#allocation8 + $0x88] ss:$16 sps:$4 sm:$0xff]  }
 0x215   : > { %2305 = vmatmul.mubr.bf16.gmra.mrb[124].mxu0 %v1328_v27  ;;  %2691 = vmatmul.mubr.bf16.gmra.mrb[124].mxu1 %v1328_v27  ;;  %v1136_v27 = vadd.f32 %v1135_v26, %v8333_v36  ;;  %v1263_v58 = vmax.f32 %v1134_v57, 0.0  ;;  %v7473_v0 = vld [vmem:[#allocation8 + $0x8c] ss:$16 sps:$4 sm:$0xff]   ;;  %v7482_v6 = vld [vmem:[#allocation8 + $0xc4] ss:$16 sps:$4 sm:$0xff]  }
 0x216   : > { %2347 = vmatprep.mubr.bf16.mxu0 %v8351_v22  ;;  %2733 = vmatprep.mubr.bf16.mxu1 %v8351_v22  ;;  %v7452_v22 = vld [vmem:[#allocation8 + $0x24] ss:$16 sps:$4 sm:$0xff]   ;;  %v7483_v14 = vld [vmem:[#allocation8 + $0xc8] ss:$16 sps:$4 sm:$0xff]   ;;  %v7492_v57 = vld [vmem:[#allocation8 + $0x100] ss:$16 sps:$4 sm:$0xff]  }
 0x217   : > { %v1266_v37 = vmax.f32 %v1136_v27, 0.0  ;;  %v7489_v17 = vld [vmem:[#allocation8 + $0xe8] ss:$16 sps:$4 sm:$0xff]  }
 0x218   : > { %v7495_v26 = vld [vmem:[#allocation8 + $0x108] ss:$16 sps:$4 sm:$0xff]  }
 0x219   : > { %v7501_v27 = vld [vmem:[#allocation8 + $0x128] ss:$16 sps:$4 sm:$0xff]  }
 0x21d   : > { %2348 = vmatmul.mubr.bf16.vlgmr.msra.gmra.mrb[64].mxu0 %v8348_v18  ;;  %2734 = vmatmul.mubr.bf16.vlgmr.msra.gmra.mrb[64].mxu1 %v8348_v18  ;;  %v1262_v18 = vmax.f32 %v1132_v15, 0.0  ;;  %v7488_v15 = vld [vmem:[#allocation8 + $0xe4] ss:$16 sps:$4 sm:$0xff]  }
 0x21e   : > { %2357 = vmatprep.mubr.bf16.mxu0 %v8363_v2  ;;  %2743 = vmatprep.mubr.bf16.mxu1 %v8363_v2  ;;  %v1138_v2 = vadd.f32 %v1137_v29, %v8337_v41  ;;  %v7462_v41 = vld [vmem:[#allocation8 + $0x60] ss:$16 sps:$4 sm:$0xff]   ;;  %v7506_v29 = vld [vmem:[#allocation8 + $0x144] ss:$16 sps:$4 sm:$0xff]  }
 0x21f   : > { %3877 = vmatpush1.bf16.msra.mxu0 %v7444_v1  ;;  %4263 = vmatpush1.bf16.msra.mxu1 %v7447_v3  ;;  %v8524_v46 = vpack.c.bf16 %v1266_v37, %v1262_v18  ;;  %v7479_v1 = vld [vmem:[#allocation8 + $0xac] ss:$16 sps:$4 sm:$0xff]   ;;  %v7477_v3 = vld [vmem:[#allocation8 + $0xa8] ss:$16 sps:$4 sm:$0xff]   ;;  %v7500_v18 = vld [vmem:[#allocation8 + $0x124] ss:$16 sps:$4 sm:$0xff]  }
 0x220   : > { %3878 = vmatprep.subr.bf16.mxu0 %v7452_v22  ;;  %4264 = vmatprep.subr.bf16.mxu1 %v7455_v12  ;;  %v1267_v42 = vmax.f32 %v1138_v2, 0.0  ;;  %v7485_v22 = vld [vmem:[#allocation8 + $0xcc] ss:$16 sps:$4 sm:$0xff]   ;;  %v7480_v12 = vld [vmem:[#allocation8 + $0xc0] ss:$16 sps:$4 sm:$0xff]  }
 0x221   : > { %v7512_v2 = vld [vmem:[#allocation8 + $0x164] ss:$16 sps:$4 sm:$0xff]   ;;  %v7513_v37 = vld [vmem:[#allocation8 + $0x168] ss:$16 sps:$4 sm:$0xff]  }
 0x222   : > { %v8528_v36 = vpack.c.bf16 %v1267_v42, %v1263_v58  ;;  %v7507_v58 = vld [vmem:[#allocation8 + $0x148] ss:$16 sps:$4 sm:$0xff]   ;;  %v7518_v42 = vld [vmem:[#allocation8 + $0x184] ss:$16 sps:$4 sm:$0xff]  }
 0x223   : > { %3879 = vmatpush1.bf16.msra.mxu0 %v7450_v20  ;;  %4265 = vmatpush1.bf16.msra.mxu1 %v7453_v23  ;;  %v7494_v20 = vld [vmem:[#allocation8 + $0x104] ss:$16 sps:$4 sm:$0xff]   ;;  %v7497_v23 = vld [vmem:[#allocation8 + $0x10c] ss:$16 sps:$4 sm:$0xff]  }
 0x224   : > { %3880 = vmatprep.subr.bf16.mxu0 %v7458_v32  ;;  %4266 = vmatprep.subr.bf16.mxu1 %v7461_v34  ;;  %v7509_v32 = vld [vmem:[#allocation8 + $0x14c] ss:$16 sps:$4 sm:$0xff]   ;;  %v7504_v34 = vld [vmem:[#allocation8 + $0x140] ss:$16 sps:$4 sm:$0xff]  }
 0x225   : > { %2358 = vmatmul.mubr.bf16.gmra.mrb[68].mxu0 %v8360_v61  ;;  %2744 = vmatmul.mubr.bf16.gmra.mrb[68].mxu1 %v8360_v61  ;;  %v7476_v61 = vld [vmem:[#allocation8 + $0xa4] ss:$16 sps:$4 sm:$0xff]  }
 0x226   : > { %2367 = vmatprep.mubr.bf16.mxu0 %v8375_v44  ;;  %2753 = vmatprep.mubr.bf16.mxu1 %v8375_v44  ;;  %v7474_v44 = vld [vmem:[#allocation8 + $0xa0] ss:$16 sps:$4 sm:$0xff]  }
 0x227   : > { %3881 = vmatpush1.bf16.msra.mxu0 %v7456_v43  ;;  %4267 = vmatpush1.bf16.msra.mxu1 %v7459_v45  ;;  %v7521_v43 = vld [vmem:[#allocation8 + $0x18c] ss:$16 sps:$4 sm:$0xff]   ;;  %v7516_v45 = vld [vmem:[#allocation8 + $0x180] ss:$16 sps:$4 sm:$0xff]  }
 0x228   : > { %3882 = vmatprep.subr.bf16.mxu0 %v7464_v47  ;;  %4268 = vmatprep.subr.bf16.mxu1 %v7467_v49  ;;  %v7519_v47 = vld [vmem:[#allocation8 + $0x188] ss:$16 sps:$4 sm:$0xff]   ;;  %v7524_v49 = vld [vmem:[#allocation8 + $0x1a4] ss:$16 sps:$4 sm:$0xff]  }
 0x22b   : > { %3883 = vmatpush1.bf16.msra.mxu0 %v7462_v41  ;;  %4269 = vmatpush1.bf16.msra.mxu1 %v7465_v51  ;;  %v7525_v41 = vld [vmem:[#allocation8 + $0x1a8] ss:$16 sps:$4 sm:$0xff]   ;;  %v7530_v51 = vld [vmem:[#allocation8 + $0x1c4] ss:$16 sps:$4 sm:$0xff]  }
 0x22c   : > { %3884 = vmatprep.subr.bf16.mxu0 %v7470_v55  ;;  %4270 = vmatprep.subr.bf16.mxu1 %v7473_v0  ;;  %v7533_v55 = vld [vmem:[#allocation8 + $0x1cc] ss:$16 sps:$4 sm:$0xff]   ;;  %v7528_v0 = vld [vmem:[#allocation8 + $0x1c0] ss:$16 sps:$4 sm:$0xff]  }
 0x22d   : > { %2368 = vmatmul.mubr.bf16.gmra.mrb[72].mxu0 %v8372_v39  ;;  %2754 = vmatmul.mubr.bf16.gmra.mrb[72].mxu1 %v8372_v39  ;;  %v7491_v39 = vld [vmem:[#allocation8 + $0xec] ss:$16 sps:$4 sm:$0xff]  }
 0x22e   : > { %2377 = vmatprep.mubr.bf16.mxu0 %v8387_v25  ;;  %2763 = vmatprep.mubr.bf16.mxu1 %v8387_v25  ;;  %v7486_v25 = vld [vmem:[#allocation8 + $0xe0] ss:$16 sps:$4 sm:$0xff]  }
 0x22f   : > { %3885 = vmatpush1.bf16.msra.mxu0 %v7468_v60  ;;  %4271 = vmatpush1.bf16.msra.mxu1 %v7471_v62  ;;  %v7531_v60 = vld [vmem:[#allocation8 + $0x1c8] ss:$16 sps:$4 sm:$0xff]  }
 0x230   : > { %3886 = vmatprep.subr.bf16.mxu0 %v7476_v61  ;;  %4272 = vmatprep.subr.bf16.mxu1 %v7479_v1 }
 0x233   : > { %3887 = vmatpush1.bf16.msra.mxu0 %v7474_v44  ;;  %4273 = vmatpush1.bf16.msra.mxu1 %v7477_v3 }
 0x234   : > { %3888 = vmatprep.subr.bf16.mxu0 %v7482_v6  ;;  %4274 = vmatprep.subr.bf16.mxu1 %v7485_v22 }
 0x235   : > { %2378 = vmatmul.mubr.bf16.gmra.mrb[76].mxu0 %v8384_v19  ;;  %2764 = vmatmul.mubr.bf16.gmra.mrb[76].mxu1 %v8384_v19  ;;  %v7503_v19 = vld [vmem:[#allocation8 + $0x12c] ss:$16 sps:$4 sm:$0xff]  }
 0x236   : > { %2387 = vmatprep.mubr.bf16.mxu0 %v8399_v8  ;;  %2773 = vmatprep.mubr.bf16.mxu1 %v8399_v8  ;;  %v7498_v8 = vld [vmem:[#allocation8 + $0x120] ss:$16 sps:$4 sm:$0xff]  }
 0x237   : > { %3889 = vmatpush1.bf16.msra.mxu0 %v7480_v12  ;;  %4275 = vmatpush1.bf16.msra.mxu1 %v7483_v14 }
 0x238   : > { %3890 = vmatprep.subr.bf16.mxu0 %v7488_v15  ;;  %4276 = vmatprep.subr.bf16.mxu1 %v7491_v39 }
 0x23b   : > { %3891 = vmatpush1.bf16.msra.mxu0 %v7486_v25  ;;  %4277 = vmatpush1.bf16.msra.mxu1 %v7489_v17 }
 0x23c   : > { %3892 = vmatprep.subr.bf16.mxu0 %v7494_v20  ;;  %4278 = vmatprep.subr.bf16.mxu1 %v7497_v23 }
 0x23d   : > { %2388 = vmatmul.mubr.bf16.gmra.mrb[80].mxu0 %v8396_v4  ;;  %2774 = vmatmul.mubr.bf16.gmra.mrb[80].mxu1 %v8396_v4  ;;  %v7515_v4 = vld [vmem:[#allocation8 + $0x16c] ss:$16 sps:$4 sm:$0xff]  }
 0x23e   : > { %2397 = vmatprep.mubr.bf16.mxu0 %v8411_v53  ;;  %2783 = vmatprep.mubr.bf16.mxu1 %v8411_v53  ;;  %v7510_v53 = vld [vmem:[#allocation8 + $0x160] ss:$16 sps:$4 sm:$0xff]  }
 0x23f   : > { %3893 = vmatpush1.bf16.msra.mxu0 %v7492_v57  ;;  %4279 = vmatpush1.bf16.msra.mxu1 %v7495_v26 }
 0x240   : > { %3894 = vmatprep.subr.bf16.mxu0 %v7500_v18  ;;  %4280 = vmatprep.subr.bf16.mxu1 %v7503_v19 }
 0x243   : > { %3895 = vmatpush1.bf16.msra.mxu0 %v7498_v8  ;;  %4281 = vmatpush1.bf16.msra.mxu1 %v7501_v27 }
 0x244   : > { %3896 = vmatprep.subr.bf16.mxu0 %v7506_v29  ;;  %4282 = vmatprep.subr.bf16.mxu1 %v7509_v32  ;;  %v7540_v32 = vld [vmem:[#allocation8 + $0x200] ss:$16 sps:$4 sm:$0xff]  }
 0x245   : > { %2398 = vmatmul.mubr.bf16.gmra.mrb[84].mxu0 %v8408_v50  ;;  %2784 = vmatmul.mubr.bf16.gmra.mrb[84].mxu1 %v8408_v50  ;;  %v7527_v50 = vld [vmem:[#allocation8 + $0x1ac] ss:$16 sps:$4 sm:$0xff]  }
 0x246   : > { %2407 = vmatprep.mubr.bf16.mxu0 %v8423_v33  ;;  %2793 = vmatprep.mubr.bf16.mxu1 %v8423_v33  ;;  %v7522_v33 = vld [vmem:[#allocation8 + $0x1a0] ss:$16 sps:$4 sm:$0xff]  }
 0x247   : > { %3897 = vmatpush1.bf16.msra.mxu0 %v7504_v34  ;;  %4283 = vmatpush1.bf16.msra.mxu1 %v7507_v58  ;;  %v7543_v34 = vld [vmem:[#allocation8 + $0x208] ss:$16 sps:$4 sm:$0xff]  }
 0x248   : > { %3898 = vmatprep.subr.bf16.mxu0 %v7512_v2  ;;  %4284 = vmatprep.subr.bf16.mxu1 %v7515_v4 }
 0x24b   : > { %3899 = vmatpush1.bf16.msra.mxu0 %v7510_v53  ;;  %4285 = vmatpush1.bf16.msra.mxu1 %v7513_v37  ;;  %v7548_v37 = vld [vmem:[#allocation8 + $0x224] ss:$16 sps:$4 sm:$0xff]  }
 0x24c   : > { %3900 = vmatprep.subr.bf16.mxu0 %v7518_v42  ;;  %4286 = vmatprep.subr.bf16.mxu1 %v7521_v43  ;;  %v7551_v42 = vld [vmem:[#allocation8 + $0x22c] ss:$16 sps:$4 sm:$0xff]  }
 0x24d   : > { %2408 = vmatmul.mubr.bf16.gmra.mrb[88].mxu0 %v8420_v30  ;;  %2794 = vmatmul.mubr.bf16.gmra.mrb[88].mxu1 %v8420_v30  ;;  %v7536_v30 = vld [vmem:[#allocation8 + $0x1e4] ss:$16 sps:$4 sm:$0xff]  }
 0x24e   : > { %2417 = vmatprep.mubr.bf16.mxu0 %v8435_v11  ;;  %2803 = vmatprep.mubr.bf16.mxu1 %v8435_v11  ;;  %v7534_v11 = vld [vmem:[#allocation8 + $0x1e0] ss:$16 sps:$4 sm:$0xff]  }
 0x24f   : > { %3901 = vmatpush1.bf16.msra.mxu0 %v7516_v45  ;;  %4287 = vmatpush1.bf16.msra.mxu1 %v7519_v47 }
 0x250   : > { %3902 = vmatprep.subr.bf16.mxu0 %v7524_v49  ;;  %4288 = vmatprep.subr.bf16.mxu1 %v7527_v50 }
 0x253   : > { %3903 = vmatpush1.bf16.msra.mxu0 %v7522_v33  ;;  %4289 = vmatpush1.bf16.msra.mxu1 %v7525_v41 }
 0x254   : > { %3904 = vmatprep.subr.bf16.mxu0 %v7530_v51  ;;  %4290 = vmatprep.subr.bf16.mxu1 %v7533_v55 }
 0x255   : > { %2418 = vmatmul.mubr.bf16.gmra.mrb[92].mxu0 %v8432_v7  ;;  %2804 = vmatmul.mubr.bf16.gmra.mrb[92].mxu1 %v8432_v7  ;;  %v7539_v7 = vld [vmem:[#allocation8 + $0x1ec] ss:$16 sps:$4 sm:$0xff]  }
 0x256   : > { %2427 = vmatprep.mubr.bf16.mxu0 %v8447_v52  ;;  %2813 = vmatprep.mubr.bf16.mxu1 %v8447_v52  ;;  %v7542_v52 = vld [vmem:[#allocation8 + $0x204] ss:$16 sps:$4 sm:$0xff]  }
 0x257   : > { %3905 = vmatpush1.bf16.msra.mxu0 %v7528_v0  ;;  %4291 = vmatpush1.bf16.msra.mxu1 %v7531_v60  ;;  %v7546_v60 = vld [vmem:[#allocation8 + $0x220] ss:$16 sps:$4 sm:$0xff]  }
 0x258   : > { %3906 = vmatprep.subr.bf16.mxu0 %v7536_v30  ;;  %4292 = vmatprep.subr.bf16.mxu1 %v7539_v7  ;;  %v7549_v30 = vld [vmem:[#allocation8 + $0x228] ss:$16 sps:$4 sm:$0xff]   ;;  %v7554_v7 = vld [vmem:[#allocation8 + $0x244] ss:$16 sps:$4 sm:$0xff]  }
 0x25b   : > { %3907 = vmatpush1.bf16.msra.mxu0 %v7534_v11 }
 0x25c   : > { %4069 = vmatprep.subr.bf16.mxu0 %v7542_v52 }
 0x25d   : > { %2428 = vmatmul.mubr.bf16.gmra.mrb[96].mxu0 %v8444_v48  ;;  %2814 = vmatmul.mubr.bf16.gmra.mrb[96].mxu1 %v8444_v48  ;;  %v7537_v48 = vld [vmem:[#allocation8 + $0x1e8] ss:$16 sps:$4 sm:$0xff]  }
 0x25e   : > { %2437 = vmatprep.mubr.bf16.mxu0 %v8459_v35  ;;  %2823 = vmatprep.mubr.bf16.mxu1 %v8459_v35  ;;  %v1460_v35 = vld [vmem:[%s9112_s4] sm:$0xf] }
 0x25f   : > { %4293 = vmatpush1.bf16.msra.mxu1 %v7537_v48 }
 0x265   : > { %2438 = vmatmul.mubr.bf16.gmra.mrb[100].mxu0 %v8456_v31  ;;  %2824 = vmatmul.mubr.bf16.gmra.mrb[100].mxu1 %v8456_v31  ;;  %v7545_v31 = vld [vmem:[#allocation8 + $0x20c] ss:$16 sps:$4 sm:$0xff]  }
 0x266   : > { %2447 = vmatprep.mubr.bf16.mxu0 %v8471_v21  ;;  %2833 = vmatprep.mubr.bf16.mxu1 %v8471_v21  ;;  %v8593_v21 = vrot.slane %v1460_v35, %v8328_v24 }
 0x267   : > { %4455 = vmatprep.subr.bf16.mxu1 %v7545_v31 }
 0x26d   : > { %2448 = vmatmul.mubr.bf16.gmra.mrb[104].mxu0 %v8468_v16  ;;  %2834 = vmatmul.mubr.bf16.gmra.mrb[104].mxu1 %v8468_v16  ;;  %v8590_v16 = vrot.slane %v1460_v35, %v8307_v54 }
 0x26e   : > { %2457 = vmatprep.mubr.bf16.mxu0 %v8483_v10  ;;  %2843 = vmatprep.mubr.bf16.mxu1 %v8483_v10  ;;  %v8599_v10 = vrot.slane %v1460_v35, %v8330_v28 }
 0x275   : > { %2458 = vmatmul.mubr.bf16.gmra.mrb[108].mxu0 %v8480_v5  ;;  %2844 = vmatmul.mubr.bf16.gmra.mrb[108].mxu1 %v8480_v5  ;;  %v8596_v5 = vrot.slane %v1460_v35, %v8312_v56  ;;  %v7557_v35 = vld [vmem:[#allocation8 + $0x24c] ss:$16 sps:$4 sm:$0xff]  }
 0x276   : > { %2467 = vmatprep.mubr.bf16.mxu0 %v8495_v63  ;;  %2853 = vmatprep.mubr.bf16.mxu1 %v8495_v63 }
 0x27d   : > { %2468 = vmatmul.mubr.bf16.gmra.mrb[112].mxu0 %v8492_v59  ;;  %2854 = vmatmul.mubr.bf16.gmra.mrb[112].mxu1 %v8492_v59 }
 0x27e   : > { %2477 = vmatprep.mubr.bf16.mxu0 %v8504_v40  ;;  %2863 = vmatprep.mubr.bf16.mxu1 %v8504_v40 }
 0x285   : > { %2478 = vmatmul.mubr.bf16.gmra.mrb[116].mxu0 %v8502_v38  ;;  %2864 = vmatmul.mubr.bf16.gmra.mrb[116].mxu1 %v8502_v38 }
 0x286   : > { %2487 = vmatprep.mubr.bf16.mxu0 %v8516_v13  ;;  %2873 = vmatprep.mubr.bf16.mxu1 %v8516_v13 }
 0x28d   : > { %2488 = vmatmul.mubr.bf16.gmra.mrb[120].mxu0 %v8512_v9  ;;  %2874 = vmatmul.mubr.bf16.gmra.mrb[120].mxu1 %v8512_v9 }
 0x28e   : > { %2497 = vmatprep.mubr.bf16.mxu0 %v8528_v36  ;;  %2883 = vmatprep.mubr.bf16.mxu1 %v8528_v36 }
 0x295   : > { %2498 = vmatmul.mubr.bf16.gmra.mrb[124].mxu0 %v8524_v46  ;;  %2884 = vmatmul.mubr.bf16.gmra.mrb[124].mxu1 %v8524_v46 }
 0x2f0   : > { %v2349_v59 = vpop.f32.mrb[64].mxu0  ;;  %v2735_v63 = vpop.f32.mrb[64].mxu1 }
 0x2f1   : > { %v6582_v38 = vadd.f32 %v2349_v59, %v8590_v16  ;;  %v6646_v40 = vadd.f32 %v2735_v63, %v8593_v21  ;;  %v2351_v9 = vpop.f32.mrb[65].mxu0  ;;  %v2737_v13 = vpop.f32.mrb[65].mxu1 }
 0x2f2   : > { %v6583_v46 = vadd.f32 %v2351_v9, %v8596_v5  ;;  %v6647_v36 = vadd.f32 %v2737_v13, %v8599_v10  ;;  %v2353_v62 = vpop.f32.mrb[66].mxu0  ;;  %v2739_v61 = vpop.f32.mrb[66].mxu1 }
 0x2f3   : > { %v6584_v1 = vadd.f32 %v2353_v62, %v8590_v16  ;;  %v6648_v44 = vadd.f32 %v2739_v61, %v8593_v21  ;;  %v2355_v3 = vpop.f32.mrb[67].mxu0  ;;  %v2741_v6 = vpop.f32.mrb[67].mxu1  ;;  %v2894_v14 = vmax.f32 %v6582_v38, 0.0  ;;  %v2896_v15 = vmax.f32 %v6646_v40, 0.0 }
 0x2f4   : > { %v6585_v22 = vadd.f32 %v2355_v3, %v8596_v5  ;;  %v6649_v12 = vadd.f32 %v2741_v6, %v8599_v10  ;;  %v2895_v17 = vmax.f32 %v6583_v46, 0.0  ;;  %v2897_v20 = vmax.f32 %v6647_v36, 0.0 }
 0x2f5   : > { %v2898_v39 = vmax.f32 %v6584_v1, 0.0  ;;  %v2900_v25 = vmax.f32 %v6648_v44, 0.0  ;;  %v7552_v1 = vld [vmem:[#allocation8 + $0x240] ss:$16 sps:$4 sm:$0xff]   ;;  %v7555_v44 = vld [vmem:[#allocation8 + $0x248] ss:$16 sps:$4 sm:$0xff]  }
 0x2f6   : > { %v2899_v23 = vmax.f32 %v6585_v22, 0.0  ;;  %v2901_v57 = vmax.f32 %v6649_v12, 0.0 }
 0x2f7   : > { %v3022_v26 = vpack.c.bf16 %v2898_v39, %v2894_v14  ;;  %v8609_v18 = vpack.c.bf16 %v2900_v25, %v2896_v15  ;;  %v7560_v14 = vld [vmem:[#allocation8 + $0x264] ss:$16 sps:$4 sm:$0xff]   ;;  %v7563_v15 = vld [vmem:[#allocation8 + $0x26c] ss:$16 sps:$4 sm:$0xff]  }
 0x2f8   : > { %v3023_v19 = vpack.c.bf16 %v2899_v23, %v2895_v17  ;;  %v8611_v8 = vpack.c.bf16 %v2901_v57, %v2897_v20  ;;  %v2359_v27 = vpop.f32.mrb[68].mxu0  ;;  %v2745_v29 = vpop.f32.mrb[68].mxu1 }
 0x2f9   : > { %v6586_v58 = vadd.f32 %v2359_v27, %v8590_v16  ;;  %v6650_v2 = vadd.f32 %v2745_v29, %v8593_v21  ;;  %v2361_v4 = vpop.f32.mrb[69].mxu0  ;;  %v2747_v53 = vpop.f32.mrb[69].mxu1 }
 0x2fa   : > { %v6587_v43 = vadd.f32 %v2361_v4, %v8596_v5  ;;  %v6651_v45 = vadd.f32 %v2747_v53, %v8599_v10  ;;  %v2363_v47 = vpop.f32.mrb[70].mxu0  ;;  %v2749_v49 = vpop.f32.mrb[70].mxu1  ;;  %3908 = vmatprep.mubr.bf16.mxu0 %v3023_v19  ;;  %4294 = vmatprep.mubr.bf16.mxu1 %v3023_v19 }
 0x2fb   : > { %v6588_v50 = vadd.f32 %v2363_v47, %v8590_v16  ;;  %v6652_v33 = vadd.f32 %v2749_v49, %v8593_v21  ;;  %v2365_v41 = vpop.f32.mrb[71].mxu0  ;;  %v2751_v51 = vpop.f32.mrb[71].mxu1  ;;  %3909 = vmatmul.mubr.bf16.vlgmr.msra.gmra.mrb[128].mxu0 %v3022_v26  ;;  %4295 = vmatmul.mubr.bf16.vlgmr.msra.gmra.mrb[128].mxu1 %v3022_v26  ;;  %v2902_v11 = vmax.f32 %v6586_v58, 0.0  ;;  %v2904_v48 = vmax.f32 %v6650_v2, 0.0  ;;  %v7566_v58 = vld [vmem:[#allocation8 + $0x284] ss:$16 sps:$4 sm:$0xff]  }
 0x2fc   : > { %v6589_v55 = vadd.f32 %v2365_v41, %v8596_v5  ;;  %v6653_v0 = vadd.f32 %v2751_v51, %v8599_v10  ;;  %4070 = vmatpush1.bf16.msra.mxu0 %v7540_v32  ;;  %4456 = vmatpush1.bf16.msra.mxu1 %v7543_v34  ;;  %v2903_v59 = vmax.f32 %v6587_v43, 0.0  ;;  %v2905_v63 = vmax.f32 %v6651_v45, 0.0  ;;  %v7558_v32 = vld [vmem:[#allocation8 + $0x260] ss:$16 sps:$4 sm:$0xff]   ;;  %v7561_v34 = vld [vmem:[#allocation8 + $0x268] ss:$16 sps:$4 sm:$0xff]  }
 0x2fd   : > { %v2906_v52 = vmax.f32 %v6588_v50, 0.0  ;;  %v2908_v31 = vmax.f32 %v6652_v33, 0.0  ;;  %4071 = vmatprep.subr.bf16.mxu0 %v7548_v37  ;;  %4457 = vmatprep.subr.bf16.mxu1 %v7551_v42  ;;  %v7569_v42 = vld [vmem:[#allocation8 + $0x28c] ss:$16 sps:$4 sm:$0xff]  }
 0x2fe   : > { %v2907_v38 = vmax.f32 %v6589_v55, 0.0  ;;  %v2909_v40 = vmax.f32 %v6653_v0, 0.0 }
 0x2ff   : > { %v3026_v9 = vpack.c.bf16 %v2906_v52, %v2902_v11  ;;  %v8621_v13 = vpack.c.bf16 %v2908_v31, %v2904_v48  ;;  %v7572_v31 = vld [vmem:[#allocation8 + $0x2a4] ss:$16 sps:$4 sm:$0xff]  }
 0x300   : > { %v3027_v46 = vpack.c.bf16 %v2907_v38, %v2903_v59  ;;  %v8623_v36 = vpack.c.bf16 %v2909_v40, %v2905_v63  ;;  %v2369_v62 = vpop.f32.mrb[72].mxu0  ;;  %v2755_v61 = vpop.f32.mrb[72].mxu1  ;;  %4072 = vmatpush1.bf16.msra.mxu0 %v7546_v60  ;;  %4458 = vmatpush1.bf16.msra.mxu1 %v7549_v30  ;;  %v7564_v60 = vld [vmem:[#allocation8 + $0x280] ss:$16 sps:$4 sm:$0xff]   ;;  %v7567_v30 = vld [vmem:[#allocation8 + $0x288] ss:$16 sps:$4 sm:$0xff]  }
 0x301   : > { %v6590_v3 = vadd.f32 %v2369_v62, %v8590_v16  ;;  %v6654_v6 = vadd.f32 %v2755_v61, %v8593_v21  ;;  %v2371_v22 = vpop.f32.mrb[73].mxu0  ;;  %v2757_v12 = vpop.f32.mrb[73].mxu1  ;;  %4073 = vmatprep.subr.bf16.mxu0 %v7554_v7  ;;  %4459 = vmatprep.subr.bf16.mxu1 %v7557_v35  ;;  %v7575_v35 = vld [vmem:[#allocation8 + $0x2ac] ss:$16 sps:$4 sm:$0xff]  }
 0x302   : > { %v6591_v39 = vadd.f32 %v2371_v22, %v8596_v5  ;;  %v6655_v25 = vadd.f32 %v2757_v12, %v8599_v10  ;;  %v2373_v17 = vpop.f32.mrb[74].mxu0  ;;  %v2759_v20 = vpop.f32.mrb[74].mxu1  ;;  %3918 = vmatprep.mubr.bf16.mxu0 %v3027_v46  ;;  %4304 = vmatprep.mubr.bf16.mxu1 %v3027_v46  ;;  %v7578_v22 = vld [vmem:[#allocation8 + $0x2c4] ss:$16 sps:$4 sm:$0xff]  }
 0x303   : > { %v6592_v23 = vadd.f32 %v2373_v17, %v8590_v16  ;;  %v6656_v57 = vadd.f32 %v2759_v20, %v8593_v21  ;;  %v2375_v26 = vpop.f32.mrb[75].mxu0  ;;  %v2761_v19 = vpop.f32.mrb[75].mxu1  ;;  %3919 = vmatmul.mubr.bf16.gmra.mrb[132].mxu0 %v3026_v9  ;;  %4305 = vmatmul.mubr.bf16.gmra.mrb[132].mxu1 %v3026_v9  ;;  %v2910_v2 = vmax.f32 %v6590_v3, 0.0  ;;  %v2912_v4 = vmax.f32 %v6654_v6, 0.0  ;;  %v7570_v3 = vld [vmem:[#allocation8 + $0x2a0] ss:$16 sps:$4 sm:$0xff]  }
 0x304   : > { %v6593_v27 = vadd.f32 %v2375_v26, %v8596_v5  ;;  %v6657_v29 = vadd.f32 %v2761_v19, %v8599_v10  ;;  %4074 = vmatpush1.bf16.msra.mxu0 %v7552_v1  ;;  %4460 = vmatpush1.bf16.msra.mxu1 %v7555_v44  ;;  %v2911_v43 = vmax.f32 %v6591_v39, 0.0  ;;  %v2913_v45 = vmax.f32 %v6655_v25, 0.0  ;;  %v7573_v6 = vld [vmem:[#allocation8 + $0x2a8] ss:$16 sps:$4 sm:$0xff]   ;;  %v7581_v25 = vld [vmem:[#allocation8 + $0x2cc] ss:$16 sps:$4 sm:$0xff]  }
 0x305   : > { %v2914_v53 = vmax.f32 %v6592_v23, 0.0  ;;  %v2916_v37 = vmax.f32 %v6656_v57, 0.0  ;;  %4075 = vmatprep.subr.bf16.mxu0 %v7560_v14  ;;  %4461 = vmatprep.subr.bf16.mxu1 %v7563_v15 }
 0x306   : > { %v2915_v47 = vmax.f32 %v6593_v27, 0.0  ;;  %v2917_v49 = vmax.f32 %v6657_v29, 0.0 }
 0x307   : > { %v3030_v50 = vpack.c.bf16 %v2914_v53, %v2910_v2  ;;  %v8633_v33 = vpack.c.bf16 %v2916_v37, %v2912_v4  ;;  %v7579_v2 = vld [vmem:[#allocation8 + $0x2c8] ss:$16 sps:$4 sm:$0xff]  }
 0x308   : > { %v3031_v41 = vpack.c.bf16 %v2915_v47, %v2911_v43  ;;  %v8635_v51 = vpack.c.bf16 %v2917_v49, %v2913_v45  ;;  %v2379_v55 = vpop.f32.mrb[76].mxu0  ;;  %v2765_v0 = vpop.f32.mrb[76].mxu1  ;;  %4076 = vmatpush1.bf16.msra.mxu0 %v7558_v32  ;;  %4462 = vmatpush1.bf16.msra.mxu1 %v7561_v34  ;;  %v7584_v43 = vld [vmem:[#allocation8 + $0x2e4] ss:$16 sps:$4 sm:$0xff]   ;;  %v7587_v45 = vld [vmem:[#allocation8 + $0x2ec] ss:$16 sps:$4 sm:$0xff]  }
 0x309   : > { %v6594_v7 = vadd.f32 %v2379_v55, %v8590_v16  ;;  %v6658_v11 = vadd.f32 %v2765_v0, %v8593_v21  ;;  %v2381_v48 = vpop.f32.mrb[77].mxu0  ;;  %v2767_v52 = vpop.f32.mrb[77].mxu1  ;;  %4077 = vmatprep.subr.bf16.mxu0 %v7566_v58  ;;  %4463 = vmatprep.subr.bf16.mxu1 %v7569_v42  ;;  %v7576_v58 = vld [vmem:[#allocation8 + $0x2c0] ss:$16 sps:$4 sm:$0xff]  }
 0x30a   : > { %v6595_v59 = vadd.f32 %v2381_v48, %v8596_v5  ;;  %v6659_v63 = vadd.f32 %v2767_v52, %v8599_v10  ;;  %v2383_v38 = vpop.f32.mrb[78].mxu0  ;;  %v2769_v40 = vpop.f32.mrb[78].mxu1  ;;  %3928 = vmatprep.mubr.bf16.mxu0 %v3031_v41  ;;  %4314 = vmatprep.mubr.bf16.mxu1 %v3031_v41  ;;  %v7582_v48 = vld [vmem:[#allocation8 + $0x2e0] ss:$16 sps:$4 sm:$0xff]   ;;  %v7585_v52 = vld [vmem:[#allocation8 + $0x2e8] ss:$16 sps:$4 sm:$0xff]  }
 0x30b   : > { %v6596_v9 = vadd.f32 %v2383_v38, %v8590_v16  ;;  %v6660_v46 = vadd.f32 %v2769_v40, %v8593_v21  ;;  %v2385_v62 = vpop.f32.mrb[79].mxu0  ;;  %v2771_v61 = vpop.f32.mrb[79].mxu1  ;;  %3929 = vmatmul.mubr.bf16.gmra.mrb[136].mxu0 %v3030_v50  ;;  %4315 = vmatmul.mubr.bf16.gmra.mrb[136].mxu1 %v3030_v50  ;;  %v2918_v12 = vmax.f32 %v6594_v7, 0.0  ;;  %v2920_v14 = vmax.f32 %v6658_v11, 0.0  ;;  %v7593_v40 = vld [vmem:[#allocation8 + $0x30c] ss:$16 sps:$4 sm:$0xff]  }
 0x30c   : > { %v6597_v1 = vadd.f32 %v2385_v62, %v8596_v5  ;;  %v6661_v44 = vadd.f32 %v2771_v61, %v8599_v10  ;;  %4078 = vmatpush1.bf16.msra.mxu0 %v7564_v60  ;;  %4464 = vmatpush1.bf16.msra.mxu1 %v7567_v30  ;;  %v2919_v17 = vmax.f32 %v6595_v59, 0.0  ;;  %v2921_v20 = vmax.f32 %v6659_v63, 0.0 }
 0x30d   : > { %v2922_v15 = vmax.f32 %v6596_v9, 0.0  ;;  %v2924_v39 = vmax.f32 %v6660_v46, 0.0  ;;  %4079 = vmatprep.subr.bf16.mxu0 %v7572_v31  ;;  %4465 = vmatprep.subr.bf16.mxu1 %v7575_v35  ;;  %v7590_v31 = vld [vmem:[#allocation8 + $0x304] ss:$16 sps:$4 sm:$0xff]  }
 0x30e   : > { %v2923_v23 = vmax.f32 %v6597_v1, 0.0  ;;  %v2925_v57 = vmax.f32 %v6661_v44, 0.0 }
 0x30f   : > { %v3034_v26 = vpack.c.bf16 %v2922_v15, %v2918_v12  ;;  %v8645_v19 = vpack.c.bf16 %v2924_v39, %v2920_v14  ;;  %v7588_v14 = vld [vmem:[#allocation8 + $0x300] ss:$16 sps:$4 sm:$0xff]   ;;  %v7591_v15 = vld [vmem:[#allocation8 + $0x308] ss:$16 sps:$4 sm:$0xff]  }
 0x310   : > { %v3035_v27 = vpack.c.bf16 %v2923_v23, %v2919_v17  ;;  %v8647_v29 = vpack.c.bf16 %v2925_v57, %v2921_v20  ;;  %v2389_v32 = vpop.f32.mrb[80].mxu0  ;;  %v2775_v34 = vpop.f32.mrb[80].mxu1  ;;  %4080 = vmatpush1.bf16.msra.mxu0 %v7570_v3  ;;  %4466 = vmatpush1.bf16.msra.mxu1 %v7573_v6  ;;  %v7596_v23 = vld [vmem:[#allocation8 + $0x324] ss:$16 sps:$4 sm:$0xff]   ;;  %v7599_v57 = vld [vmem:[#allocation8 + $0x32c] ss:$16 sps:$4 sm:$0xff]  }
 0x311   : > { %v6598_v4 = vadd.f32 %v2389_v32, %v8590_v16  ;;  %v6662_v53 = vadd.f32 %v2775_v34, %v8593_v21  ;;  %v2391_v37 = vpop.f32.mrb[81].mxu0  ;;  %v2777_v42 = vpop.f32.mrb[81].mxu1  ;;  %4081 = vmatprep.subr.bf16.mxu0 %v7578_v22  ;;  %4467 = vmatprep.subr.bf16.mxu1 %v7581_v25 }
 0x312   : > { %v6599_v47 = vadd.f32 %v2391_v37, %v8596_v5  ;;  %v6663_v49 = vadd.f32 %v2777_v42, %v8599_v10  ;;  %v2393_v50 = vpop.f32.mrb[82].mxu0  ;;  %v2779_v41 = vpop.f32.mrb[82].mxu1  ;;  %3938 = vmatprep.mubr.bf16.mxu0 %v3035_v27  ;;  %4324 = vmatprep.mubr.bf16.mxu1 %v3035_v27 }
 0x313   : > { %v6600_v55 = vadd.f32 %v2393_v50, %v8590_v16  ;;  %v6664_v0 = vadd.f32 %v2779_v41, %v8593_v21  ;;  %v2395_v60 = vpop.f32.mrb[83].mxu0  ;;  %v2781_v30 = vpop.f32.mrb[83].mxu1  ;;  %3939 = vmatmul.mubr.bf16.gmra.mrb[140].mxu0 %v3034_v26  ;;  %4325 = vmatmul.mubr.bf16.gmra.mrb[140].mxu1 %v3034_v26  ;;  %v2926_v35 = vmax.f32 %v6598_v4, 0.0  ;;  %v2928_v59 = vmax.f32 %v6662_v53, 0.0 }
 0x314   : > { %v6601_v7 = vadd.f32 %v2395_v60, %v8596_v5  ;;  %v6665_v11 = vadd.f32 %v2781_v30, %v8599_v10  ;;  %4082 = vmatpush1.bf16.msra.mxu0 %v7576_v58  ;;  %4468 = vmatpush1.bf16.msra.mxu1 %v7579_v2  ;;  %v2927_v9 = vmax.f32 %v6599_v47, 0.0  ;;  %v2929_v46 = vmax.f32 %v6663_v49, 0.0  ;;  %v7602_v47 = vld [vmem:[#allocation8 + $0x344] ss:$16 sps:$4 sm:$0xff]  }
 0x315   : > { %v2930_v63 = vmax.f32 %v6600_v55, 0.0  ;;  %v2932_v38 = vmax.f32 %v6664_v0, 0.0  ;;  %4083 = vmatprep.subr.bf16.mxu0 %v7584_v43  ;;  %4469 = vmatprep.subr.bf16.mxu1 %v7587_v45  ;;  %v7594_v43 = vld [vmem:[#allocation8 + $0x320] ss:$16 sps:$4 sm:$0xff]   ;;  %v7597_v45 = vld [vmem:[#allocation8 + $0x328] ss:$16 sps:$4 sm:$0xff]  }
 0x316   : > { %v2931_v62 = vmax.f32 %v6601_v7, 0.0  ;;  %v2933_v61 = vmax.f32 %v6665_v11, 0.0  ;;  %v7605_v0 = vld [vmem:[#allocation8 + $0x34c] ss:$16 sps:$4 sm:$0xff]  }
 0x317   : > { %v3038_v1 = vpack.c.bf16 %v2930_v63, %v2926_v35  ;;  %v8657_v44 = vpack.c.bf16 %v2932_v38, %v2928_v59  ;;  %v7600_v38 = vld [vmem:[#allocation8 + $0x340] ss:$16 sps:$4 sm:$0xff]  }
 0x318   : > { %v3039_v3 = vpack.c.bf16 %v2931_v62, %v2927_v9  ;;  %v8659_v6 = vpack.c.bf16 %v2933_v61, %v2929_v46  ;;  %v2399_v22 = vpop.f32.mrb[84].mxu0  ;;  %v2785_v12 = vpop.f32.mrb[84].mxu1  ;;  %4084 = vmatpush1.bf16.msra.mxu0 %v7582_v48  ;;  %4470 = vmatpush1.bf16.msra.mxu1 %v7585_v52 }
 0x319   : > { %v6602_v39 = vadd.f32 %v2399_v22, %v8590_v16  ;;  %v6666_v25 = vadd.f32 %v2785_v12, %v8593_v21  ;;  %v2401_v17 = vpop.f32.mrb[85].mxu0  ;;  %v2787_v20 = vpop.f32.mrb[85].mxu1  ;;  %4085 = vmatprep.subr.bf16.mxu0 %v7590_v31  ;;  %4471 = vmatprep.subr.bf16.mxu1 %v7593_v40  ;;  %v7603_v40 = vld [vmem:[#allocation8 + $0x348] ss:$16 sps:$4 sm:$0xff]  }
 0x31a   : > { %v6603_v26 = vadd.f32 %v2401_v17, %v8596_v5  ;;  %v6667_v27 = vadd.f32 %v2787_v20, %v8599_v10  ;;  %v2403_v32 = vpop.f32.mrb[86].mxu0  ;;  %v2789_v34 = vpop.f32.mrb[86].mxu1  ;;  %3948 = vmatprep.mubr.bf16.mxu0 %v3039_v3  ;;  %4334 = vmatprep.mubr.bf16.mxu1 %v3039_v3  ;;  %v7611_v3 = vld [vmem:[#allocation8 + $0x36c] ss:$16 sps:$4 sm:$0xff]  }
 0x31b   : > { %v6604_v58 = vadd.f32 %v2403_v32, %v8590_v16  ;;  %v6668_v2 = vadd.f32 %v2789_v34, %v8593_v21  ;;  %v2405_v4 = vpop.f32.mrb[87].mxu0  ;;  %v2791_v53 = vpop.f32.mrb[87].mxu1  ;;  %3949 = vmatmul.mubr.bf16.gmra.mrb[144].mxu0 %v3038_v1  ;;  %4335 = vmatmul.mubr.bf16.gmra.mrb[144].mxu1 %v3038_v1  ;;  %v2934_v49 = vmax.f32 %v6602_v39, 0.0  ;;  %v2936_v50 = vmax.f32 %v6666_v25, 0.0  ;;  %v7608_v1 = vld [vmem:[#allocation8 + $0x364] ss:$16 sps:$4 sm:$0xff]  }
 0x31c   : > { %v6605_v37 = vadd.f32 %v2405_v4, %v8596_v5  ;;  %v6669_v42 = vadd.f32 %v2791_v53, %v8599_v10  ;;  %4086 = vmatpush1.bf16.msra.mxu0 %v7588_v14  ;;  %4472 = vmatpush1.bf16.msra.mxu1 %v7591_v15  ;;  %v2935_v60 = vmax.f32 %v6603_v26, 0.0  ;;  %v2937_v30 = vmax.f32 %v6667_v27, 0.0  ;;  %v7606_v26 = vld [vmem:[#allocation8 + $0x360] ss:$16 sps:$4 sm:$0xff]   ;;  %v7609_v27 = vld [vmem:[#allocation8 + $0x368] ss:$16 sps:$4 sm:$0xff]  }
 0x31d   : > { %v2938_v41 = vmax.f32 %v6604_v58, 0.0  ;;  %v2940_v55 = vmax.f32 %v6668_v2, 0.0  ;;  %4087 = vmatprep.subr.bf16.mxu0 %v7596_v23  ;;  %4473 = vmatprep.subr.bf16.mxu1 %v7599_v57  ;;  %v7614_v32 = vld [vmem:[#allocation8 + $0x384] ss:$16 sps:$4 sm:$0xff]   ;;  %v7617_v53 = vld [vmem:[#allocation8 + $0x38c] ss:$16 sps:$4 sm:$0xff]  }
 0x31e   : > { %v2939_v7 = vmax.f32 %v6605_v37, 0.0  ;;  %v2941_v11 = vmax.f32 %v6669_v42, 0.0 }
 0x31f   : > { %v3042_v48 = vpack.c.bf16 %v2938_v41, %v2934_v49  ;;  %v8669_v52 = vpack.c.bf16 %v2940_v55, %v2936_v50 }
 0x320   : > { %v3043_v31 = vpack.c.bf16 %v2939_v7, %v2935_v60  ;;  %v8671_v35 = vpack.c.bf16 %v2941_v11, %v2937_v30  ;;  %v2409_v59 = vpop.f32.mrb[88].mxu0  ;;  %v2795_v63 = vpop.f32.mrb[88].mxu1  ;;  %4088 = vmatpush1.bf16.msra.mxu0 %v7594_v43  ;;  %4474 = vmatpush1.bf16.msra.mxu1 %v7597_v45  ;;  %v7612_v60 = vld [vmem:[#allocation8 + $0x380] ss:$16 sps:$4 sm:$0xff]   ;;  %v7615_v30 = vld [vmem:[#allocation8 + $0x388] ss:$16 sps:$4 sm:$0xff]  }
 0x321   : > { %v6606_v9 = vadd.f32 %v2409_v59, %v8590_v16  ;;  %v6670_v46 = vadd.f32 %v2795_v63, %v8593_v21  ;;  %v2411_v62 = vpop.f32.mrb[89].mxu0  ;;  %v2797_v61 = vpop.f32.mrb[89].mxu1  ;;  %4089 = vmatprep.subr.bf16.mxu0 %v7602_v47  ;;  %4475 = vmatprep.subr.bf16.mxu1 %v7605_v0  ;;  %v7620_v59 = vld [vmem:[#allocation8 + $0x3a4] ss:$16 sps:$4 sm:$0xff]   ;;  %v7623_v63 = vld [vmem:[#allocation8 + $0x3ac] ss:$16 sps:$4 sm:$0xff]  }
 0x322   : > { %v6607_v22 = vadd.f32 %v2411_v62, %v8596_v5  ;;  %v6671_v12 = vadd.f32 %v2797_v61, %v8599_v10  ;;  %v2413_v14 = vpop.f32.mrb[90].mxu0  ;;  %v2799_v15 = vpop.f32.mrb[90].mxu1  ;;  %3958 = vmatprep.mubr.bf16.mxu0 %v3043_v31  ;;  %4344 = vmatprep.mubr.bf16.mxu1 %v3043_v31 }
 0x323   : > { %v6608_v39 = vadd.f32 %v2413_v14, %v8590_v16  ;;  %v6672_v25 = vadd.f32 %v2799_v15, %v8593_v21  ;;  %v2415_v17 = vpop.f32.mrb[91].mxu0  ;;  %v2801_v20 = vpop.f32.mrb[91].mxu1  ;;  %3959 = vmatmul.mubr.bf16.gmra.mrb[148].mxu0 %v3042_v48  ;;  %4345 = vmatmul.mubr.bf16.gmra.mrb[148].mxu1 %v3042_v48  ;;  %v2942_v34 = vmax.f32 %v6606_v9, 0.0  ;;  %v2944_v58 = vmax.f32 %v6670_v46, 0.0  ;;  %v7618_v14 = vld [vmem:[#allocation8 + $0x3a0] ss:$16 sps:$4 sm:$0xff]  }
 0x324   : > { %v6609_v23 = vadd.f32 %v2415_v17, %v8596_v5  ;;  %v6673_v57 = vadd.f32 %v2801_v20, %v8599_v10  ;;  %4090 = vmatpush1.bf16.msra.mxu0 %v7600_v38  ;;  %4476 = vmatpush1.bf16.msra.mxu1 %v7603_v40  ;;  %v2943_v37 = vmax.f32 %v6607_v22, 0.0  ;;  %v2945_v42 = vmax.f32 %v6671_v12, 0.0  ;;  %v7621_v15 = vld [vmem:[#allocation8 + $0x3a8] ss:$16 sps:$4 sm:$0xff]  }
 0x325   : > { %v2946_v2 = vmax.f32 %v6608_v39, 0.0  ;;  %v2948_v4 = vmax.f32 %v6672_v25, 0.0  ;;  %4091 = vmatprep.subr.bf16.mxu0 %v7608_v1  ;;  %4477 = vmatprep.subr.bf16.mxu1 %v7611_v3  ;;  %v7626_v39 = vld [vmem:[#allocation8 + $0x3c4] ss:$16 sps:$4 sm:$0xff]  }
 0x326   : > { %v2947_v43 = vmax.f32 %v6609_v23, 0.0  ;;  %v2949_v45 = vmax.f32 %v6673_v57, 0.0  ;;  %v7629_v57 = vld [vmem:[#allocation8 + $0x3cc] ss:$16 sps:$4 sm:$0xff]  }
 0x327   : > { %v3046_v47 = vpack.c.bf16 %v2946_v2, %v2942_v34  ;;  %v8681_v49 = vpack.c.bf16 %v2948_v4, %v2944_v58 }
 0x328   : > { %v3047_v50 = vpack.c.bf16 %v2947_v43, %v2943_v37  ;;  %v8683_v41 = vpack.c.bf16 %v2949_v45, %v2945_v42  ;;  %v2419_v55 = vpop.f32.mrb[92].mxu0  ;;  %v2805_v0 = vpop.f32.mrb[92].mxu1  ;;  %4092 = vmatpush1.bf16.msra.mxu0 %v7606_v26  ;;  %4478 = vmatpush1.bf16.msra.mxu1 %v7609_v27  ;;  %v7624_v43 = vld [vmem:[#allocation8 + $0x3c0] ss:$16 sps:$4 sm:$0xff]   ;;  %v7627_v45 = vld [vmem:[#allocation8 + $0x3c8] ss:$16 sps:$4 sm:$0xff]  }
 0x329   : > { %v6610_v7 = vadd.f32 %v2419_v55, %v8590_v16  ;;  %v6674_v11 = vadd.f32 %v2805_v0, %v8593_v21  ;;  %v2421_v48 = vpop.f32.mrb[93].mxu0  ;;  %v2807_v31 = vpop.f32.mrb[93].mxu1  ;;  %4093 = vmatprep.subr.bf16.mxu0 %v7614_v32  ;;  %4479 = vmatprep.subr.bf16.mxu1 %v7617_v53 }
 0x32a   : > { %v6611_v38 = vadd.f32 %v2421_v48, %v8596_v5  ;;  %v6675_v40 = vadd.f32 %v2807_v31, %v8599_v10  ;;  %v2423_v9 = vpop.f32.mrb[94].mxu0  ;;  %v2809_v46 = vpop.f32.mrb[94].mxu1  ;;  %3968 = vmatprep.mubr.bf16.mxu0 %v3047_v50  ;;  %4354 = vmatprep.mubr.bf16.mxu1 %v3047_v50 }
 0x32b   : > { %v6612_v62 = vadd.f32 %v2423_v9, %v8590_v16  ;;  %v6676_v61 = vadd.f32 %v2809_v46, %v8593_v21  ;;  %v2425_v1 = vpop.f32.mrb[95].mxu0  ;;  %v2811_v3 = vpop.f32.mrb[95].mxu1  ;;  %3969 = vmatmul.mubr.bf16.gmra.mrb[152].mxu0 %v3046_v47  ;;  %4355 = vmatmul.mubr.bf16.gmra.mrb[152].mxu1 %v3046_v47  ;;  %v2950_v25 = vmax.f32 %v6610_v7, 0.0  ;;  %v2952_v17 = vmax.f32 %v6674_v11, 0.0 }
 0x32c   : > { %v6613_v22 = vadd.f32 %v2425_v1, %v8596_v5  ;;  %v6677_v12 = vadd.f32 %v2811_v3, %v8599_v10  ;;  %4094 = vmatpush1.bf16.msra.mxu0 %v7612_v60  ;;  %4480 = vmatpush1.bf16.msra.mxu1 %v7615_v30  ;;  %v2951_v26 = vmax.f32 %v6611_v38, 0.0  ;;  %v2953_v27 = vmax.f32 %v6675_v40, 0.0  ;;  %v7632_v60 = vld [vmem:[#allocation8 + $0x3e4] ss:$16 sps:$4 sm:$0xff]   ;;  %v7635_v30 = vld [vmem:[#allocation8 + $0x3ec] ss:$16 sps:$4 sm:$0xff]  }
 0x32d   : > { %v2954_v20 = vmax.f32 %v6612_v62, 0.0  ;;  %v2956_v23 = vmax.f32 %v6676_v61, 0.0  ;;  %4095 = vmatprep.subr.bf16.mxu0 %v7620_v59  ;;  %4481 = vmatprep.subr.bf16.mxu1 %v7623_v63  ;;  %v7630_v62 = vld [vmem:[#allocation8 + $0x3e0] ss:$16 sps:$4 sm:$0xff]   ;;  %v7633_v61 = vld [vmem:[#allocation8 + $0x3e8] ss:$16 sps:$4 sm:$0xff]  }
 0x32e   : > { %v2955_v32 = vmax.f32 %v6613_v22, 0.0  ;;  %v2957_v34 = vmax.f32 %v6677_v12, 0.0 }
 0x32f   : > { %v3050_v58 = vpack.c.bf16 %v2954_v20, %v2950_v25  ;;  %v8693_v2 = vpack.c.bf16 %v2956_v23, %v2952_v17 }
 0x330   : > { %v3051_v4 = vpack.c.bf16 %v2955_v32, %v2951_v26  ;;  %v8695_v53 = vpack.c.bf16 %v2957_v34, %v2953_v27  ;;  %v2429_v37 = vpop.f32.mrb[96].mxu0  ;;  %v2815_v42 = vpop.f32.mrb[96].mxu1  ;;  %4096 = vmatpush1.bf16.msra.mxu0 %v7618_v14  ;;  %4482 = vmatpush1.bf16.msra.mxu1 %v7621_v15 }
 0x331   : > { %v6614_v47 = vadd.f32 %v2429_v37, %v8590_v16  ;;  %v6678_v50 = vadd.f32 %v2815_v42, %v8593_v21  ;;  %v2431_v55 = vpop.f32.mrb[97].mxu0  ;;  %v2817_v0 = vpop.f32.mrb[97].mxu1  ;;  %4097 = vmatprep.subr.bf16.mxu0 %v7626_v39  ;;  %4483 = vmatprep.subr.bf16.mxu1 %v7629_v57 }
 0x332   : > { %v6615_v7 = vadd.f32 %v2431_v55, %v8596_v5  ;;  %v6679_v11 = vadd.f32 %v2817_v0, %v8599_v10  ;;  %v2433_v48 = vpop.f32.mrb[98].mxu0  ;;  %v2819_v31 = vpop.f32.mrb[98].mxu1  ;;  %3978 = vmatprep.mubr.bf16.mxu0 %v3051_v4  ;;  %4364 = vmatprep.mubr.bf16.mxu1 %v3051_v4 }
 0x333   : > { %v6616_v59 = vadd.f32 %v2433_v48, %v8590_v16  ;;  %v6680_v63 = vadd.f32 %v2819_v31, %v8593_v21  ;;  %v2435_v38 = vpop.f32.mrb[99].mxu0  ;;  %v2821_v40 = vpop.f32.mrb[99].mxu1  ;;  %3979 = vmatmul.mubr.bf16.gmra.mrb[156].mxu0 %v3050_v58  ;;  %4365 = vmatmul.mubr.bf16.gmra.mrb[156].mxu1 %v3050_v58  ;;  %v2958_v1 = vmax.f32 %v6614_v47, 0.0  ;;  %v2960_v3 = vmax.f32 %v6678_v50, 0.0 }
 0x334   : > { %v6617_v9 = vadd.f32 %v2435_v38, %v8596_v5  ;;  %v6681_v46 = vadd.f32 %v2821_v40, %v8599_v10  ;;  %4098 = vmatpush1.bf16.msra.mxu0 %v7624_v43  ;;  %4484 = vmatpush1.bf16.msra.mxu1 %v7627_v45  ;;  %v2959_v14 = vmax.f32 %v6615_v7, 0.0  ;;  %v2961_v15 = vmax.f32 %v6679_v11, 0.0 }
 0x335   : > { %v2962_v22 = vmax.f32 %v6616_v59, 0.0  ;;  %v2964_v12 = vmax.f32 %v6680_v63, 0.0  ;;  %4099 = vmatprep.subr.bf16.mxu0 %v7632_v60  ;;  %4485 = vmatprep.subr.bf16.mxu1 %v7635_v30 }
 0x336   : > { %v2963_v39 = vmax.f32 %v6617_v9, 0.0  ;;  %v2965_v25 = vmax.f32 %v6681_v46, 0.0 }
 0x337   : > { %v3054_v17 = vpack.c.bf16 %v2962_v22, %v2958_v1  ;;  %v8705_v20 = vpack.c.bf16 %v2964_v12, %v2960_v3 }
 0x338   : > { %v3055_v23 = vpack.c.bf16 %v2963_v39, %v2959_v14  ;;  %v8707_v57 = vpack.c.bf16 %v2965_v25, %v2961_v15  ;;  %v2439_v26 = vpop.f32.mrb[100].mxu0  ;;  %v2825_v27 = vpop.f32.mrb[100].mxu1  ;;  %4100 = vmatpush1.bf16.msra.mxu0 %v7630_v62  ;;  %4486 = vmatpush1.bf16.msra.mxu1 %v7633_v61 }
 0x339   : > { %v6618_v32 = vadd.f32 %v2439_v26, %v8590_v16  ;;  %v6682_v34 = vadd.f32 %v2825_v27, %v8593_v21  ;;  %v2441_v58 = vpop.f32.mrb[101].mxu0  ;;  %v2827_v4 = vpop.f32.mrb[101].mxu1 }
 0x33a   : > { %v6619_v37 = vadd.f32 %v2441_v58, %v8596_v5  ;;  %v6683_v42 = vadd.f32 %v2827_v4, %v8599_v10  ;;  %v2443_v43 = vpop.f32.mrb[102].mxu0  ;;  %v2829_v45 = vpop.f32.mrb[102].mxu1  ;;  %3988 = vmatprep.mubr.bf16.mxu0 %v3055_v23  ;;  %4374 = vmatprep.mubr.bf16.mxu1 %v3055_v23 }
 0x33b   : > { %v6620_v47 = vadd.f32 %v2443_v43, %v8590_v16  ;;  %v6684_v50 = vadd.f32 %v2829_v45, %v8593_v21  ;;  %v2445_v55 = vpop.f32.mrb[103].mxu0  ;;  %v2831_v0 = vpop.f32.mrb[103].mxu1  ;;  %3989 = vmatmul.mubr.bf16.gmra.mrb[160].mxu0 %v3054_v17  ;;  %4375 = vmatmul.mubr.bf16.gmra.mrb[160].mxu1 %v3054_v17  ;;  %v2966_v7 = vmax.f32 %v6618_v32, 0.0  ;;  %v2968_v11 = vmax.f32 %v6682_v34, 0.0 }
 0x33c   : > { %v6621_v60 = vadd.f32 %v2445_v55, %v8596_v5  ;;  %v6685_v30 = vadd.f32 %v2831_v0, %v8599_v10  ;;  %v2967_v59 = vmax.f32 %v6619_v37, 0.0  ;;  %v2969_v63 = vmax.f32 %v6683_v42, 0.0 }
 0x33d   : > { %v2970_v48 = vmax.f32 %v6620_v47, 0.0  ;;  %v2972_v31 = vmax.f32 %v6684_v50, 0.0 }
 0x33e   : > { %v2971_v38 = vmax.f32 %v6621_v60, 0.0  ;;  %v2973_v40 = vmax.f32 %v6685_v30, 0.0 }
 0x33f   : > { %v3058_v9 = vpack.c.bf16 %v2970_v48, %v2966_v7  ;;  %v8717_v46 = vpack.c.bf16 %v2972_v31, %v2968_v11 }
 0x340   : > { %v3059_v62 = vpack.c.bf16 %v2971_v38, %v2967_v59  ;;  %v8719_v61 = vpack.c.bf16 %v2973_v40, %v2969_v63  ;;  %v2449_v1 = vpop.f32.mrb[104].mxu0  ;;  %v2835_v3 = vpop.f32.mrb[104].mxu1 }
 0x341   : > { %v6622_v22 = vadd.f32 %v2449_v1, %v8590_v16  ;;  %v6686_v12 = vadd.f32 %v2835_v3, %v8593_v21  ;;  %v2451_v14 = vpop.f32.mrb[105].mxu0  ;;  %v2837_v15 = vpop.f32.mrb[105].mxu1 }
 0x342   : > { %v6623_v39 = vadd.f32 %v2451_v14, %v8596_v5  ;;  %v6687_v25 = vadd.f32 %v2837_v15, %v8599_v10  ;;  %v2453_v17 = vpop.f32.mrb[106].mxu0  ;;  %v2839_v23 = vpop.f32.mrb[106].mxu1  ;;  %3998 = vmatprep.mubr.bf16.mxu0 %v3059_v62  ;;  %4384 = vmatprep.mubr.bf16.mxu1 %v3059_v62 }
 0x343   : > { %v6624_v26 = vadd.f32 %v2453_v17, %v8590_v16  ;;  %v6688_v27 = vadd.f32 %v2839_v23, %v8593_v21  ;;  %v2455_v32 = vpop.f32.mrb[107].mxu0  ;;  %v2841_v34 = vpop.f32.mrb[107].mxu1  ;;  %3999 = vmatmul.mubr.bf16.gmra.mrb[164].mxu0 %v3058_v9  ;;  %4385 = vmatmul.mubr.bf16.gmra.mrb[164].mxu1 %v3058_v9  ;;  %v2974_v37 = vmax.f32 %v6622_v22, 0.0  ;;  %v2976_v42 = vmax.f32 %v6686_v12, 0.0 }
 0x344   : > { %v6625_v58 = vadd.f32 %v2455_v32, %v8596_v5  ;;  %v6689_v4 = vadd.f32 %v2841_v34, %v8599_v10  ;;  %v2975_v47 = vmax.f32 %v6623_v39, 0.0  ;;  %v2977_v50 = vmax.f32 %v6687_v25, 0.0 }
 0x345   : > { %v2978_v43 = vmax.f32 %v6624_v26, 0.0  ;;  %v2980_v45 = vmax.f32 %v6688_v27, 0.0 }
 0x346   : > { %v2979_v55 = vmax.f32 %v6625_v58, 0.0  ;;  %v2981_v0 = vmax.f32 %v6689_v4, 0.0 }
 0x347   : > { %v3062_v60 = vpack.c.bf16 %v2978_v43, %v2974_v37  ;;  %v8729_v30 = vpack.c.bf16 %v2980_v45, %v2976_v42 }
 0x348   : > { %v3063_v7 = vpack.c.bf16 %v2979_v55, %v2975_v47  ;;  %v8731_v11 = vpack.c.bf16 %v2981_v0, %v2977_v50  ;;  %v2459_v48 = vpop.f32.mrb[108].mxu0  ;;  %v2845_v31 = vpop.f32.mrb[108].mxu1 }
 0x349   : > { %v6626_v59 = vadd.f32 %v2459_v48, %v8590_v16  ;;  %v6690_v63 = vadd.f32 %v2845_v31, %v8593_v21  ;;  %v2461_v38 = vpop.f32.mrb[109].mxu0  ;;  %v2847_v40 = vpop.f32.mrb[109].mxu1 }
 0x34a   : > { %v6627_v9 = vadd.f32 %v2461_v38, %v8596_v5  ;;  %v6691_v62 = vadd.f32 %v2847_v40, %v8599_v10  ;;  %v2463_v1 = vpop.f32.mrb[110].mxu0  ;;  %v2849_v3 = vpop.f32.mrb[110].mxu1  ;;  %4008 = vmatprep.mubr.bf16.mxu0 %v3063_v7  ;;  %4394 = vmatprep.mubr.bf16.mxu1 %v3063_v7 }
 0x34b   : > { %v6628_v22 = vadd.f32 %v2463_v1, %v8590_v16  ;;  %v6692_v12 = vadd.f32 %v2849_v3, %v8593_v21  ;;  %v2465_v14 = vpop.f32.mrb[111].mxu0  ;;  %v2851_v15 = vpop.f32.mrb[111].mxu1  ;;  %4009 = vmatmul.mubr.bf16.gmra.mrb[168].mxu0 %v3062_v60  ;;  %4395 = vmatmul.mubr.bf16.gmra.mrb[168].mxu1 %v3062_v60  ;;  %v2982_v17 = vmax.f32 %v6626_v59, 0.0  ;;  %v2984_v23 = vmax.f32 %v6690_v63, 0.0 }
 0x34c   : > { %v6629_v39 = vadd.f32 %v2465_v14, %v8596_v5  ;;  %v6693_v25 = vadd.f32 %v2851_v15, %v8599_v10  ;;  %v2983_v32 = vmax.f32 %v6627_v9, 0.0  ;;  %v2985_v34 = vmax.f32 %v6691_v62, 0.0 }
 0x34d   : > { %v2986_v26 = vmax.f32 %v6628_v22, 0.0  ;;  %v2988_v27 = vmax.f32 %v6692_v12, 0.0  ;;  %v7636_v22 = vld [vmem:[#allocation10 + $0x40] sm:$0xff]  }
 0x34e   : > { %v2987_v58 = vmax.f32 %v6629_v39, 0.0  ;;  %v2989_v4 = vmax.f32 %v6693_v25, 0.0  ;;  %v7638_v12 = vld [vmem:[#allocation10 + $0xc0] sm:$0xff]   ;;  %6358 = vmatprep.subr.bf16.mxu0 %v7636_v22 }
 0x34f   : > { %v3066_v37 = vpack.c.bf16 %v2986_v26, %v2982_v17  ;;  %v8741_v42 = vpack.c.bf16 %v2988_v27, %v2984_v23  ;;  %6470 = vmatprep.subr.bf16.mxu1 %v7638_v12 }
 0x350   : > { %v3067_v43 = vpack.c.bf16 %v2987_v58, %v2983_v32  ;;  %v8743_v45 = vpack.c.bf16 %v2989_v4, %v2985_v34  ;;  %v2469_v47 = vpop.f32.mrb[112].mxu0  ;;  %v2855_v50 = vpop.f32.mrb[112].mxu1 }
 0x351   : > { %v6630_v55 = vadd.f32 %v2469_v47, %v8590_v16  ;;  %v6694_v0 = vadd.f32 %v2855_v50, %v8593_v21  ;;  %v2471_v60 = vpop.f32.mrb[113].mxu0  ;;  %v2857_v7 = vpop.f32.mrb[113].mxu1 }
 0x352   : > { %v6631_v48 = vadd.f32 %v2471_v60, %v8596_v5  ;;  %v6695_v31 = vadd.f32 %v2857_v7, %v8599_v10  ;;  %v2473_v59 = vpop.f32.mrb[114].mxu0  ;;  %v2859_v63 = vpop.f32.mrb[114].mxu1  ;;  %4018 = vmatprep.mubr.bf16.mxu0 %v3067_v43  ;;  %4404 = vmatprep.mubr.bf16.mxu1 %v3067_v43 }
 0x353   : > { %v6632_v38 = vadd.f32 %v2473_v59, %v8590_v16  ;;  %v6696_v40 = vadd.f32 %v2859_v63, %v8593_v21  ;;  %v2475_v9 = vpop.f32.mrb[115].mxu0  ;;  %v2861_v62 = vpop.f32.mrb[115].mxu1  ;;  %4019 = vmatmul.mubr.bf16.gmra.mrb[172].mxu0 %v3066_v37  ;;  %4405 = vmatmul.mubr.bf16.gmra.mrb[172].mxu1 %v3066_v37  ;;  %v2990_v14 = vmax.f32 %v6630_v55, 0.0  ;;  %v2992_v15 = vmax.f32 %v6694_v0, 0.0 }
 0x354   : > { %v6633_v1 = vadd.f32 %v2475_v9, %v8596_v5  ;;  %v6697_v3 = vadd.f32 %v2861_v62, %v8599_v10  ;;  %v2991_v17 = vmax.f32 %v6631_v48, 0.0  ;;  %v2993_v23 = vmax.f32 %v6695_v31, 0.0 }
 0x355   : > { %v2994_v39 = vmax.f32 %v6632_v38, 0.0  ;;  %v2996_v25 = vmax.f32 %v6696_v40, 0.0 }
 0x356   : > { %v2995_v26 = vmax.f32 %v6633_v1, 0.0  ;;  %v2997_v27 = vmax.f32 %v6697_v3, 0.0 }
 0x357   : > { %v3070_v32 = vpack.c.bf16 %v2994_v39, %v2990_v14  ;;  %v8753_v34 = vpack.c.bf16 %v2996_v25, %v2992_v15 }
 0x358   : > { %v3071_v58 = vpack.c.bf16 %v2995_v26, %v2991_v17  ;;  %v8755_v4 = vpack.c.bf16 %v2997_v27, %v2993_v23  ;;  %v2479_v37 = vpop.f32.mrb[116].mxu0  ;;  %v2865_v43 = vpop.f32.mrb[116].mxu1 }
 0x359   : > { %v6634_v47 = vadd.f32 %v2479_v37, %v8590_v16  ;;  %v6698_v50 = vadd.f32 %v2865_v43, %v8593_v21  ;;  %v2481_v55 = vpop.f32.mrb[117].mxu0  ;;  %v2867_v0 = vpop.f32.mrb[117].mxu1 }
 0x35a   : > { %v6635_v60 = vadd.f32 %v2481_v55, %v8596_v5  ;;  %v6699_v7 = vadd.f32 %v2867_v0, %v8599_v10  ;;  %v2483_v48 = vpop.f32.mrb[118].mxu0  ;;  %v2869_v31 = vpop.f32.mrb[118].mxu1  ;;  %4028 = vmatprep.mubr.bf16.mxu0 %v3071_v58  ;;  %4414 = vmatprep.mubr.bf16.mxu1 %v3071_v58 }
 0x35b   : > { %v6636_v59 = vadd.f32 %v2483_v48, %v8590_v16  ;;  %v6700_v63 = vadd.f32 %v2869_v31, %v8593_v21  ;;  %v2485_v38 = vpop.f32.mrb[119].mxu0  ;;  %v2871_v40 = vpop.f32.mrb[119].mxu1  ;;  %4029 = vmatmul.mubr.bf16.gmra.mrb[176].mxu0 %v3070_v32  ;;  %4415 = vmatmul.mubr.bf16.gmra.mrb[176].mxu1 %v3070_v32  ;;  %v2998_v1 = vmax.f32 %v6634_v47, 0.0  ;;  %v3000_v3 = vmax.f32 %v6698_v50, 0.0 }
 0x35c   : > { %v6637_v9 = vadd.f32 %v2485_v38, %v8596_v5  ;;  %v6701_v62 = vadd.f32 %v2871_v40, %v8599_v10  ;;  %v2999_v14 = vmax.f32 %v6635_v60, 0.0  ;;  %v3001_v15 = vmax.f32 %v6699_v7, 0.0 }
 0x35d   : > { %v3002_v22 = vmax.f32 %v6636_v59, 0.0  ;;  %v3004_v12 = vmax.f32 %v6700_v63, 0.0 }
 0x35e   : > { %v3003_v39 = vmax.f32 %v6637_v9, 0.0  ;;  %v3005_v25 = vmax.f32 %v6701_v62, 0.0 }
 0x35f   : > { %v3074_v17 = vpack.c.bf16 %v3002_v22, %v2998_v1  ;;  %v8765_v23 = vpack.c.bf16 %v3004_v12, %v3000_v3 }
 0x360   : > { %v3075_v26 = vpack.c.bf16 %v3003_v39, %v2999_v14  ;;  %v8767_v27 = vpack.c.bf16 %v3005_v25, %v3001_v15  ;;  %v2489_v58 = vpop.f32.mrb[120].mxu0  ;;  %v2875_v32 = vpop.f32.mrb[120].mxu1 }
 0x361   : > { %v6638_v37 = vadd.f32 %v2489_v58, %v8590_v16  ;;  %v6702_v43 = vadd.f32 %v2875_v32, %v8593_v21  ;;  %v2491_v47 = vpop.f32.mrb[121].mxu0  ;;  %v2877_v50 = vpop.f32.mrb[121].mxu1 }
 0x362   : > { %v6639_v55 = vadd.f32 %v2491_v47, %v8596_v5  ;;  %v6703_v0 = vadd.f32 %v2877_v50, %v8599_v10  ;;  %v2493_v60 = vpop.f32.mrb[122].mxu0  ;;  %v2879_v7 = vpop.f32.mrb[122].mxu1  ;;  %4038 = vmatprep.mubr.bf16.mxu0 %v3075_v26  ;;  %4424 = vmatprep.mubr.bf16.mxu1 %v3075_v26 }
 0x363   : > { %v6640_v48 = vadd.f32 %v2493_v60, %v8590_v16  ;;  %v6704_v31 = vadd.f32 %v2879_v7, %v8593_v21  ;;  %v2495_v59 = vpop.f32.mrb[123].mxu0  ;;  %v2881_v63 = vpop.f32.mrb[123].mxu1  ;;  %4039 = vmatmul.mubr.bf16.gmra.mrb[180].mxu0 %v3074_v17  ;;  %4425 = vmatmul.mubr.bf16.gmra.mrb[180].mxu1 %v3074_v17  ;;  %v3006_v9 = vmax.f32 %v6638_v37, 0.0  ;;  %v3008_v62 = vmax.f32 %v6702_v43, 0.0 }
 0x364   : > { %v6641_v38 = vadd.f32 %v2495_v59, %v8596_v5  ;;  %v6705_v40 = vadd.f32 %v2881_v63, %v8599_v10  ;;  %v3007_v22 = vmax.f32 %v6639_v55, 0.0  ;;  %v3009_v12 = vmax.f32 %v6703_v0, 0.0 }
 0x365   : > { %v3010_v1 = vmax.f32 %v6640_v48, 0.0  ;;  %v3012_v3 = vmax.f32 %v6704_v31, 0.0 }
 0x366   : > { %v3011_v14 = vmax.f32 %v6641_v38, 0.0  ;;  %v3013_v15 = vmax.f32 %v6705_v40, 0.0 }
 0x367   : > { %v3078_v39 = vpack.c.bf16 %v3010_v1, %v3006_v9  ;;  %v8777_v25 = vpack.c.bf16 %v3012_v3, %v3008_v62 }
 0x368   : > { %v3079_v26 = vpack.c.bf16 %v3011_v14, %v3007_v22  ;;  %v8779_v58 = vpack.c.bf16 %v3013_v15, %v3009_v12  ;;  %v2499_v32 = vpop.f32.mrb[124].mxu0  ;;  %v2885_v17 = vpop.f32.mrb[124].mxu1 }
 0x369   : > { %v6642_v47 = vadd.f32 %v2499_v32, %v8590_v16  ;;  %v6706_v50 = vadd.f32 %v2885_v17, %v8593_v21  ;;  %v2501_v37 = vpop.f32.mrb[125].mxu0  ;;  %v2887_v43 = vpop.f32.mrb[125].mxu1  ;;  %v7642_v17 = vld [vmem:[#allocation10 + $0xc8] sm:$0xff]  }
 0x36a   : > { %v6643_v60 = vadd.f32 %v2501_v37, %v8596_v5  ;;  %v6707_v55 = vadd.f32 %v2887_v43, %v8599_v10  ;;  %v2503_v0 = vpop.f32.mrb[126].mxu0  ;;  %v2889_v7 = vpop.f32.mrb[126].mxu1  ;;  %4048 = vmatprep.mubr.bf16.mxu0 %v3079_v26  ;;  %4434 = vmatprep.mubr.bf16.mxu1 %v3079_v26  ;;  %v7644_v37 = vld [vmem:[#allocation10 + $0x50] sm:$0xff]  }
 0x36b   : > { %v6644_v48 = vadd.f32 %v2503_v0, %v8590_v16  ;;  %v6708_v31 = vadd.f32 %v2889_v7, %v8593_v21  ;;  %v2505_v59 = vpop.f32.mrb[127].mxu0  ;;  %v2891_v63 = vpop.f32.mrb[127].mxu1  ;;  %4049 = vmatmul.mubr.bf16.gmra.mrb[184].mxu0 %v3078_v39  ;;  %4435 = vmatmul.mubr.bf16.gmra.mrb[184].mxu1 %v3078_v39  ;;  %v3014_v9 = vmax.f32 %v6642_v47, 0.0  ;;  %v3016_v62 = vmax.f32 %v6706_v50, 0.0  ;;  %v7640_v39 = vld [vmem:[#allocation10 + $0x48] sm:$0xff]   ;;  %v7645_v43 = vld [vmem:[#allocation10 + $0x10] sm:$0xff]  }
 0x36c   : > { %v6645_v38 = vadd.f32 %v2505_v59, %v8596_v5  ;;  %v6709_v40 = vadd.f32 %v2891_v63, %v8599_v10  ;;  %v3015_v22 = vmax.f32 %v6643_v60, 0.0  ;;  %v3017_v12 = vmax.f32 %v6707_v55, 0.0  ;;  %v7637_v5 = vld [vmem:[#allocation10] sm:$0xff]   ;;  %v7641_v47 = vld [vmem:[#allocation10 + $0x8] sm:$0xff]   ;;  %v7647_v60 = vld [vmem:[#allocation10 + $0x90] sm:$0xff]  }
 0x36d   : > { %v3018_v1 = vmax.f32 %v6644_v48, 0.0  ;;  %v3020_v3 = vmax.f32 %v6708_v31, 0.0  ;;  %v7639_v10 = vld [vmem:[#allocation10 + $0x80] sm:$0xff]   ;;  %v7643_v50 = vld [vmem:[#allocation10 + $0x88] sm:$0xff]   ;;  %v7648_v55 = vld [vmem:[#allocation10 + $0x58] sm:$0xff]  }
 0x36e   : > { %v3019_v14 = vmax.f32 %v6645_v38, 0.0  ;;  %v3021_v15 = vmax.f32 %v6709_v40, 0.0  ;;  %v7651_v0 = vld [vmem:[#allocation10 + $0x98] sm:$0xff]   ;;  %v7652_v7 = vld [vmem:[#allocation10 + $0x60] sm:$0xff]   ;;  %v7656_v63 = vld [vmem:[#allocation10 + $0x68] sm:$0xff]  }
 0x36f   : > { %v3082_v26 = vpack.c.bf16 %v3018_v1, %v3014_v9  ;;  %v8789_v16 = vpack.c.bf16 %v3020_v3, %v3016_v62  ;;  %v7654_v48 = vld [vmem:[#allocation10 + $0xe0] sm:$0xff]   ;;  %v7659_v38 = vld [vmem:[#allocation10 + $0xa8] sm:$0xff]   ;;  %v7660_v40 = vld [vmem:[#allocation10 + $0x70] sm:$0xff]  }
 0x370   : > { %v3083_v21 = vpack.c.bf16 %v3019_v14, %v3015_v22  ;;  %v8791_v32 = vpack.c.bf16 %v3021_v15, %v3017_v12  ;;  %v7653_v31 = vld [vmem:[#allocation10 + $0x20] sm:$0xff]   ;;  %v7662_v9 = vld [vmem:[#allocation10 + $0xf0] sm:$0xff]   ;;  %v7664_v3 = vld [vmem:[#allocation10 + $0x78] sm:$0xff]  }
 0x371   : > { %v7655_v59 = vld [vmem:[#allocation10 + $0xa0] sm:$0xff]   ;;  %v7661_v62 = vld [vmem:[#allocation10 + $0x30] sm:$0xff]   ;;  %v7667_v22 = vld [vmem:[#allocation10 + $0xb8] sm:$0xff]  }
 0x372   : > { %4058 = vmatprep.mubr.bf16.mxu0 %v3083_v21  ;;  %4444 = vmatprep.mubr.bf16.mxu1 %v3083_v21  ;;  %v7663_v1 = vld [vmem:[#allocation10 + $0xb0] sm:$0xff]  }
 0x373   : > { %4059 = vmatmul.mubr.bf16.gmra.mrb[188].mxu0 %v3082_v26  ;;  %4445 = vmatmul.mubr.bf16.gmra.mrb[188].mxu1 %v3082_v26 }
 0x374   : > { %4101 = vmatprep.mubr.bf16.mxu0 %v8611_v8  ;;  %4487 = vmatprep.mubr.bf16.mxu1 %v8611_v8  ;;  %v7646_v8 = vld [vmem:[#allocation10 + $0xd0] sm:$0xff]  }
 0x37b   : > { %4102 = vmatmul.mubr.bf16.vlgmr.msra.gmra.mrb[128].mxu0 %v8609_v18  ;;  %4488 = vmatmul.mubr.bf16.vlgmr.msra.gmra.mrb[128].mxu1 %v8609_v18  ;;  %v7650_v18 = vld [vmem:[#allocation10 + $0xd8] sm:$0xff]  }
 0x37c   : > { %4111 = vmatprep.mubr.bf16.mxu0 %v8623_v36  ;;  %4497 = vmatprep.mubr.bf16.mxu1 %v8623_v36  ;;  %v7649_v36 = vld [vmem:[#allocation10 + $0x18] sm:$0xff]  }
 0x37d   : > { %6359 = vmatpush3.bf16.msra.mxu0 %v7637_v5  ;;  %6471 = vmatpush3.bf16.msra.mxu1 %v7639_v10 }
 0x37e   : > { %6360 = vmatprep.subr.bf16.mxu0 %v7640_v39  ;;  %6472 = vmatprep.subr.bf16.mxu1 %v7642_v17 }
 0x381   : > { %6361 = vmatpush3.bf16.msra.mxu0 %v7641_v47  ;;  %6473 = vmatpush3.bf16.msra.mxu1 %v7643_v50 }
 0x382   : > { %6362 = vmatprep.subr.bf16.mxu0 %v7644_v37  ;;  %6474 = vmatprep.subr.bf16.mxu1 %v7646_v8 }
 0x383   : > { %4112 = vmatmul.mubr.bf16.gmra.mrb[132].mxu0 %v8621_v13  ;;  %4498 = vmatmul.mubr.bf16.gmra.mrb[132].mxu1 %v8621_v13  ;;  %v7658_v13 = vld [vmem:[#allocation10 + $0xe8] sm:$0xff]  }
 0x384   : > { %4121 = vmatprep.mubr.bf16.mxu0 %v8635_v51  ;;  %4507 = vmatprep.mubr.bf16.mxu1 %v8635_v51  ;;  %v7657_v51 = vld [vmem:[#allocation10 + $0x28] sm:$0xff]  }
 0x385   : > { %6363 = vmatpush3.bf16.msra.mxu0 %v7645_v43  ;;  %6475 = vmatpush3.bf16.msra.mxu1 %v7647_v60 }
 0x386   : > { %6364 = vmatprep.subr.bf16.mxu0 %v7648_v55  ;;  %6476 = vmatprep.subr.bf16.mxu1 %v7650_v18 }
 0x389   : > { %6365 = vmatpush3.bf16.msra.mxu0 %v7649_v36  ;;  %6477 = vmatpush3.bf16.msra.mxu1 %v7651_v0 }
 0x38a   : > { %6366 = vmatprep.subr.bf16.mxu0 %v7652_v7  ;;  %6478 = vmatprep.subr.bf16.mxu1 %v7654_v48 }
 0x38b   : > { %4122 = vmatmul.mubr.bf16.gmra.mrb[136].mxu0 %v8633_v33  ;;  %4508 = vmatmul.mubr.bf16.gmra.mrb[136].mxu1 %v8633_v33  ;;  %v7666_v33 = vld [vmem:[#allocation10 + $0xf8] sm:$0xff]  }
 0x38c   : > { %4131 = vmatprep.mubr.bf16.mxu0 %v8647_v29  ;;  %4517 = vmatprep.mubr.bf16.mxu1 %v8647_v29  ;;  %v7665_v29 = vld [vmem:[#allocation10 + $0x38] sm:$0xff]  }
 0x38d   : > { %6367 = vmatpush3.bf16.msra.mxu0 %v7653_v31  ;;  %6479 = vmatpush3.bf16.msra.mxu1 %v7655_v59 }
 0x38e   : > { %6368 = vmatprep.subr.bf16.mxu0 %v7656_v63  ;;  %6480 = vmatprep.subr.bf16.mxu1 %v7658_v13 }
 0x391   : > { %6369 = vmatpush3.bf16.msra.mxu0 %v7657_v51  ;;  %6481 = vmatpush3.bf16.msra.mxu1 %v7659_v38 }
 0x392   : > { %6370 = vmatprep.subr.bf16.mxu0 %v7660_v40  ;;  %6482 = vmatprep.subr.bf16.mxu1 %v7662_v9 }
 0x393   : > { %4132 = vmatmul.mubr.bf16.gmra.mrb[140].mxu0 %v8645_v19  ;;  %4518 = vmatmul.mubr.bf16.gmra.mrb[140].mxu1 %v8645_v19  ;;  %v3214_v19 = vld [vmem:[%s9114_s6] sm:$0xf] }
 0x394   : > { %4141 = vmatprep.mubr.bf16.mxu0 %v8659_v6  ;;  %4527 = vmatprep.mubr.bf16.mxu1 %v8659_v6  ;;  %v8864_v6 = vrot.slane %v3214_v19, %v8328_v24 }
 0x395   : > { %6371 = vmatpush3.bf16.msra.mxu0 %v7661_v62  ;;  %6483 = vmatpush3.bf16.msra.mxu1 %v7663_v1 }
 0x396   : > { %6372 = vmatprep.subr.bf16.mxu0 %v7664_v3  ;;  %6484 = vmatprep.subr.bf16.mxu1 %v7666_v33 }
 0x399   : > { %6373 = vmatpush3.bf16.msra.mxu0 %v7665_v29  ;;  %6485 = vmatpush3.bf16.msra.mxu1 %v7667_v22 }
 0x39b   : > { %4142 = vmatmul.mubr.bf16.gmra.mrb[144].mxu0 %v8657_v44  ;;  %4528 = vmatmul.mubr.bf16.gmra.mrb[144].mxu1 %v8657_v44  ;;  %v8861_v44 = vrot.slane %v3214_v19, %v8307_v54 }
 0x39c   : > { %4151 = vmatprep.mubr.bf16.mxu0 %v8671_v35  ;;  %4537 = vmatprep.mubr.bf16.mxu1 %v8671_v35  ;;  %v8870_v35 = vrot.slane %v3214_v19, %v8330_v28 }
 0x3a3   : > { %4152 = vmatmul.mubr.bf16.gmra.mrb[148].mxu0 %v8669_v52  ;;  %4538 = vmatmul.mubr.bf16.gmra.mrb[148].mxu1 %v8669_v52  ;;  %v8867_v52 = vrot.slane %v3214_v19, %v8312_v56 }
 0x3a4   : > { %4161 = vmatprep.mubr.bf16.mxu0 %v8683_v41  ;;  %4547 = vmatprep.mubr.bf16.mxu1 %v8683_v41 }
 0x3ab   : > { %4162 = vmatmul.mubr.bf16.gmra.mrb[152].mxu0 %v8681_v49  ;;  %4548 = vmatmul.mubr.bf16.gmra.mrb[152].mxu1 %v8681_v49 }
 0x3ac   : > { %4171 = vmatprep.mubr.bf16.mxu0 %v8695_v53  ;;  %4557 = vmatprep.mubr.bf16.mxu1 %v8695_v53 }
 0x3b3   : > { %4172 = vmatmul.mubr.bf16.gmra.mrb[156].mxu0 %v8693_v2  ;;  %4558 = vmatmul.mubr.bf16.gmra.mrb[156].mxu1 %v8693_v2 }
 0x3b4   : > { %4181 = vmatprep.mubr.bf16.mxu0 %v8707_v57  ;;  %4567 = vmatprep.mubr.bf16.mxu1 %v8707_v57 }
 0x3bb   : > { %4182 = vmatmul.mubr.bf16.gmra.mrb[160].mxu0 %v8705_v20  ;;  %4568 = vmatmul.mubr.bf16.gmra.mrb[160].mxu1 %v8705_v20 }
 0x3bc   : > { %4191 = vmatprep.mubr.bf16.mxu0 %v8719_v61  ;;  %4577 = vmatprep.mubr.bf16.mxu1 %v8719_v61 }
 0x3c3   : > { %4192 = vmatmul.mubr.bf16.gmra.mrb[164].mxu0 %v8717_v46  ;;  %4578 = vmatmul.mubr.bf16.gmra.mrb[164].mxu1 %v8717_v46 }
 0x3c4   : > { %4201 = vmatprep.mubr.bf16.mxu0 %v8731_v11  ;;  %4587 = vmatprep.mubr.bf16.mxu1 %v8731_v11 }
 0x3cb   : > { %4202 = vmatmul.mubr.bf16.gmra.mrb[168].mxu0 %v8729_v30  ;;  %4588 = vmatmul.mubr.bf16.gmra.mrb[168].mxu1 %v8729_v30 }
 0x3cc   : > { %4211 = vmatprep.mubr.bf16.mxu0 %v8743_v45  ;;  %4597 = vmatprep.mubr.bf16.mxu1 %v8743_v45 }
 0x3d3   : > { %4212 = vmatmul.mubr.bf16.gmra.mrb[172].mxu0 %v8741_v42  ;;  %4598 = vmatmul.mubr.bf16.gmra.mrb[172].mxu1 %v8741_v42 }
 0x3d4   : > { %4221 = vmatprep.mubr.bf16.mxu0 %v8755_v4  ;;  %4607 = vmatprep.mubr.bf16.mxu1 %v8755_v4 }
 0x3db   : > { %4222 = vmatmul.mubr.bf16.gmra.mrb[176].mxu0 %v8753_v34  ;;  %4608 = vmatmul.mubr.bf16.gmra.mrb[176].mxu1 %v8753_v34 }
 0x3dc   : > { %4231 = vmatprep.mubr.bf16.mxu0 %v8767_v27  ;;  %4617 = vmatprep.mubr.bf16.mxu1 %v8767_v27 }
 0x3e3   : > { %4232 = vmatmul.mubr.bf16.gmra.mrb[180].mxu0 %v8765_v23  ;;  %4618 = vmatmul.mubr.bf16.gmra.mrb[180].mxu1 %v8765_v23 }
 0x3e4   : > { %4241 = vmatprep.mubr.bf16.mxu0 %v8779_v58  ;;  %4627 = vmatprep.mubr.bf16.mxu1 %v8779_v58 }
 0x3eb   : > { %4242 = vmatmul.mubr.bf16.gmra.mrb[184].mxu0 %v8777_v25  ;;  %4628 = vmatmul.mubr.bf16.gmra.mrb[184].mxu1 %v8777_v25 }
 0x3ec   : > { %4251 = vmatprep.mubr.bf16.mxu0 %v8791_v32  ;;  %4637 = vmatprep.mubr.bf16.mxu1 %v8791_v32 }
 0x3f3   : > { %4252 = vmatmul.mubr.bf16.gmra.mrb[188].mxu0 %v8789_v16  ;;  %4638 = vmatmul.mubr.bf16.gmra.mrb[188].mxu1 %v8789_v16 }
 0x44e   : > { %v4103_v49 = vpop.f32.mrb[128].mxu0  ;;  %v4489_v41 = vpop.f32.mrb[128].mxu1 }
 0x44f   : > { %v6710_v2 = vadd.f32 %v4103_v49, %v8861_v44  ;;  %v6774_v53 = vadd.f32 %v4489_v41, %v8864_v6  ;;  %v4105_v20 = vpop.f32.mrb[129].mxu0  ;;  %v4491_v57 = vpop.f32.mrb[129].mxu1 }
 0x450   : > { %v6711_v54 = vadd.f32 %v4105_v20, %v8867_v52  ;;  %v6775_v46 = vadd.f32 %v4491_v57, %v8870_v35  ;;  %v4107_v24 = vpop.f32.mrb[130].mxu0  ;;  %v4493_v61 = vpop.f32.mrb[130].mxu1 }
 0x451   : > { %v6712_v56 = vadd.f32 %v4107_v24, %v8861_v44  ;;  %v6776_v30 = vadd.f32 %v4493_v61, %v8864_v6  ;;  %v4109_v28 = vpop.f32.mrb[131].mxu0  ;;  %v4495_v11 = vpop.f32.mrb[131].mxu1  ;;  %v4648_v34 = vmax.f32 %v6710_v2, 0.0  ;;  %v4650_v4 = vmax.f32 %v6774_v53, 0.0 }
 0x452   : > { %v6713_v42 = vadd.f32 %v4109_v28, %v8867_v52  ;;  %v6777_v45 = vadd.f32 %v4495_v11, %v8870_v35  ;;  %v4649_v25 = vmax.f32 %v6711_v54, 0.0  ;;  %v4651_v58 = vmax.f32 %v6775_v46, 0.0 }
 0x453   : > { %v4652_v23 = vmax.f32 %v6712_v56, 0.0  ;;  %v4654_v27 = vmax.f32 %v6776_v30, 0.0 }
 0x454   : > { %v4653_v12 = vmax.f32 %v6713_v42, 0.0  ;;  %v4655_v14 = vmax.f32 %v6777_v45, 0.0 }
 0x455   : > { %v4776_v15 = vpack.c.bf16 %v4652_v23, %v4648_v34  ;;  %v4778_v26 = vpack.c.bf16 %v4654_v27, %v4650_v4 }
 0x456   : > { %v4777_v16 = vpack.c.bf16 %v4653_v12, %v4649_v25  ;;  %v4779_v21 = vpack.c.bf16 %v4655_v14, %v4651_v58  ;;  %v4113_v32 = vpop.f32.mrb[132].mxu0  ;;  %v4499_v5 = vpop.f32.mrb[132].mxu1 }
 0x457   : > { %v6714_v10 = vadd.f32 %v4113_v32, %v8861_v44  ;;  %v6778_v39 = vadd.f32 %v4499_v5, %v8864_v6  ;;  %v4115_v17 = vpop.f32.mrb[133].mxu0  ;;  %v4501_v47 = vpop.f32.mrb[133].mxu1 }
 0x458   : > { %v6715_v50 = vadd.f32 %v4115_v17, %v8867_v52  ;;  %v6779_v37 = vadd.f32 %v4501_v47, %v8870_v35  ;;  %v4117_v8 = vpop.f32.mrb[134].mxu0  ;;  %v4503_v43 = vpop.f32.mrb[134].mxu1  ;;  %5135 = vmatprep.mubr.bf16.mxu0 %v4777_v16  ;;  %5296 = vmatprep.mubr.bf16.mxu1 %v4779_v21 }
 0x459   : > { %v6716_v60 = vadd.f32 %v4117_v8, %v8861_v44  ;;  %v6780_v55 = vadd.f32 %v4503_v43, %v8864_v6  ;;  %v4119_v18 = vpop.f32.mrb[135].mxu0  ;;  %v4505_v36 = vpop.f32.mrb[135].mxu1  ;;  %5136 = vmatmul.mubr.bf16.vlgmr.msra.gmra.mrb[192].mxu0 %v4776_v15  ;;  %5297 = vmatmul.mubr.bf16.vlgmr.msra.gmra.mrb[192].mxu1 %v4778_v26  ;;  %v4656_v48 = vmax.f32 %v6714_v10, 0.0  ;;  %v4658_v31 = vmax.f32 %v6778_v39, 0.0 }
 0x45a   : > { %v6717_v0 = vadd.f32 %v4119_v18, %v8867_v52  ;;  %v6781_v7 = vadd.f32 %v4505_v36, %v8870_v35  ;;  %v4657_v13 = vmax.f32 %v6715_v50, 0.0  ;;  %v4659_v51 = vmax.f32 %v6779_v37, 0.0 }
 0x45b   : > { %v4660_v59 = vmax.f32 %v6716_v60, 0.0  ;;  %v4662_v63 = vmax.f32 %v6780_v55, 0.0 }
 0x45c   : > { %v4661_v38 = vmax.f32 %v6717_v0, 0.0  ;;  %v4663_v40 = vmax.f32 %v6781_v7, 0.0 }
 0x45d   : > { %v4780_v9 = vpack.c.bf16 %v4660_v59, %v4656_v48  ;;  %v4782_v62 = vpack.c.bf16 %v4662_v63, %v4658_v31 }
 0x45e   : > { %v4781_v1 = vpack.c.bf16 %v4661_v38, %v4657_v13  ;;  %v4783_v3 = vpack.c.bf16 %v4663_v40, %v4659_v51  ;;  %v4123_v33 = vpop.f32.mrb[136].mxu0  ;;  %v4509_v29 = vpop.f32.mrb[136].mxu1 }
 0x45f   : > { %v6718_v22 = vadd.f32 %v4123_v33, %v8861_v44  ;;  %v6782_v19 = vadd.f32 %v4509_v29, %v8864_v6  ;;  %v4125_v49 = vpop.f32.mrb[137].mxu0  ;;  %v4511_v41 = vpop.f32.mrb[137].mxu1 }
 0x460   : > { %v6719_v2 = vadd.f32 %v4125_v49, %v8867_v52  ;;  %v6783_v53 = vadd.f32 %v4511_v41, %v8870_v35  ;;  %v4127_v20 = vpop.f32.mrb[138].mxu0  ;;  %v4513_v57 = vpop.f32.mrb[138].mxu1  ;;  %5143 = vmatprep.mubr.bf16.mxu0 %v4781_v1  ;;  %5304 = vmatprep.mubr.bf16.mxu1 %v4783_v3 }
 0x461   : > { %v6720_v54 = vadd.f32 %v4127_v20, %v8861_v44  ;;  %v6784_v46 = vadd.f32 %v4513_v57, %v8864_v6  ;;  %v4129_v24 = vpop.f32.mrb[139].mxu0  ;;  %v4515_v61 = vpop.f32.mrb[139].mxu1  ;;  %5144 = vmatmul.mubr.bf16.gmra.mrb[196].mxu0 %v4780_v9  ;;  %5305 = vmatmul.mubr.bf16.gmra.mrb[196].mxu1 %v4782_v62  ;;  %v4664_v28 = vmax.f32 %v6718_v22, 0.0  ;;  %v4666_v11 = vmax.f32 %v6782_v19, 0.0 }
 0x462   : > { %v6721_v56 = vadd.f32 %v4129_v24, %v8867_v52  ;;  %v6785_v30 = vadd.f32 %v4515_v61, %v8870_v35  ;;  %v4665_v34 = vmax.f32 %v6719_v2, 0.0  ;;  %v4667_v4 = vmax.f32 %v6783_v53, 0.0 }
 0x463   : > { %v4668_v42 = vmax.f32 %v6720_v54, 0.0  ;;  %v4670_v45 = vmax.f32 %v6784_v46, 0.0 }
 0x464   : > { %v4669_v23 = vmax.f32 %v6721_v56, 0.0  ;;  %v4671_v27 = vmax.f32 %v6785_v30, 0.0 }
 0x465   : > { %v4784_v25 = vpack.c.bf16 %v4668_v42, %v4664_v28  ;;  %v4786_v58 = vpack.c.bf16 %v4670_v45, %v4666_v11 }
 0x466   : > { %v4785_v12 = vpack.c.bf16 %v4669_v23, %v4665_v34  ;;  %v4787_v14 = vpack.c.bf16 %v4671_v27, %v4667_v4  ;;  %v4133_v15 = vpop.f32.mrb[140].mxu0  ;;  %v4519_v26 = vpop.f32.mrb[140].mxu1 }
 0x467   : > { %v6722_v16 = vadd.f32 %v4133_v15, %v8861_v44  ;;  %v6786_v21 = vadd.f32 %v4519_v26, %v8864_v6  ;;  %v4135_v32 = vpop.f32.mrb[141].mxu0  ;;  %v4521_v5 = vpop.f32.mrb[141].mxu1 }
 0x468   : > { %v6723_v10 = vadd.f32 %v4135_v32, %v8867_v52  ;;  %v6787_v39 = vadd.f32 %v4521_v5, %v8870_v35  ;;  %v4137_v17 = vpop.f32.mrb[142].mxu0  ;;  %v4523_v47 = vpop.f32.mrb[142].mxu1  ;;  %5151 = vmatprep.mubr.bf16.mxu0 %v4785_v12  ;;  %5312 = vmatprep.mubr.bf16.mxu1 %v4787_v14 }
 0x469   : > { %v6724_v50 = vadd.f32 %v4137_v17, %v8861_v44  ;;  %v6788_v37 = vadd.f32 %v4523_v47, %v8864_v6  ;;  %v4139_v8 = vpop.f32.mrb[143].mxu0  ;;  %v4525_v43 = vpop.f32.mrb[143].mxu1  ;;  %5152 = vmatmul.mubr.bf16.gmra.mrb[200].mxu0 %v4784_v25  ;;  %5313 = vmatmul.mubr.bf16.gmra.mrb[200].mxu1 %v4786_v58  ;;  %v4672_v18 = vmax.f32 %v6722_v16, 0.0  ;;  %v4674_v36 = vmax.f32 %v6786_v21, 0.0 }
 0x46a   : > { %v6725_v60 = vadd.f32 %v4139_v8, %v8867_v52  ;;  %v6789_v55 = vadd.f32 %v4525_v43, %v8870_v35  ;;  %v4673_v48 = vmax.f32 %v6723_v10, 0.0  ;;  %v4675_v31 = vmax.f32 %v6787_v39, 0.0 }
 0x46b   : > { %v4676_v0 = vmax.f32 %v6724_v50, 0.0  ;;  %v4678_v7 = vmax.f32 %v6788_v37, 0.0 }
 0x46c   : > { %v4677_v59 = vmax.f32 %v6725_v60, 0.0  ;;  %v4679_v63 = vmax.f32 %v6789_v55, 0.0 }
 0x46d   : > { %v4788_v13 = vpack.c.bf16 %v4676_v0, %v4672_v18  ;;  %v4790_v51 = vpack.c.bf16 %v4678_v7, %v4674_v36 }
 0x46e   : > { %v4789_v38 = vpack.c.bf16 %v4677_v59, %v4673_v48  ;;  %v4791_v40 = vpack.c.bf16 %v4679_v63, %v4675_v31  ;;  %v4143_v9 = vpop.f32.mrb[144].mxu0  ;;  %v4529_v62 = vpop.f32.mrb[144].mxu1 }
 0x46f   : > { %v6726_v1 = vadd.f32 %v4143_v9, %v8861_v44  ;;  %v6790_v3 = vadd.f32 %v4529_v62, %v8864_v6  ;;  %v4145_v33 = vpop.f32.mrb[145].mxu0  ;;  %v4531_v29 = vpop.f32.mrb[145].mxu1 }
 0x470   : > { %v6727_v22 = vadd.f32 %v4145_v33, %v8867_v52  ;;  %v6791_v19 = vadd.f32 %v4531_v29, %v8870_v35  ;;  %v4147_v49 = vpop.f32.mrb[146].mxu0  ;;  %v4533_v41 = vpop.f32.mrb[146].mxu1  ;;  %5159 = vmatprep.mubr.bf16.mxu0 %v4789_v38  ;;  %5320 = vmatprep.mubr.bf16.mxu1 %v4791_v40 }
 0x471   : > { %v6728_v2 = vadd.f32 %v4147_v49, %v8861_v44  ;;  %v6792_v53 = vadd.f32 %v4533_v41, %v8864_v6  ;;  %v4149_v20 = vpop.f32.mrb[147].mxu0  ;;  %v4535_v57 = vpop.f32.mrb[147].mxu1  ;;  %5160 = vmatmul.mubr.bf16.gmra.mrb[204].mxu0 %v4788_v13  ;;  %5321 = vmatmul.mubr.bf16.gmra.mrb[204].mxu1 %v4790_v51  ;;  %v4680_v24 = vmax.f32 %v6726_v1, 0.0  ;;  %v4682_v61 = vmax.f32 %v6790_v3, 0.0 }
 0x472   : > { %v6729_v54 = vadd.f32 %v4149_v20, %v8867_v52  ;;  %v6793_v46 = vadd.f32 %v4535_v57, %v8870_v35  ;;  %v4681_v28 = vmax.f32 %v6727_v22, 0.0  ;;  %v4683_v11 = vmax.f32 %v6791_v19, 0.0 }
 0x473   : > { %v4684_v56 = vmax.f32 %v6728_v2, 0.0  ;;  %v4686_v30 = vmax.f32 %v6792_v53, 0.0 }
 0x474   : > { %v4685_v42 = vmax.f32 %v6729_v54, 0.0  ;;  %v4687_v45 = vmax.f32 %v6793_v46, 0.0 }
 0x475   : > { %v4792_v34 = vpack.c.bf16 %v4684_v56, %v4680_v24  ;;  %v4794_v4 = vpack.c.bf16 %v4686_v30, %v4682_v61 }
 0x476   : > { %v4793_v23 = vpack.c.bf16 %v4685_v42, %v4681_v28  ;;  %v4795_v27 = vpack.c.bf16 %v4687_v45, %v4683_v11  ;;  %v4153_v25 = vpop.f32.mrb[148].mxu0  ;;  %v4539_v58 = vpop.f32.mrb[148].mxu1 }
 0x477   : > { %v6730_v12 = vadd.f32 %v4153_v25, %v8861_v44  ;;  %v6794_v14 = vadd.f32 %v4539_v58, %v8864_v6  ;;  %v4155_v15 = vpop.f32.mrb[149].mxu0  ;;  %v4541_v26 = vpop.f32.mrb[149].mxu1 }
 0x478   : > { %v6731_v16 = vadd.f32 %v4155_v15, %v8867_v52  ;;  %v6795_v21 = vadd.f32 %v4541_v26, %v8870_v35  ;;  %v4157_v32 = vpop.f32.mrb[150].mxu0  ;;  %v4543_v5 = vpop.f32.mrb[150].mxu1  ;;  %5167 = vmatprep.mubr.bf16.mxu0 %v4793_v23  ;;  %5328 = vmatprep.mubr.bf16.mxu1 %v4795_v27 }
 0x479   : > { %v6732_v10 = vadd.f32 %v4157_v32, %v8861_v44  ;;  %v6796_v39 = vadd.f32 %v4543_v5, %v8864_v6  ;;  %v4159_v17 = vpop.f32.mrb[151].mxu0  ;;  %v4545_v47 = vpop.f32.mrb[151].mxu1  ;;  %5168 = vmatmul.mubr.bf16.gmra.mrb[208].mxu0 %v4792_v34  ;;  %5329 = vmatmul.mubr.bf16.gmra.mrb[208].mxu1 %v4794_v4  ;;  %v4688_v8 = vmax.f32 %v6730_v12, 0.0  ;;  %v4690_v43 = vmax.f32 %v6794_v14, 0.0 }
 0x47a   : > { %v6733_v50 = vadd.f32 %v4159_v17, %v8867_v52  ;;  %v6797_v37 = vadd.f32 %v4545_v47, %v8870_v35  ;;  %v4689_v18 = vmax.f32 %v6731_v16, 0.0  ;;  %v4691_v36 = vmax.f32 %v6795_v21, 0.0 }
 0x47b   : > { %v4692_v60 = vmax.f32 %v6732_v10, 0.0  ;;  %v4694_v55 = vmax.f32 %v6796_v39, 0.0 }
 0x47c   : > { %v4693_v0 = vmax.f32 %v6733_v50, 0.0  ;;  %v4695_v7 = vmax.f32 %v6797_v37, 0.0 }
 0x47d   : > { %v4796_v48 = vpack.c.bf16 %v4692_v60, %v4688_v8  ;;  %v4798_v31 = vpack.c.bf16 %v4694_v55, %v4690_v43 }
 0x47e   : > { %v4797_v59 = vpack.c.bf16 %v4693_v0, %v4689_v18  ;;  %v4799_v63 = vpack.c.bf16 %v4695_v7, %v4691_v36  ;;  %v4163_v13 = vpop.f32.mrb[152].mxu0  ;;  %v4549_v51 = vpop.f32.mrb[152].mxu1 }
 0x47f   : > { %v6734_v38 = vadd.f32 %v4163_v13, %v8861_v44  ;;  %v6798_v40 = vadd.f32 %v4549_v51, %v8864_v6  ;;  %v4165_v9 = vpop.f32.mrb[153].mxu0  ;;  %v4551_v62 = vpop.f32.mrb[153].mxu1 }
 0x480   : > { %v6735_v1 = vadd.f32 %v4165_v9, %v8867_v52  ;;  %v6799_v3 = vadd.f32 %v4551_v62, %v8870_v35  ;;  %v4167_v33 = vpop.f32.mrb[154].mxu0  ;;  %v4553_v29 = vpop.f32.mrb[154].mxu1  ;;  %5175 = vmatprep.mubr.bf16.mxu0 %v4797_v59  ;;  %5336 = vmatprep.mubr.bf16.mxu1 %v4799_v63 }
 0x481   : > { %v6736_v22 = vadd.f32 %v4167_v33, %v8861_v44  ;;  %v6800_v19 = vadd.f32 %v4553_v29, %v8864_v6  ;;  %v4169_v49 = vpop.f32.mrb[155].mxu0  ;;  %v4555_v41 = vpop.f32.mrb[155].mxu1  ;;  %5176 = vmatmul.mubr.bf16.gmra.mrb[212].mxu0 %v4796_v48  ;;  %5337 = vmatmul.mubr.bf16.gmra.mrb[212].mxu1 %v4798_v31  ;;  %v4696_v20 = vmax.f32 %v6734_v38, 0.0  ;;  %v4698_v57 = vmax.f32 %v6798_v40, 0.0 }
 0x482   : > { %v6737_v2 = vadd.f32 %v4169_v49, %v8867_v52  ;;  %v6801_v53 = vadd.f32 %v4555_v41, %v8870_v35  ;;  %v4697_v24 = vmax.f32 %v6735_v1, 0.0  ;;  %v4699_v61 = vmax.f32 %v6799_v3, 0.0 }
 0x483   : > { %v4700_v54 = vmax.f32 %v6736_v22, 0.0  ;;  %v4702_v46 = vmax.f32 %v6800_v19, 0.0 }
 0x484   : > { %v4701_v56 = vmax.f32 %v6737_v2, 0.0  ;;  %v4703_v30 = vmax.f32 %v6801_v53, 0.0 }
 0x485   : > { %v4800_v28 = vpack.c.bf16 %v4700_v54, %v4696_v20  ;;  %v4802_v11 = vpack.c.bf16 %v4702_v46, %v4698_v57 }
 0x486   : > { %v4801_v42 = vpack.c.bf16 %v4701_v56, %v4697_v24  ;;  %v4803_v45 = vpack.c.bf16 %v4703_v30, %v4699_v61  ;;  %v4173_v34 = vpop.f32.mrb[156].mxu0  ;;  %v4559_v4 = vpop.f32.mrb[156].mxu1 }
 0x487   : > { %v6738_v23 = vadd.f32 %v4173_v34, %v8861_v44  ;;  %v6802_v27 = vadd.f32 %v4559_v4, %v8864_v6  ;;  %v4175_v25 = vpop.f32.mrb[157].mxu0  ;;  %v4561_v58 = vpop.f32.mrb[157].mxu1 }
 0x488   : > { %v6739_v12 = vadd.f32 %v4175_v25, %v8867_v52  ;;  %v6803_v14 = vadd.f32 %v4561_v58, %v8870_v35  ;;  %v4177_v15 = vpop.f32.mrb[158].mxu0  ;;  %v4563_v26 = vpop.f32.mrb[158].mxu1  ;;  %5183 = vmatprep.mubr.bf16.mxu0 %v4801_v42  ;;  %5344 = vmatprep.mubr.bf16.mxu1 %v4803_v45 }
 0x489   : > { %v6740_v16 = vadd.f32 %v4177_v15, %v8861_v44  ;;  %v6804_v21 = vadd.f32 %v4563_v26, %v8864_v6  ;;  %v4179_v32 = vpop.f32.mrb[159].mxu0  ;;  %v4565_v5 = vpop.f32.mrb[159].mxu1  ;;  %5184 = vmatmul.mubr.bf16.gmra.mrb[216].mxu0 %v4800_v28  ;;  %5345 = vmatmul.mubr.bf16.gmra.mrb[216].mxu1 %v4802_v11  ;;  %v4704_v17 = vmax.f32 %v6738_v23, 0.0  ;;  %v4706_v47 = vmax.f32 %v6802_v27, 0.0 }
 0x48a   : > { %v6741_v10 = vadd.f32 %v4179_v32, %v8867_v52  ;;  %v6805_v39 = vadd.f32 %v4565_v5, %v8870_v35  ;;  %v4705_v8 = vmax.f32 %v6739_v12, 0.0  ;;  %v4707_v43 = vmax.f32 %v6803_v14, 0.0 }
 0x48b   : > { %v4708_v50 = vmax.f32 %v6740_v16, 0.0  ;;  %v4710_v37 = vmax.f32 %v6804_v21, 0.0 }
 0x48c   : > { %v4709_v60 = vmax.f32 %v6741_v10, 0.0  ;;  %v4711_v55 = vmax.f32 %v6805_v39, 0.0 }
 0x48d   : > { %v4804_v18 = vpack.c.bf16 %v4708_v50, %v4704_v17  ;;  %v4806_v36 = vpack.c.bf16 %v4710_v37, %v4706_v47 }
 0x48e   : > { %v4805_v0 = vpack.c.bf16 %v4709_v60, %v4705_v8  ;;  %v4807_v7 = vpack.c.bf16 %v4711_v55, %v4707_v43  ;;  %v4183_v48 = vpop.f32.mrb[160].mxu0  ;;  %v4569_v31 = vpop.f32.mrb[160].mxu1 }
 0x48f   : > { %v6742_v59 = vadd.f32 %v4183_v48, %v8861_v44  ;;  %v6806_v63 = vadd.f32 %v4569_v31, %v8864_v6  ;;  %v4185_v13 = vpop.f32.mrb[161].mxu0  ;;  %v4571_v51 = vpop.f32.mrb[161].mxu1 }
 0x490   : > { %v6743_v38 = vadd.f32 %v4185_v13, %v8867_v52  ;;  %v6807_v40 = vadd.f32 %v4571_v51, %v8870_v35  ;;  %v4187_v9 = vpop.f32.mrb[162].mxu0  ;;  %v4573_v62 = vpop.f32.mrb[162].mxu1  ;;  %5191 = vmatprep.mubr.bf16.mxu0 %v4805_v0  ;;  %5352 = vmatprep.mubr.bf16.mxu1 %v4807_v7 }
 0x491   : > { %v6744_v1 = vadd.f32 %v4187_v9, %v8861_v44  ;;  %v6808_v3 = vadd.f32 %v4573_v62, %v8864_v6  ;;  %v4189_v33 = vpop.f32.mrb[163].mxu0  ;;  %v4575_v29 = vpop.f32.mrb[163].mxu1  ;;  %5192 = vmatmul.mubr.bf16.gmra.mrb[220].mxu0 %v4804_v18  ;;  %5353 = vmatmul.mubr.bf16.gmra.mrb[220].mxu1 %v4806_v36  ;;  %v4712_v49 = vmax.f32 %v6742_v59, 0.0  ;;  %v4714_v41 = vmax.f32 %v6806_v63, 0.0 }
 0x492   : > { %v6745_v22 = vadd.f32 %v4189_v33, %v8867_v52  ;;  %v6809_v19 = vadd.f32 %v4575_v29, %v8870_v35  ;;  %v4713_v20 = vmax.f32 %v6743_v38, 0.0  ;;  %v4715_v57 = vmax.f32 %v6807_v40, 0.0 }
 0x493   : > { %v4716_v2 = vmax.f32 %v6744_v1, 0.0  ;;  %v4718_v53 = vmax.f32 %v6808_v3, 0.0 }
 0x494   : > { %v4717_v54 = vmax.f32 %v6745_v22, 0.0  ;;  %v4719_v46 = vmax.f32 %v6809_v19, 0.0 }
 0x495   : > { %v4808_v24 = vpack.c.bf16 %v4716_v2, %v4712_v49  ;;  %v4810_v61 = vpack.c.bf16 %v4718_v53, %v4714_v41 }
 0x496   : > { %v4809_v56 = vpack.c.bf16 %v4717_v54, %v4713_v20  ;;  %v4811_v30 = vpack.c.bf16 %v4719_v46, %v4715_v57  ;;  %v4193_v28 = vpop.f32.mrb[164].mxu0  ;;  %v4579_v11 = vpop.f32.mrb[164].mxu1 }
 0x497   : > { %v6746_v42 = vadd.f32 %v4193_v28, %v8861_v44  ;;  %v6810_v45 = vadd.f32 %v4579_v11, %v8864_v6  ;;  %v4195_v34 = vpop.f32.mrb[165].mxu0  ;;  %v4581_v4 = vpop.f32.mrb[165].mxu1 }
 0x498   : > { %v6747_v23 = vadd.f32 %v4195_v34, %v8867_v52  ;;  %v6811_v27 = vadd.f32 %v4581_v4, %v8870_v35  ;;  %v4197_v25 = vpop.f32.mrb[166].mxu0  ;;  %v4583_v58 = vpop.f32.mrb[166].mxu1  ;;  %5199 = vmatprep.mubr.bf16.mxu0 %v4809_v56  ;;  %5360 = vmatprep.mubr.bf16.mxu1 %v4811_v30 }
 0x499   : > { %v6748_v12 = vadd.f32 %v4197_v25, %v8861_v44  ;;  %v6812_v14 = vadd.f32 %v4583_v58, %v8864_v6  ;;  %v4199_v15 = vpop.f32.mrb[167].mxu0  ;;  %v4585_v26 = vpop.f32.mrb[167].mxu1  ;;  %5200 = vmatmul.mubr.bf16.gmra.mrb[224].mxu0 %v4808_v24  ;;  %5361 = vmatmul.mubr.bf16.gmra.mrb[224].mxu1 %v4810_v61  ;;  %v4720_v32 = vmax.f32 %v6746_v42, 0.0  ;;  %v4722_v5 = vmax.f32 %v6810_v45, 0.0 }
 0x49a   : > { %v6749_v16 = vadd.f32 %v4199_v15, %v8867_v52  ;;  %v6813_v21 = vadd.f32 %v4585_v26, %v8870_v35  ;;  %v4721_v17 = vmax.f32 %v6747_v23, 0.0  ;;  %v4723_v47 = vmax.f32 %v6811_v27, 0.0 }
 0x49b   : > { %v4724_v10 = vmax.f32 %v6748_v12, 0.0  ;;  %v4726_v39 = vmax.f32 %v6812_v14, 0.0 }
 0x49c   : > { %v4725_v50 = vmax.f32 %v6749_v16, 0.0  ;;  %v4727_v37 = vmax.f32 %v6813_v21, 0.0 }
 0x49d   : > { %v4812_v8 = vpack.c.bf16 %v4724_v10, %v4720_v32  ;;  %v4814_v43 = vpack.c.bf16 %v4726_v39, %v4722_v5 }
 0x49e   : > { %v4813_v60 = vpack.c.bf16 %v4725_v50, %v4721_v17  ;;  %v4815_v55 = vpack.c.bf16 %v4727_v37, %v4723_v47  ;;  %v4203_v18 = vpop.f32.mrb[168].mxu0  ;;  %v4589_v36 = vpop.f32.mrb[168].mxu1 }
 0x49f   : > { %v6750_v0 = vadd.f32 %v4203_v18, %v8861_v44  ;;  %v6814_v7 = vadd.f32 %v4589_v36, %v8864_v6  ;;  %v4205_v48 = vpop.f32.mrb[169].mxu0  ;;  %v4591_v31 = vpop.f32.mrb[169].mxu1 }
 0x4a0   : > { %v6751_v59 = vadd.f32 %v4205_v48, %v8867_v52  ;;  %v6815_v63 = vadd.f32 %v4591_v31, %v8870_v35  ;;  %v4207_v13 = vpop.f32.mrb[170].mxu0  ;;  %v4593_v51 = vpop.f32.mrb[170].mxu1  ;;  %5207 = vmatprep.mubr.bf16.mxu0 %v4813_v60  ;;  %5368 = vmatprep.mubr.bf16.mxu1 %v4815_v55 }
 0x4a1   : > { %v6752_v38 = vadd.f32 %v4207_v13, %v8861_v44  ;;  %v6816_v40 = vadd.f32 %v4593_v51, %v8864_v6  ;;  %v4209_v9 = vpop.f32.mrb[171].mxu0  ;;  %v4595_v62 = vpop.f32.mrb[171].mxu1  ;;  %5208 = vmatmul.mubr.bf16.gmra.mrb[228].mxu0 %v4812_v8  ;;  %5369 = vmatmul.mubr.bf16.gmra.mrb[228].mxu1 %v4814_v43  ;;  %v4728_v33 = vmax.f32 %v6750_v0, 0.0  ;;  %v4730_v29 = vmax.f32 %v6814_v7, 0.0 }
 0x4a2   : > { %v6753_v1 = vadd.f32 %v4209_v9, %v8867_v52  ;;  %v6817_v3 = vadd.f32 %v4595_v62, %v8870_v35  ;;  %v4729_v49 = vmax.f32 %v6751_v59, 0.0  ;;  %v4731_v41 = vmax.f32 %v6815_v63, 0.0 }
 0x4a3   : > { %v4732_v22 = vmax.f32 %v6752_v38, 0.0  ;;  %v4734_v19 = vmax.f32 %v6816_v40, 0.0 }
 0x4a4   : > { %v4733_v2 = vmax.f32 %v6753_v1, 0.0  ;;  %v4735_v53 = vmax.f32 %v6817_v3, 0.0 }
 0x4a5   : > { %v4816_v20 = vpack.c.bf16 %v4732_v22, %v4728_v33  ;;  %v4818_v57 = vpack.c.bf16 %v4734_v19, %v4730_v29 }
 0x4a6   : > { %v4817_v54 = vpack.c.bf16 %v4733_v2, %v4729_v49  ;;  %v4819_v46 = vpack.c.bf16 %v4735_v53, %v4731_v41  ;;  %v4213_v24 = vpop.f32.mrb[172].mxu0  ;;  %v4599_v61 = vpop.f32.mrb[172].mxu1 }
 0x4a7   : > { %v6754_v56 = vadd.f32 %v4213_v24, %v8861_v44  ;;  %v6818_v30 = vadd.f32 %v4599_v61, %v8864_v6  ;;  %v4215_v28 = vpop.f32.mrb[173].mxu0  ;;  %v4601_v11 = vpop.f32.mrb[173].mxu1 }
 0x4a8   : > { %v6755_v42 = vadd.f32 %v4215_v28, %v8867_v52  ;;  %v6819_v45 = vadd.f32 %v4601_v11, %v8870_v35  ;;  %v4217_v34 = vpop.f32.mrb[174].mxu0  ;;  %v4603_v4 = vpop.f32.mrb[174].mxu1  ;;  %5215 = vmatprep.mubr.bf16.mxu0 %v4817_v54  ;;  %5376 = vmatprep.mubr.bf16.mxu1 %v4819_v46 }
 0x4a9   : > { %v6756_v23 = vadd.f32 %v4217_v34, %v8861_v44  ;;  %v6820_v27 = vadd.f32 %v4603_v4, %v8864_v6  ;;  %v4219_v25 = vpop.f32.mrb[175].mxu0  ;;  %v4605_v58 = vpop.f32.mrb[175].mxu1  ;;  %5216 = vmatmul.mubr.bf16.gmra.mrb[232].mxu0 %v4816_v20  ;;  %5377 = vmatmul.mubr.bf16.gmra.mrb[232].mxu1 %v4818_v57  ;;  %v4736_v15 = vmax.f32 %v6754_v56, 0.0  ;;  %v4738_v26 = vmax.f32 %v6818_v30, 0.0 }
 0x4aa   : > { %v6757_v12 = vadd.f32 %v4219_v25, %v8867_v52  ;;  %v6821_v14 = vadd.f32 %v4605_v58, %v8870_v35  ;;  %v4737_v32 = vmax.f32 %v6755_v42, 0.0  ;;  %v4739_v5 = vmax.f32 %v6819_v45, 0.0 }
 0x4ab   : > { %v4740_v16 = vmax.f32 %v6756_v23, 0.0  ;;  %v4742_v21 = vmax.f32 %v6820_v27, 0.0 }
 0x4ac   : > { %v4741_v10 = vmax.f32 %v6757_v12, 0.0  ;;  %v4743_v39 = vmax.f32 %v6821_v14, 0.0 }
 0x4ad   : > { %v4820_v17 = vpack.c.bf16 %v4740_v16, %v4736_v15  ;;  %v4822_v47 = vpack.c.bf16 %v4742_v21, %v4738_v26 }
 0x4ae   : > { %v4821_v50 = vpack.c.bf16 %v4741_v10, %v4737_v32  ;;  %v4823_v37 = vpack.c.bf16 %v4743_v39, %v4739_v5  ;;  %v4223_v8 = vpop.f32.mrb[176].mxu0  ;;  %v4609_v43 = vpop.f32.mrb[176].mxu1 }
 0x4af   : > { %v6758_v60 = vadd.f32 %v4223_v8, %v8861_v44  ;;  %v6822_v55 = vadd.f32 %v4609_v43, %v8864_v6  ;;  %v4225_v18 = vpop.f32.mrb[177].mxu0  ;;  %v4611_v36 = vpop.f32.mrb[177].mxu1 }
 0x4b0   : > { %v6759_v0 = vadd.f32 %v4225_v18, %v8867_v52  ;;  %v6823_v7 = vadd.f32 %v4611_v36, %v8870_v35  ;;  %v4227_v48 = vpop.f32.mrb[178].mxu0  ;;  %v4613_v31 = vpop.f32.mrb[178].mxu1  ;;  %5223 = vmatprep.mubr.bf16.mxu0 %v4821_v50  ;;  %5384 = vmatprep.mubr.bf16.mxu1 %v4823_v37 }
 0x4b1   : > { %v6760_v59 = vadd.f32 %v4227_v48, %v8861_v44  ;;  %v6824_v63 = vadd.f32 %v4613_v31, %v8864_v6  ;;  %v4229_v13 = vpop.f32.mrb[179].mxu0  ;;  %v4615_v51 = vpop.f32.mrb[179].mxu1  ;;  %5224 = vmatmul.mubr.bf16.gmra.mrb[236].mxu0 %v4820_v17  ;;  %5385 = vmatmul.mubr.bf16.gmra.mrb[236].mxu1 %v4822_v47  ;;  %v4744_v9 = vmax.f32 %v6758_v60, 0.0  ;;  %v4746_v62 = vmax.f32 %v6822_v55, 0.0 }
 0x4b2   : > { %v6761_v38 = vadd.f32 %v4229_v13, %v8867_v52  ;;  %v6825_v40 = vadd.f32 %v4615_v51, %v8870_v35  ;;  %v4745_v33 = vmax.f32 %v6759_v0, 0.0  ;;  %v4747_v29 = vmax.f32 %v6823_v7, 0.0 }
 0x4b3   : > { %v4748_v1 = vmax.f32 %v6760_v59, 0.0  ;;  %v4750_v3 = vmax.f32 %v6824_v63, 0.0 }
 0x4b4   : > { %v4749_v22 = vmax.f32 %v6761_v38, 0.0  ;;  %v4751_v19 = vmax.f32 %v6825_v40, 0.0 }
 0x4b5   : > { %v4824_v49 = vpack.c.bf16 %v4748_v1, %v4744_v9  ;;  %v4826_v41 = vpack.c.bf16 %v4750_v3, %v4746_v62 }
 0x4b6   : > { %v4825_v2 = vpack.c.bf16 %v4749_v22, %v4745_v33  ;;  %v4827_v53 = vpack.c.bf16 %v4751_v19, %v4747_v29  ;;  %v4233_v20 = vpop.f32.mrb[180].mxu0  ;;  %v4619_v57 = vpop.f32.mrb[180].mxu1 }
 0x4b7   : > { %v6762_v54 = vadd.f32 %v4233_v20, %v8861_v44  ;;  %v6826_v46 = vadd.f32 %v4619_v57, %v8864_v6  ;;  %v4235_v24 = vpop.f32.mrb[181].mxu0  ;;  %v4621_v61 = vpop.f32.mrb[181].mxu1 }
 0x4b8   : > { %v6763_v56 = vadd.f32 %v4235_v24, %v8867_v52  ;;  %v6827_v30 = vadd.f32 %v4621_v61, %v8870_v35  ;;  %v4237_v28 = vpop.f32.mrb[182].mxu0  ;;  %v4623_v11 = vpop.f32.mrb[182].mxu1  ;;  %5231 = vmatprep.mubr.bf16.mxu0 %v4825_v2  ;;  %5392 = vmatprep.mubr.bf16.mxu1 %v4827_v53 }
 0x4b9   : > { %v6764_v42 = vadd.f32 %v4237_v28, %v8861_v44  ;;  %v6828_v45 = vadd.f32 %v4623_v11, %v8864_v6  ;;  %v4239_v34 = vpop.f32.mrb[183].mxu0  ;;  %v4625_v4 = vpop.f32.mrb[183].mxu1  ;;  %5232 = vmatmul.mubr.bf16.gmra.mrb[240].mxu0 %v4824_v49  ;;  %5393 = vmatmul.mubr.bf16.gmra.mrb[240].mxu1 %v4826_v41  ;;  %v4752_v25 = vmax.f32 %v6762_v54, 0.0  ;;  %v4754_v58 = vmax.f32 %v6826_v46, 0.0 }
 0x4ba   : > { %v6765_v23 = vadd.f32 %v4239_v34, %v8867_v52  ;;  %v6829_v27 = vadd.f32 %v4625_v4, %v8870_v35  ;;  %v4753_v15 = vmax.f32 %v6763_v56, 0.0  ;;  %v4755_v26 = vmax.f32 %v6827_v30, 0.0 }
 0x4bb   : > { %v4756_v12 = vmax.f32 %v6764_v42, 0.0  ;;  %v4758_v14 = vmax.f32 %v6828_v45, 0.0 }
 0x4bc   : > { %v4757_v16 = vmax.f32 %v6765_v23, 0.0  ;;  %v4759_v21 = vmax.f32 %v6829_v27, 0.0 }
 0x4bd   : > { %v4828_v32 = vpack.c.bf16 %v4756_v12, %v4752_v25  ;;  %v4830_v5 = vpack.c.bf16 %v4758_v14, %v4754_v58 }
 0x4be   : > { %v4829_v10 = vpack.c.bf16 %v4757_v16, %v4753_v15  ;;  %v4831_v39 = vpack.c.bf16 %v4759_v21, %v4755_v26  ;;  %v4243_v17 = vpop.f32.mrb[184].mxu0  ;;  %v4629_v47 = vpop.f32.mrb[184].mxu1 }
 0x4bf   : > { %v6766_v50 = vadd.f32 %v4243_v17, %v8861_v44  ;;  %v6830_v37 = vadd.f32 %v4629_v47, %v8864_v6  ;;  %v4245_v8 = vpop.f32.mrb[185].mxu0  ;;  %v4631_v43 = vpop.f32.mrb[185].mxu1 }
 0x4c0   : > { %v6767_v60 = vadd.f32 %v4245_v8, %v8867_v52  ;;  %v6831_v55 = vadd.f32 %v4631_v43, %v8870_v35  ;;  %v4247_v18 = vpop.f32.mrb[186].mxu0  ;;  %v4633_v36 = vpop.f32.mrb[186].mxu1  ;;  %5239 = vmatprep.mubr.bf16.mxu0 %v4829_v10  ;;  %5400 = vmatprep.mubr.bf16.mxu1 %v4831_v39 }
 0x4c1   : > { %v6768_v0 = vadd.f32 %v4247_v18, %v8861_v44  ;;  %v6832_v7 = vadd.f32 %v4633_v36, %v8864_v6  ;;  %v4249_v48 = vpop.f32.mrb[187].mxu0  ;;  %v4635_v31 = vpop.f32.mrb[187].mxu1  ;;  %5240 = vmatmul.mubr.bf16.gmra.mrb[244].mxu0 %v4828_v32  ;;  %5401 = vmatmul.mubr.bf16.gmra.mrb[244].mxu1 %v4830_v5  ;;  %v4760_v13 = vmax.f32 %v6766_v50, 0.0  ;;  %v4762_v51 = vmax.f32 %v6830_v37, 0.0 }
 0x4c2   : > { %v6769_v59 = vadd.f32 %v4249_v48, %v8867_v52  ;;  %v6833_v63 = vadd.f32 %v4635_v31, %v8870_v35  ;;  %v4761_v9 = vmax.f32 %v6767_v60, 0.0  ;;  %v4763_v62 = vmax.f32 %v6831_v55, 0.0 }
 0x4c3   : > { %v4764_v38 = vmax.f32 %v6768_v0, 0.0  ;;  %v4766_v40 = vmax.f32 %v6832_v7, 0.0 }
 0x4c4   : > { %v4765_v1 = vmax.f32 %v6769_v59, 0.0  ;;  %v4767_v3 = vmax.f32 %v6833_v63, 0.0 }
 0x4c5   : > { %v4832_v33 = vpack.c.bf16 %v4764_v38, %v4760_v13  ;;  %v4834_v29 = vpack.c.bf16 %v4766_v40, %v4762_v51 }
 0x4c6   : > { %v4833_v22 = vpack.c.bf16 %v4765_v1, %v4761_v9  ;;  %v4835_v19 = vpack.c.bf16 %v4767_v3, %v4763_v62  ;;  %v4253_v49 = vpop.f32.mrb[188].mxu0  ;;  %v4639_v41 = vpop.f32.mrb[188].mxu1 }
 0x4c7   : > { %v6770_v2 = vadd.f32 %v4253_v49, %v8861_v44  ;;  %v6834_v53 = vadd.f32 %v4639_v41, %v8864_v6  ;;  %v4255_v20 = vpop.f32.mrb[189].mxu0  ;;  %v4641_v57 = vpop.f32.mrb[189].mxu1 }
 0x4c8   : > { %v6771_v54 = vadd.f32 %v4255_v20, %v8867_v52  ;;  %v6835_v46 = vadd.f32 %v4641_v57, %v8870_v35  ;;  %v4257_v24 = vpop.f32.mrb[190].mxu0  ;;  %v4643_v61 = vpop.f32.mrb[190].mxu1  ;;  %5247 = vmatprep.mubr.bf16.mxu0 %v4833_v22  ;;  %5408 = vmatprep.mubr.bf16.mxu1 %v4835_v19 }
 0x4c9   : > { %v6772_v56 = vadd.f32 %v4257_v24, %v8861_v44  ;;  %v6836_v30 = vadd.f32 %v4643_v61, %v8864_v6  ;;  %v4259_v28 = vpop.f32.mrb[191].mxu0  ;;  %v4645_v11 = vpop.f32.mrb[191].mxu1  ;;  %5248 = vmatmul.mubr.bf16.gmra.mrb[248].mxu0 %v4832_v33  ;;  %5409 = vmatmul.mubr.bf16.gmra.mrb[248].mxu1 %v4834_v29  ;;  %v4768_v34 = vmax.f32 %v6770_v2, 0.0  ;;  %v4770_v4 = vmax.f32 %v6834_v53, 0.0 }
 0x4ca   : > { %v6773_v42 = vadd.f32 %v4259_v28, %v8867_v52  ;;  %v6837_v45 = vadd.f32 %v4645_v11, %v8870_v35  ;;  %v4769_v25 = vmax.f32 %v6771_v54, 0.0  ;;  %v4771_v58 = vmax.f32 %v6835_v46, 0.0  ;;  %v9003_v35 = vld [vmem:[%s9116_s8] ss:$0 sm:$0xff] }
 0x4cb   : > { %v4772_v23 = vmax.f32 %v6772_v56, 0.0  ;;  %v4774_v27 = vmax.f32 %v6836_v30, 0.0 }
 0x4cc   : > { %v4773_v12 = vmax.f32 %v6773_v42, 0.0  ;;  %v4775_v14 = vmax.f32 %v6837_v45, 0.0 }
 0x4cd   : > { %v4836_v15 = vpack.c.bf16 %v4772_v23, %v4768_v34  ;;  %v4838_v44 = vpack.c.bf16 %v4774_v27, %v4770_v4 }
 0x4ce   : > { %v4837_v26 = vpack.c.bf16 %v4773_v12, %v4769_v25  ;;  %v4839_v6 = vpack.c.bf16 %v4775_v14, %v4771_v58 }
 0x4d0   : > { %5255 = vmatprep.mubr.bf16.mxu0 %v4837_v26  ;;  %5416 = vmatprep.mubr.bf16.mxu1 %v4839_v6 }
 0x4d1   : > { %5256 = vmatmul.mubr.bf16.gmra.mrb[252].mxu0 %v4836_v15  ;;  %5417 = vmatmul.mubr.bf16.gmra.mrb[252].mxu1 %v4838_v44 }
 0x52c   : > { %v6374_v16 = vpop.f32.mrb[192].mxu0  ;;  %v6486_v52 = vpop.f32.mrb[192].mxu1 }
 0x52d   : > { %v6375_v21 = vpop.f32.mrb[193].mxu0  ;;  %v6487_v32 = vpop.f32.mrb[193].mxu1 }
 0x52e   : > { %v6376_v5 = vadd.f32 %v6375_v21, %v6374_v16  ;;  %v6488_v10 = vadd.f32 %v6487_v32, %v6486_v52  ;;  %v6377_v39 = vpop.f32.mrb[194].mxu0  ;;  %v6489_v17 = vpop.f32.mrb[194].mxu1 }
 0x52f   : > { %v6378_v47 = vpop.f32.mrb[195].mxu0  ;;  %v6490_v50 = vpop.f32.mrb[195].mxu1 }
 0x530   : > { %v5138_v37 = vadd.f32 %v6376_v5, %v9003_v35  ;;  %v6379_v8 = vadd.f32 %v6378_v47, %v6377_v39  ;;  %v6491_v43 = vadd.f32 %v6490_v50, %v6489_v17 }
 0x532   : > { %v5299_v60 = vadd.f32 %v6488_v10, %v5138_v37  ;;  %v5141_v55 = vadd.f32 %v6379_v8, %v9003_v35 }
 0x534   : > { %v5425_v18 = vmul.f32 0.5, %v5299_v60  ;;  %v5302_v36 = vadd.f32 %v6491_v43, %v5141_v55  ;;  %v6380_v0 = vpop.f32.mrb[196].mxu0  ;;  %v6492_v7 = vpop.f32.mrb[196].mxu1 }
 0x535   : > { %v6381_v48 = vpop.f32.mrb[197].mxu0  ;;  %v6493_v31 = vpop.f32.mrb[197].mxu1 }
 0x536   : > { %7668 = vtanh.f32 %v5425_v18  ;;  %v5426_v59 = vmul.f32 0.5, %v5302_v36  ;;  %v6382_v63 = vadd.f32 %v6381_v48, %v6380_v0  ;;  %v6494_v13 = vadd.f32 %v6493_v31, %v6492_v7  ;;  %v6383_v51 = vpop.f32.mrb[198].mxu0  ;;  %v6495_v38 = vpop.f32.mrb[198].mxu1 }
 0x537   : > { %v6384_v40 = vpop.f32.mrb[199].mxu0  ;;  %v6496_v9 = vpop.f32.mrb[199].mxu1 }
 0x538   : > { %7670 = vtanh.f32 %v5426_v59  ;;  %v5146_v62 = vadd.f32 %v6382_v63, %v9003_v35  ;;  %v6385_v1 = vadd.f32 %v6384_v40, %v6383_v51  ;;  %v6497_v3 = vadd.f32 %v6496_v9, %v6495_v38 }
 0x53a   : > { %v5307_v33 = vadd.f32 %v6494_v13, %v5146_v62  ;;  %v5149_v29 = vadd.f32 %v6385_v1, %v9003_v35 }
 0x53c   : > { %v5427_v22 = vmul.f32 0.5, %v5307_v33  ;;  %v5310_v19 = vadd.f32 %v6497_v3, %v5149_v29  ;;  %v6386_v49 = vpop.f32.mrb[200].mxu0  ;;  %v6498_v41 = vpop.f32.mrb[200].mxu1 }
 0x53d   : > { %v6387_v2 = vpop.f32.mrb[201].mxu0  ;;  %v6499_v53 = vpop.f32.mrb[201].mxu1 }
 0x53e   : > { %7672 = vtanh.f32 %v5427_v22  ;;  %v5428_v20 = vmul.f32 0.5, %v5310_v19  ;;  %v6388_v57 = vadd.f32 %v6387_v2, %v6386_v49  ;;  %v6500_v54 = vadd.f32 %v6499_v53, %v6498_v41  ;;  %v6389_v46 = vpop.f32.mrb[202].mxu0  ;;  %v6501_v24 = vpop.f32.mrb[202].mxu1 }
 0x53f   : > { %v6390_v61 = vpop.f32.mrb[203].mxu0  ;;  %v6502_v56 = vpop.f32.mrb[203].mxu1 }
 0x540   : > { %v7669_v30 = vpop.eup %7668  ;;  %7674 = vtanh.f32 %v5428_v20  ;;  %v5154_v28 = vadd.f32 %v6388_v57, %v9003_v35  ;;  %v6391_v11 = vadd.f32 %v6390_v61, %v6389_v46  ;;  %v6503_v42 = vadd.f32 %v6502_v56, %v6501_v24 }
 0x541   : > { %v5489_v45 = vmul.f32 0.5, %v7669_v30 }
 0x542   : > { %v7671_v34 = vpop.eup %7670  ;;  %v5315_v4 = vadd.f32 %v6500_v54, %v5154_v28  ;;  %v5157_v23 = vadd.f32 %v6391_v11, %v9003_v35 }
 0x543   : > { %v5490_v27 = vmul.f32 0.5, %v7671_v34  ;;  %v5521_v15 = vadd.f32 0.5, %v5489_v45 }
 0x544   : > { %v5429_v25 = vmul.f32 0.5, %v5315_v4  ;;  %v5318_v58 = vadd.f32 %v6503_v42, %v5157_v23  ;;  %v6392_v12 = vpop.f32.mrb[204].mxu0  ;;  %v6504_v14 = vpop.f32.mrb[204].mxu1 }
 0x545   : > { %v5522_v44 = vadd.f32 0.5, %v5490_v27  ;;  %v6393_v26 = vpop.f32.mrb[205].mxu0  ;;  %v6505_v6 = vpop.f32.mrb[205].mxu1 }
 0x546   : > { %7676 = vtanh.f32 %v5429_v25  ;;  %v5430_v16 = vmul.f32 0.5, %v5318_v58  ;;  %v6394_v52 = vadd.f32 %v6393_v26, %v6392_v12  ;;  %v6506_v21 = vadd.f32 %v6505_v6, %v6504_v14  ;;  %v6395_v32 = vpop.f32.mrb[206].mxu0  ;;  %v6507_v5 = vpop.f32.mrb[206].mxu1 }
 0x547   : > { %v6266_v10 = vpack.c.bf16 %v5522_v44, %v5521_v15  ;;  %v6396_v39 = vpop.f32.mrb[207].mxu0  ;;  %v6508_v17 = vpop.f32.mrb[207].mxu1 }
 0x548   : > { %v7673_v47 = vpop.eup %7672  ;;  %7678 = vtanh.f32 %v5430_v16  ;;  %v5162_v50 = vadd.f32 %v6394_v52, %v9003_v35  ;;  %v6397_v37 = vadd.f32 %v6396_v39, %v6395_v32  ;;  %v6509_v8 = vadd.f32 %v6508_v17, %v6507_v5 }
 0x549   : > { %6267 = vst [vmem:[%s9014_s18] sm:$0xff] %v6266_v10   ;;  %v5491_v43 = vmul.f32 0.5, %v7673_v47 }
 0x54a   : > { %v7675_v60 = vpop.eup %7674  ;;  %v5323_v55 = vadd.f32 %v6506_v21, %v5162_v50  ;;  %v5165_v18 = vadd.f32 %v6397_v37, %v9003_v35 }
 0x54b   : > { %v5492_v36 = vmul.f32 0.5, %v7675_v60  ;;  %v5523_v59 = vadd.f32 0.5, %v5491_v43 }
 0x54c   : > { %v5431_v0 = vmul.f32 0.5, %v5323_v55  ;;  %v5326_v7 = vadd.f32 %v6509_v8, %v5165_v18  ;;  %v6398_v48 = vpop.f32.mrb[208].mxu0  ;;  %v6510_v31 = vpop.f32.mrb[208].mxu1 }
 0x54d   : > { %v5524_v63 = vadd.f32 0.5, %v5492_v36  ;;  %v6399_v13 = vpop.f32.mrb[209].mxu0  ;;  %v6511_v51 = vpop.f32.mrb[209].mxu1 }
 0x54e   : > { %7680 = vtanh.f32 %v5431_v0  ;;  %v5432_v38 = vmul.f32 0.5, %v5326_v7  ;;  %v6400_v40 = vadd.f32 %v6399_v13, %v6398_v48  ;;  %v6512_v9 = vadd.f32 %v6511_v51, %v6510_v31  ;;  %v6401_v62 = vpop.f32.mrb[210].mxu0  ;;  %v6513_v1 = vpop.f32.mrb[210].mxu1 }
 0x54f   : > { %v6271_v3 = vpack.c.bf16 %v5524_v63, %v5523_v59  ;;  %v6402_v33 = vpop.f32.mrb[211].mxu0  ;;  %v6514_v29 = vpop.f32.mrb[211].mxu1 }
 0x550   : > { %v7677_v22 = vpop.eup %7676  ;;  %7682 = vtanh.f32 %v5432_v38  ;;  %v5170_v19 = vadd.f32 %v6400_v40, %v9003_v35  ;;  %v6403_v49 = vadd.f32 %v6402_v33, %v6401_v62  ;;  %v6515_v41 = vadd.f32 %v6514_v29, %v6513_v1 }
 0x551   : > { %6343 = vst [vmem:[%s9014_s18 + $0x8] sm:$0xff] %v6271_v3   ;;  %v5493_v2 = vmul.f32 0.5, %v7677_v22 }
 0x552   : > { %v7679_v53 = vpop.eup %7678  ;;  %v5331_v20 = vadd.f32 %v6512_v9, %v5170_v19  ;;  %v5173_v57 = vadd.f32 %v6403_v49, %v9003_v35 }
 0x553   : > { %v5494_v54 = vmul.f32 0.5, %v7679_v53  ;;  %v5525_v30 = vadd.f32 0.5, %v5493_v2 }
 0x554   : > { %v5433_v46 = vmul.f32 0.5, %v5331_v20  ;;  %v5334_v24 = vadd.f32 %v6515_v41, %v5173_v57  ;;  %v6404_v61 = vpop.f32.mrb[212].mxu0  ;;  %v6516_v56 = vpop.f32.mrb[212].mxu1 }
 0x555   : > { %v5526_v28 = vadd.f32 0.5, %v5494_v54  ;;  %v6405_v11 = vpop.f32.mrb[213].mxu0  ;;  %v6517_v42 = vpop.f32.mrb[213].mxu1 }
 0x556   : > { %7684 = vtanh.f32 %v5433_v46  ;;  %v5434_v45 = vmul.f32 0.5, %v5334_v24  ;;  %v6406_v34 = vadd.f32 %v6405_v11, %v6404_v61  ;;  %v6518_v4 = vadd.f32 %v6517_v42, %v6516_v56  ;;  %v6407_v23 = vpop.f32.mrb[214].mxu0  ;;  %v6519_v27 = vpop.f32.mrb[214].mxu1 }
 0x557   : > { %v6276_v25 = vpack.c.bf16 %v5526_v28, %v5525_v30  ;;  %v6408_v58 = vpop.f32.mrb[215].mxu0  ;;  %v6520_v12 = vpop.f32.mrb[215].mxu1 }
 0x558   : > { %v7681_v14 = vpop.eup %7680  ;;  %7686 = vtanh.f32 %v5434_v45  ;;  %v5178_v15 = vadd.f32 %v6406_v34, %v9003_v35  ;;  %v6409_v44 = vadd.f32 %v6408_v58, %v6407_v23  ;;  %v6521_v26 = vadd.f32 %v6520_v12, %v6519_v27 }
 0x559   : > { %6344 = vst [vmem:[%s9014_s18 + $0x10] sm:$0xff] %v6276_v25   ;;  %v5495_v6 = vmul.f32 0.5, %v7681_v14 }
 0x55a   : > { %v7683_v16 = vpop.eup %7682  ;;  %v5339_v52 = vadd.f32 %v6518_v4, %v5178_v15  ;;  %v5181_v21 = vadd.f32 %v6409_v44, %v9003_v35 }
 0x55b   : > { %v5496_v32 = vmul.f32 0.5, %v7683_v16  ;;  %v5527_v47 = vadd.f32 0.5, %v5495_v6 }
 0x55c   : > { %v5435_v5 = vmul.f32 0.5, %v5339_v52  ;;  %v5342_v10 = vadd.f32 %v6521_v26, %v5181_v21  ;;  %v6410_v39 = vpop.f32.mrb[216].mxu0  ;;  %v6522_v17 = vpop.f32.mrb[216].mxu1 }
 0x55d   : > { %v5528_v50 = vadd.f32 0.5, %v5496_v32  ;;  %v6411_v37 = vpop.f32.mrb[217].mxu0  ;;  %v6523_v8 = vpop.f32.mrb[217].mxu1 }
 0x55e   : > { %7688 = vtanh.f32 %v5435_v5  ;;  %v5436_v43 = vmul.f32 0.5, %v5342_v10  ;;  %v6412_v60 = vadd.f32 %v6411_v37, %v6410_v39  ;;  %v6524_v55 = vadd.f32 %v6523_v8, %v6522_v17  ;;  %v6413_v18 = vpop.f32.mrb[218].mxu0  ;;  %v6525_v36 = vpop.f32.mrb[218].mxu1 }
 0x55f   : > { %v6281_v0 = vpack.c.bf16 %v5528_v50, %v5527_v47  ;;  %v6414_v7 = vpop.f32.mrb[219].mxu0  ;;  %v6526_v48 = vpop.f32.mrb[219].mxu1 }
 0x560   : > { %v7685_v31 = vpop.eup %7684  ;;  %7690 = vtanh.f32 %v5436_v43  ;;  %v5186_v59 = vadd.f32 %v6412_v60, %v9003_v35  ;;  %v6415_v63 = vadd.f32 %v6414_v7, %v6413_v18  ;;  %v6527_v13 = vadd.f32 %v6526_v48, %v6525_v36 }
 0x561   : > { %6345 = vst [vmem:[%s9014_s18 + $0x18] sm:$0xff] %v6281_v0   ;;  %v5497_v51 = vmul.f32 0.5, %v7685_v31 }
 0x562   : > { %v7687_v38 = vpop.eup %7686  ;;  %v5347_v40 = vadd.f32 %v6524_v55, %v5186_v59  ;;  %v5189_v9 = vadd.f32 %v6415_v63, %v9003_v35 }
 0x563   : > { %v5498_v62 = vmul.f32 0.5, %v7687_v38  ;;  %v5529_v22 = vadd.f32 0.5, %v5497_v51 }
 0x564   : > { %v5437_v1 = vmul.f32 0.5, %v5347_v40  ;;  %v5350_v3 = vadd.f32 %v6527_v13, %v5189_v9  ;;  %v6416_v33 = vpop.f32.mrb[220].mxu0  ;;  %v6528_v29 = vpop.f32.mrb[220].mxu1 }
 0x565   : > { %v5530_v19 = vadd.f32 0.5, %v5498_v62  ;;  %v6417_v49 = vpop.f32.mrb[221].mxu0  ;;  %v6529_v41 = vpop.f32.mrb[221].mxu1 }
 0x566   : > { %7692 = vtanh.f32 %v5437_v1  ;;  %v5438_v2 = vmul.f32 0.5, %v5350_v3  ;;  %v6418_v53 = vadd.f32 %v6417_v49, %v6416_v33  ;;  %v6530_v20 = vadd.f32 %v6529_v41, %v6528_v29  ;;  %v6419_v57 = vpop.f32.mrb[222].mxu0  ;;  %v6531_v54 = vpop.f32.mrb[222].mxu1 }
 0x567   : > { %v6286_v46 = vpack.c.bf16 %v5530_v19, %v5529_v22  ;;  %v6420_v24 = vpop.f32.mrb[223].mxu0  ;;  %v6532_v61 = vpop.f32.mrb[223].mxu1 }
 0x568   : > { %v7689_v56 = vpop.eup %7688  ;;  %7694 = vtanh.f32 %v5438_v2  ;;  %v5194_v30 = vadd.f32 %v6418_v53, %v9003_v35  ;;  %v6421_v28 = vadd.f32 %v6420_v24, %v6419_v57  ;;  %v6533_v11 = vadd.f32 %v6532_v61, %v6531_v54 }
 0x569   : > { %6346 = vst [vmem:[%s9014_s18 + $0x20] sm:$0xff] %v6286_v46   ;;  %v5499_v42 = vmul.f32 0.5, %v7689_v56 }
 0x56a   : > { %v7691_v45 = vpop.eup %7690  ;;  %v5355_v34 = vadd.f32 %v6530_v20, %v5194_v30  ;;  %v5197_v4 = vadd.f32 %v6421_v28, %v9003_v35 }
 0x56b   : > { %v5500_v23 = vmul.f32 0.5, %v7691_v45  ;;  %v5531_v14 = vadd.f32 0.5, %v5499_v42 }
 0x56c   : > { %v5439_v27 = vmul.f32 0.5, %v5355_v34  ;;  %v5358_v25 = vadd.f32 %v6533_v11, %v5197_v4  ;;  %v6422_v58 = vpop.f32.mrb[224].mxu0  ;;  %v6534_v12 = vpop.f32.mrb[224].mxu1 }
 0x56d   : > { %v5532_v15 = vadd.f32 0.5, %v5500_v23  ;;  %v6423_v44 = vpop.f32.mrb[225].mxu0  ;;  %v6535_v26 = vpop.f32.mrb[225].mxu1 }
 0x56e   : > { %7696 = vtanh.f32 %v5439_v27  ;;  %v5440_v6 = vmul.f32 0.5, %v5358_v25  ;;  %v6424_v16 = vadd.f32 %v6423_v44, %v6422_v58  ;;  %v6536_v52 = vadd.f32 %v6535_v26, %v6534_v12  ;;  %v6425_v21 = vpop.f32.mrb[226].mxu0  ;;  %v6537_v32 = vpop.f32.mrb[226].mxu1 }
 0x56f   : > { %v6291_v5 = vpack.c.bf16 %v5532_v15, %v5531_v14  ;;  %v6426_v10 = vpop.f32.mrb[227].mxu0  ;;  %v6538_v39 = vpop.f32.mrb[227].mxu1 }
 0x570   : > { %v7693_v17 = vpop.eup %7692  ;;  %7698 = vtanh.f32 %v5440_v6  ;;  %v5202_v47 = vadd.f32 %v6424_v16, %v9003_v35  ;;  %v6427_v50 = vadd.f32 %v6426_v10, %v6425_v21  ;;  %v6539_v37 = vadd.f32 %v6538_v39, %v6537_v32 }
 0x571   : > { %6347 = vst [vmem:[%s9014_s18 + $0x28] sm:$0xff] %v6291_v5   ;;  %v5501_v8 = vmul.f32 0.5, %v7693_v17 }
 0x572   : > { %v7695_v43 = vpop.eup %7694  ;;  %v5363_v60 = vadd.f32 %v6536_v52, %v5202_v47  ;;  %v5205_v55 = vadd.f32 %v6427_v50, %v9003_v35 }
 0x573   : > { %v5502_v18 = vmul.f32 0.5, %v7695_v43  ;;  %v5533_v31 = vadd.f32 0.5, %v5501_v8 }
 0x574   : > { %v5441_v36 = vmul.f32 0.5, %v5363_v60  ;;  %v5366_v0 = vadd.f32 %v6539_v37, %v5205_v55  ;;  %v6428_v7 = vpop.f32.mrb[228].mxu0  ;;  %v6540_v48 = vpop.f32.mrb[228].mxu1 }
 0x575   : > { %v5534_v59 = vadd.f32 0.5, %v5502_v18  ;;  %v6429_v63 = vpop.f32.mrb[229].mxu0  ;;  %v6541_v13 = vpop.f32.mrb[229].mxu1 }
 0x576   : > { %7700 = vtanh.f32 %v5441_v36  ;;  %v5442_v51 = vmul.f32 0.5, %v5366_v0  ;;  %v6430_v38 = vadd.f32 %v6429_v63, %v6428_v7  ;;  %v6542_v40 = vadd.f32 %v6541_v13, %v6540_v48  ;;  %v6431_v9 = vpop.f32.mrb[230].mxu0  ;;  %v6543_v62 = vpop.f32.mrb[230].mxu1 }
 0x577   : > { %v6296_v1 = vpack.c.bf16 %v5534_v59, %v5533_v31  ;;  %v6432_v3 = vpop.f32.mrb[231].mxu0  ;;  %v6544_v33 = vpop.f32.mrb[231].mxu1 }
 0x578   : > { %v7697_v29 = vpop.eup %7696  ;;  %7702 = vtanh.f32 %v5442_v51  ;;  %v5210_v22 = vadd.f32 %v6430_v38, %v9003_v35  ;;  %v6433_v19 = vadd.f32 %v6432_v3, %v6431_v9  ;;  %v6545_v49 = vadd.f32 %v6544_v33, %v6543_v62 }
 0x579   : > { %6348 = vst [vmem:[%s9014_s18 + $0x30] sm:$0xff] %v6296_v1   ;;  %v5503_v41 = vmul.f32 0.5, %v7697_v29 }
 0x57a   : > { %v7699_v2 = vpop.eup %7698  ;;  %v5371_v53 = vadd.f32 %v6542_v40, %v5210_v22  ;;  %v5213_v20 = vadd.f32 %v6433_v19, %v9003_v35 }
 0x57b   : > { %v5504_v57 = vmul.f32 0.5, %v7699_v2  ;;  %v5535_v56 = vadd.f32 0.5, %v5503_v41 }
 0x57c   : > { %v5443_v54 = vmul.f32 0.5, %v5371_v53  ;;  %v5374_v46 = vadd.f32 %v6545_v49, %v5213_v20  ;;  %v6434_v24 = vpop.f32.mrb[232].mxu0  ;;  %v6546_v61 = vpop.f32.mrb[232].mxu1 }
 0x57d   : > { %v5536_v30 = vadd.f32 0.5, %v5504_v57  ;;  %v6435_v28 = vpop.f32.mrb[233].mxu0  ;;  %v6547_v11 = vpop.f32.mrb[233].mxu1 }
 0x57e   : > { %7704 = vtanh.f32 %v5443_v54  ;;  %v5444_v42 = vmul.f32 0.5, %v5374_v46  ;;  %v6436_v45 = vadd.f32 %v6435_v28, %v6434_v24  ;;  %v6548_v34 = vadd.f32 %v6547_v11, %v6546_v61  ;;  %v6437_v4 = vpop.f32.mrb[234].mxu0  ;;  %v6549_v23 = vpop.f32.mrb[234].mxu1 }
 0x57f   : > { %v6301_v27 = vpack.c.bf16 %v5536_v30, %v5535_v56  ;;  %v6438_v25 = vpop.f32.mrb[235].mxu0  ;;  %v6550_v58 = vpop.f32.mrb[235].mxu1 }
 0x580   : > { %v7701_v12 = vpop.eup %7700  ;;  %7706 = vtanh.f32 %v5444_v42  ;;  %v5218_v14 = vadd.f32 %v6436_v45, %v9003_v35  ;;  %v6439_v15 = vadd.f32 %v6438_v25, %v6437_v4  ;;  %v6551_v44 = vadd.f32 %v6550_v58, %v6549_v23 }
 0x581   : > { %6349 = vst [vmem:[%s9014_s18 + $0x38] sm:$0xff] %v6301_v27   ;;  %v5505_v26 = vmul.f32 0.5, %v7701_v12 }
 0x582   : > { %v7703_v6 = vpop.eup %7702  ;;  %v5379_v16 = vadd.f32 %v6548_v34, %v5218_v14  ;;  %v5221_v52 = vadd.f32 %v6439_v15, %v9003_v35 }
 0x583   : > { %v5506_v21 = vmul.f32 0.5, %v7703_v6  ;;  %v5537_v17 = vadd.f32 0.5, %v5505_v26 }
 0x584   : > { %v5445_v32 = vmul.f32 0.5, %v5379_v16  ;;  %v5382_v5 = vadd.f32 %v6551_v44, %v5221_v52  ;;  %v6440_v10 = vpop.f32.mrb[236].mxu0  ;;  %v6552_v39 = vpop.f32.mrb[236].mxu1 }
 0x585   : > { %v5538_v47 = vadd.f32 0.5, %v5506_v21  ;;  %v6441_v50 = vpop.f32.mrb[237].mxu0  ;;  %v6553_v37 = vpop.f32.mrb[237].mxu1 }
 0x586   : > { %7708 = vtanh.f32 %v5445_v32  ;;  %v5446_v8 = vmul.f32 0.5, %v5382_v5  ;;  %v6442_v43 = vadd.f32 %v6441_v50, %v6440_v10  ;;  %v6554_v60 = vadd.f32 %v6553_v37, %v6552_v39  ;;  %v6443_v55 = vpop.f32.mrb[238].mxu0  ;;  %v6555_v18 = vpop.f32.mrb[238].mxu1 }
 0x587   : > { %v6306_v36 = vpack.c.bf16 %v5538_v47, %v5537_v17  ;;  %v6444_v0 = vpop.f32.mrb[239].mxu0  ;;  %v6556_v7 = vpop.f32.mrb[239].mxu1 }
 0x588   : > { %v7705_v48 = vpop.eup %7704  ;;  %7710 = vtanh.f32 %v5446_v8  ;;  %v5226_v31 = vadd.f32 %v6442_v43, %v9003_v35  ;;  %v6445_v59 = vadd.f32 %v6444_v0, %v6443_v55  ;;  %v6557_v63 = vadd.f32 %v6556_v7, %v6555_v18 }
 0x589   : > { %6350 = vst [vmem:[%s9014_s18 + $0x40] sm:$0xff] %v6306_v36   ;;  %v5507_v13 = vmul.f32 0.5, %v7705_v48 }
 0x58a   : > { %v7707_v51 = vpop.eup %7706  ;;  %v5387_v38 = vadd.f32 %v6554_v60, %v5226_v31  ;;  %v5229_v40 = vadd.f32 %v6445_v59, %v9003_v35 }
 0x58b   : > { %v5508_v9 = vmul.f32 0.5, %v7707_v51  ;;  %v5539_v29 = vadd.f32 0.5, %v5507_v13 }
 0x58c   : > { %v5447_v62 = vmul.f32 0.5, %v5387_v38  ;;  %v5390_v1 = vadd.f32 %v6557_v63, %v5229_v40  ;;  %v6446_v3 = vpop.f32.mrb[240].mxu0  ;;  %v6558_v33 = vpop.f32.mrb[240].mxu1 }
 0x58d   : > { %v5540_v22 = vadd.f32 0.5, %v5508_v9  ;;  %v6447_v19 = vpop.f32.mrb[241].mxu0  ;;  %v6559_v49 = vpop.f32.mrb[241].mxu1 }
 0x58e   : > { %7712 = vtanh.f32 %v5447_v62  ;;  %v5448_v41 = vmul.f32 0.5, %v5390_v1  ;;  %v6448_v2 = vadd.f32 %v6447_v19, %v6446_v3  ;;  %v6560_v53 = vadd.f32 %v6559_v49, %v6558_v33  ;;  %v6449_v20 = vpop.f32.mrb[242].mxu0  ;;  %v6561_v57 = vpop.f32.mrb[242].mxu1 }
 0x58f   : > { %v6311_v54 = vpack.c.bf16 %v5540_v22, %v5539_v29  ;;  %v6450_v46 = vpop.f32.mrb[243].mxu0  ;;  %v6562_v24 = vpop.f32.mrb[243].mxu1 }
 0x590   : > { %v7709_v61 = vpop.eup %7708  ;;  %7714 = vtanh.f32 %v5448_v41  ;;  %v5234_v56 = vadd.f32 %v6448_v2, %v9003_v35  ;;  %v6451_v30 = vadd.f32 %v6450_v46, %v6449_v20  ;;  %v6563_v28 = vadd.f32 %v6562_v24, %v6561_v57 }
 0x591   : > { %6351 = vst [vmem:[%s9014_s18 + $0x48] sm:$0xff] %v6311_v54   ;;  %v5509_v11 = vmul.f32 0.5, %v7709_v61 }
 0x592   : > { %v7711_v42 = vpop.eup %7710  ;;  %v5395_v45 = vadd.f32 %v6560_v53, %v5234_v56  ;;  %v5237_v34 = vadd.f32 %v6451_v30, %v9003_v35 }
 0x593   : > { %v5510_v4 = vmul.f32 0.5, %v7711_v42  ;;  %v5541_v12 = vadd.f32 0.5, %v5509_v11 }
 0x594   : > { %v5449_v23 = vmul.f32 0.5, %v5395_v45  ;;  %v5398_v27 = vadd.f32 %v6563_v28, %v5237_v34  ;;  %v6452_v25 = vpop.f32.mrb[244].mxu0  ;;  %v6564_v58 = vpop.f32.mrb[244].mxu1 }
 0x595   : > { %v5542_v14 = vadd.f32 0.5, %v5510_v4  ;;  %v6453_v15 = vpop.f32.mrb[245].mxu0  ;;  %v6565_v44 = vpop.f32.mrb[245].mxu1 }
 0x596   : > { %7716 = vtanh.f32 %v5449_v23  ;;  %v5450_v26 = vmul.f32 0.5, %v5398_v27  ;;  %v6454_v6 = vadd.f32 %v6453_v15, %v6452_v25  ;;  %v6566_v16 = vadd.f32 %v6565_v44, %v6564_v58  ;;  %v6455_v52 = vpop.f32.mrb[246].mxu0  ;;  %v6567_v21 = vpop.f32.mrb[246].mxu1 }
 0x597   : > { %v6316_v32 = vpack.c.bf16 %v5542_v14, %v5541_v12  ;;  %v6456_v5 = vpop.f32.mrb[247].mxu0  ;;  %v6568_v10 = vpop.f32.mrb[247].mxu1 }
 0x598   : > { %v7713_v39 = vpop.eup %7712  ;;  %7718 = vtanh.f32 %v5450_v26  ;;  %v5242_v17 = vadd.f32 %v6454_v6, %v9003_v35  ;;  %v6457_v47 = vadd.f32 %v6456_v5, %v6455_v52  ;;  %v6569_v50 = vadd.f32 %v6568_v10, %v6567_v21 }
 0x599   : > { %6352 = vst [vmem:[%s9014_s18 + $0x50] sm:$0xff] %v6316_v32   ;;  %v5511_v37 = vmul.f32 0.5, %v7713_v39 }
 0x59a   : > { %v7715_v8 = vpop.eup %7714  ;;  %v5403_v43 = vadd.f32 %v6566_v16, %v5242_v17  ;;  %v5245_v60 = vadd.f32 %v6457_v47, %v9003_v35 }
 0x59b   : > { %v5512_v55 = vmul.f32 0.5, %v7715_v8  ;;  %v5543_v48 = vadd.f32 0.5, %v5511_v37 }
 0x59c   : > { %v5451_v18 = vmul.f32 0.5, %v5403_v43  ;;  %v5406_v36 = vadd.f32 %v6569_v50, %v5245_v60  ;;  %v6458_v0 = vpop.f32.mrb[248].mxu0  ;;  %v6570_v7 = vpop.f32.mrb[248].mxu1 }
 0x59d   : > { %v5544_v31 = vadd.f32 0.5, %v5512_v55  ;;  %v6459_v59 = vpop.f32.mrb[249].mxu0  ;;  %v6571_v63 = vpop.f32.mrb[249].mxu1 }
 0x59e   : > { %7720 = vtanh.f32 %v5451_v18  ;;  %v5452_v13 = vmul.f32 0.5, %v5406_v36  ;;  %v6460_v51 = vadd.f32 %v6459_v59, %v6458_v0  ;;  %v6572_v38 = vadd.f32 %v6571_v63, %v6570_v7  ;;  %v6461_v40 = vpop.f32.mrb[250].mxu0  ;;  %v6573_v9 = vpop.f32.mrb[250].mxu1 }
 0x59f   : > { %v6321_v62 = vpack.c.bf16 %v5544_v31, %v5543_v48  ;;  %v6462_v1 = vpop.f32.mrb[251].mxu0  ;;  %v6574_v3 = vpop.f32.mrb[251].mxu1 }
 0x5a0   : > { %v7717_v33 = vpop.eup %7716  ;;  %7722 = vtanh.f32 %v5452_v13  ;;  %v5250_v29 = vadd.f32 %v6460_v51, %v9003_v35  ;;  %v6463_v22 = vadd.f32 %v6462_v1, %v6461_v40  ;;  %v6575_v19 = vadd.f32 %v6574_v3, %v6573_v9 }
 0x5a1   : > { %6353 = vst [vmem:[%s9014_s18 + $0x58] sm:$0xff] %v6321_v62   ;;  %v5513_v49 = vmul.f32 0.5, %v7717_v33 }
 0x5a2   : > { %v7719_v41 = vpop.eup %7718  ;;  %v5411_v2 = vadd.f32 %v6572_v38, %v5250_v29  ;;  %v5253_v53 = vadd.f32 %v6463_v22, %v9003_v35 }
 0x5a3   : > { %v5514_v20 = vmul.f32 0.5, %v7719_v41  ;;  %v5545_v61 = vadd.f32 0.5, %v5513_v49 }
 0x5a4   : > { %v5453_v57 = vmul.f32 0.5, %v5411_v2  ;;  %v5414_v54 = vadd.f32 %v6575_v19, %v5253_v53  ;;  %v6464_v46 = vpop.f32.mrb[252].mxu0  ;;  %v6576_v24 = vpop.f32.mrb[252].mxu1 }
 0x5a5   : > { %v5546_v56 = vadd.f32 0.5, %v5514_v20  ;;  %v6465_v30 = vpop.f32.mrb[253].mxu0  ;;  %v6577_v28 = vpop.f32.mrb[253].mxu1 }
 0x5a6   : > { %7724 = vtanh.f32 %v5453_v57  ;;  %v5454_v11 = vmul.f32 0.5, %v5414_v54  ;;  %v6466_v42 = vadd.f32 %v6465_v30, %v6464_v46  ;;  %v6578_v45 = vadd.f32 %v6577_v28, %v6576_v24  ;;  %v6467_v34 = vpop.f32.mrb[254].mxu0  ;;  %v6579_v4 = vpop.f32.mrb[254].mxu1 }
 0x5a7   : > { %v6326_v23 = vpack.c.bf16 %v5546_v56, %v5545_v61  ;;  %v6468_v27 = vpop.f32.mrb[255].mxu0  ;;  %v6580_v25 = vpop.f32.mrb[255].mxu1 }
 0x5a8   : > { %v7721_v58 = vpop.eup %7720  ;;  %7726 = vtanh.f32 %v5454_v11  ;;  %v5258_v12 = vadd.f32 %v6466_v42, %v9003_v35  ;;  %v6469_v14 = vadd.f32 %v6468_v27, %v6467_v34  ;;  %v6581_v15 = vadd.f32 %v6580_v25, %v6579_v4 }
 0x5a9   : > { %6354 = vst [vmem:[%s9014_s18 + $0x60] sm:$0xff] %v6326_v23   ;;  %v5515_v44 = vmul.f32 0.5, %v7721_v58 }
 0x5aa   : > { %v7723_v26 = vpop.eup %7722  ;;  %v5419_v6 = vadd.f32 %v6578_v45, %v5258_v12  ;;  %v5261_v16 = vadd.f32 %v6469_v14, %v9003_v35 }
 0x5ab   : > { %v5516_v52 = vmul.f32 0.5, %v7723_v26  ;;  %v5547_v5 = vadd.f32 0.5, %v5515_v44 }
 0x5ac   : > { %v5455_v21 = vmul.f32 0.5, %v5419_v6  ;;  %v5422_v32 = vadd.f32 %v6581_v15, %v5261_v16 }
 0x5ad   : > { %v5548_v10 = vadd.f32 0.5, %v5516_v52 }
 0x5ae   : > { %7728 = vtanh.f32 %v5455_v21  ;;  %v5456_v39 = vmul.f32 0.5, %v5422_v32 }
 0x5af   : > { %v6331_v17 = vpack.c.bf16 %v5548_v10, %v5547_v5 }
 0x5b0   : > { %v7725_v47 = vpop.eup %7724  ;;  %7730 = vtanh.f32 %v5456_v39 }
 0x5b1   : > { %6355 = vst [vmem:[%s9014_s18 + $0x68] sm:$0xff] %v6331_v17   ;;  %v5517_v50 = vmul.f32 0.5, %v7725_v47 }
 0x5b2   : > { %v7727_v37 = vpop.eup %7726 }
 0x5b3   : > { %v5518_v8 = vmul.f32 0.5, %v7727_v37  ;;  %v5549_v43 = vadd.f32 0.5, %v5517_v50 }
 0x5b5   : > { %v5550_v35 = vadd.f32 0.5, %v5518_v8 }
 0x5b7   : > { %v6336_v60 = vpack.c.bf16 %v5550_v35, %v5549_v43 }
 0x5b8   : > { %v7729_v55 = vpop.eup %7728 }
 0x5b9   : > { %6356 = vst [vmem:[%s9014_s18 + $0x70] sm:$0xff] %v6336_v60   ;;  %v5519_v18 = vmul.f32 0.5, %v7729_v55 }
 0x5ba   : > { %v7731_v36 = vpop.eup %7730 }
 0x5bb   : > { %v5520_v0 = vmul.f32 0.5, %v7731_v36  ;;  %v5551_v7 = vadd.f32 0.5, %v5519_v18 }
 0x5bd   : > { %v5552_v48 = vadd.f32 0.5, %v5520_v0 }
 0x5bf   : > { %v6341_v31 = vpack.c.bf16 %v5552_v48, %v5551_v7 }
 0x5c1   : > { %6357 = vst [vmem:[%s9014_s18 + $0x78] sm:$0xff] %v6341_v31  }
 0x5c2   : > { %7887 = shalt.err (!%p7884_p13)
}
 0x5c3   : > { %s7888_s26 = scalar_lea.hbm %s9061_s15, 2048  ;;  %s7892_s18 = scalar_lea.hbm %s9141_s22, 4096 }
 0x5c4   : > { %p7889_p9 = scmp.ne.s32.totalorder %s9061_s15, %s7888_s26  ;;  %p7893_p4 = scmp.lt.u32.totalorder %s9061_s15, %s9141_s22 }
 0x5c5   : > { %p7894_p8 = scmp.lt.u32.totalorder %s7892_s18, %s7888_s26  ;;  %p7896_p10 = scmp.lt.u32.totalorder %s7888_s26, %s9061_s15 }
 0x5c6   : > { %p7890_p0 = pnand %p7889_p9, %p8187_p3 }
 0x5c7   : > { %p7895_p6 = por %p7894_p8, %p7893_p4 }
 0x5c8   : > { %p7891_p11 = pneg %p7890_p0 }
 0x5c9   : > { %p7897_p5 = por %p7896_p10, %p7895_p6 }
 0x5cb   : > { %p7898_p7 = pnand %p7897_p5, %p7891_p11 }
 0x5cd   : > { %7901 = shalt.err (!%p7898_p7)
}
 0x5ce   : > { %s7961_s24 = smov 64   ;;  %s7962_s25 = smov 4  }
 0x5cf   : > { %7112 = dma.vmem_to_hbm [thread:$0]  (%p8187_p3), %s9063_s23, 2048, %s9061_s15, %s5714_s17, %s7961_s24, %s7961_s24, %s7962_s25  }
 0x5d0 PF: > { %s9142_s13 = sld [smem:[#allocation16_spill]]  ;;  %s9143_s14 = sld [smem:[#allocation17_spill]] }
 0x5d1   : > { %p9145_p1 = scmp.ge.s32.totalorder %s7948_s12, 2 }
 0x5d6   : > { %s5742_s19 = sand.u32 1, %s9142_s13   ;;  %p9144_p12 = scmp.ne.s32.totalorder %s9143_s14, 0 }
 0x5d7   : > { %s5743_s26 = scalar_lea.sflag [#allocation4], %s5742_s19 }
 0x5d8   : > { %p7132_p2 = pnand %p9145_p1, %p9144_p12 }
 0x5da   : > { %7931 = dma.done.wait (!%p7132_p2), %s5743_s26, 2048  }
 0x5db   : > { %7933 = vsyncadd (!%p7132_p2), %s5743_s26, 4294965248  ;;  %p24_p13 = scmp.ge.s32.totalorder %s8174_s9, 4   ;;  %s9146_s30 = smov %s7940_s10 }
 0x5dc   : > { %s9147_s10 = smov %s7944_s11  ;;  %s9148_s11 = smov %s8183_s28 }
 0x5dd   : > { %s9149_s12 = smov %s8174_s9  ;;  %26 = sbr.rel (!%p24_p13) target bundleno = 9 (0x9), region = 117 }
 0x5e4   :  { %5748 = vsyncpa [#allocation3], 1 }
 0x5e5   :  { %5750 = vsyncpa [#allocation3 + $0x1], 1 }
 0x5e6   :  { %5751 = vsyncpa [#allocation6], 1 }
 0x5e7   :  { %5752 = vsyncpa [#allocation9], 1 }
 0x5e8   :  { %5753 = vsyncpa [#allocation4], 1 }
 0x5e9   :  { %5755 = vsyncpa [#allocation4 + $0x1], 1 }

</bundles_post_ra>
